<compile_context>
chip_gen: v7x
topology: tpu7x:2x2x1
jax: 0.10.0
libtpu: 0.0.40
codegen_flags: <defaults>
</compile_context>

<pallas_src>
import functools

import jax
import jax.numpy as jnp
from jax.experimental import pallas as pl
from jax.experimental.pallas import tpu as pltpu


# ----------------------------------------------------------------------------
# Static shape bookkeeping (both convs have stride 2, as in the module)
# ----------------------------------------------------------------------------
def _derive_dims(input_dim, layers):
    C, H, W = input_dim
    if len(layers) != 2:
        raise NotImplementedError("fused kernel supports exactly two conv layers")
    (C1, k1), (C2, k2) = layers
    OH1 = (H - k1) // 2 + 1
    OW1 = (W - k1) // 2 + 1
    OH2 = (OH1 - k2) // 2 + 1
    OW2 = (OW1 - k2) // 2 + 1
    if C2 * OH2 * OW2 != 4096:
        raise ValueError(
            "Det_Encoder hard-codes nn.Linear(4096, z_dim); conv stack gives "
            f"{C2}*{OH2}*{OW2} = {C2 * OH2 * OW2}")
    if k1 > 4:
        raise NotImplementedError("patch builder assumes kernel_size_0 <= 4")
    return C, H, W, C1, k1, C2, k2, OH1, OW1, OH2, OW2


# ----------------------------------------------------------------------------
# Per-forward glue (raw input only): conv1 patches grouped by conv2 tap.
#
#   out[b, kh*k2+kw, oh*OW2+ow, c*k1*k1 + i*k1 + j]
#       = x[b, c, 4*oh + 2*kh + i, 4*ow + 2*kw + j]
#
# i.e. for conv2 tap t=(kh,kw) and conv2 output position (oh,ow), the 36-long
# conv1 patch of the conv1 output pixel that tap needs.  Combined stride of
# the two stride-2 convs is 4 and k1 <= 4, so each tap is a plain slice +
# group-of-4 reshape (no gather, no strided HLOs on intermediates).
# ----------------------------------------------------------------------------
def _build_conv_patches(x, k1, k2, oh2, ow2):
    B, C, H, W = x.shape
    s = 4  # stride(conv1) * stride(conv2)
    need_h = 2 * (k2 - 1) + s * oh2
    need_w = 2 * (k2 - 1) + s * ow2
    pad_h = max(0, need_h - H)
    pad_w = max(0, need_w - W)
    if pad_h or pad_w:
        # padded elements are never selected (only i,j < k1 are kept below)
        x = jnp.pad(x, ((0, 0), (0, 0), (0, pad_h), (0, pad_w)))
    slabs = []
    for kh in range(k2):
        for kw in range(k2):
            xt = x[:, :, 2 * kh: 2 * kh + s * oh2, 2 * kw: 2 * kw + s * ow2]
            xt = xt.reshape(B, C, oh2, s, ow2, s)[:, :, :, :k1, :, :k1]
            # xt[b, c, oh, i, ow, j] = x[b, c, 4*oh + 2*kh + i, 4*ow + 2*kw + j]
            slabs.append(xt)
    p = jnp.stack(slabs, axis=1)            # (B, k2*k2, C, oh2, k1, ow2, k1)
    p = p.transpose(0, 1, 3, 5, 2, 4, 6)    # (B, t, oh, ow, c, i, j)
    return p.reshape(B, k2 * k2, oh2 * ow2, C * k1 * k1)


# ----------------------------------------------------------------------------
# Fused Pallas kernel: one grid step == one sample.
# ----------------------------------------------------------------------------
def _det_encoder_kernel(p_ref, w1_ref, b1_ref, w2_ref, b2_ref, wz_ref, bz_ref,
                        o_ref, flat_ref, *, n_off, n_pos, c2):
    # conv1 (matmul+bias+ReLU) and conv2 accumulated per conv2 tap t=(kh,kw).
    acc = jnp.zeros((n_pos, c2), jnp.float32)
    for t in range(n_off):                                     # static unroll
        pt = p_ref[0, t]                                       # (n_pos, C*k1*k1)
        h1 = jnp.dot(pt, w1_ref[...], preferred_element_type=jnp.float32)
        h1 = jnp.maximum(h1 + b1_ref[...], 0.0)                # ReLU(conv1)
        acc = acc + jnp.dot(h1, w2_ref[t], preferred_element_type=jnp.float32)
    h2 = jnp.maximum(acc + b2_ref[...], 0.0)                   # (n_pos, c2)

    # Flatten (position q, channel c) -> lane q*c2 + c of a VMEM scratch row.
    # The torch (C,H,W) flatten order is folded into the column permutation of
    # wz at init, so this ordering is free to be the cheap one.
    for q in range(n_pos):                                     # static unroll
        flat_ref[:, pl.ds(q * c2, c2)] = h2[q:q + 1, :]

    z = jnp.dot(flat_ref[...], wz_ref[...], preferred_element_type=jnp.float32)
    o_ref[0] = (z + bz_ref[...]).astype(o_ref.dtype)


# ----------------------------------------------------------------------------
# Forward factory: all static layout/tiling decided once, forward is jitted.
# ----------------------------------------------------------------------------
def make_det_encoder_forward(input_dim, layers, z_dim):
    C, H, W, C1, k1, C2, k2, OH1, OW1, OH2, OW2 = _derive_dims(input_dim, layers)
    n_off = k2 * k2
    n_pos = OH2 * OW2
    kdim = C * k1 * k1
    feat = C2 * n_pos                                          # 4096

    kernel = functools.partial(_det_encoder_kernel,
                               n_off=n_off, n_pos=n_pos, c2=C2)

    def forward(packed, x):
        if tuple(x.shape[1:]) != tuple(input_dim):
            raise ValueError(
                "Input is of dimension {}, expected {}".format(
                    tuple(x.shape[1:]), tuple(input_dim)))
        B = x.shape[0]
        p1 = _build_conv_patches(x, k1, k2, OH2, OW2)          # (B, n_off, n_pos, kdim)

        z = pl.pallas_call(
            kernel,
            out_shape=jax.ShapeDtypeStruct((B, 1, z_dim), jnp.float32),
            grid=(B,),
            in_specs=[
                pl.BlockSpec((1, n_off, n_pos, kdim), lambda b: (b, 0, 0, 0)),
                pl.BlockSpec((kdim, C1), lambda b: (0, 0)),
                pl.BlockSpec((1, C1), lambda b: (0, 0)),
                pl.BlockSpec((n_off, C1, C2), lambda b: (0, 0, 0)),
                pl.BlockSpec((1, C2), lambda b: (0, 0)),
                pl.BlockSpec((feat, z_dim), lambda b: (0, 0)),
                pl.BlockSpec((1, z_dim), lambda b: (0, 0)),
            ],
            out_specs=pl.BlockSpec((1, 1, z_dim), lambda b: (b, 0, 0)),
            scratch_shapes=[pltpu.VMEM((1, feat), jnp.float32)],
            compiler_params=pltpu.CompilerParams(
                dimension_semantics=("parallel",),
                vmem_limit_bytes=32 * 1024 * 1024,
            ),
        )(p1, packed["w1"], packed["b1"], packed["w2"], packed["b2"],
          packed["wz"], packed["bz"])
        return z.reshape(B, z_dim)

    return jax.jit(forward)


# ----------------------------------------------------------------------------
# Parameter init (torch layouts, synthetic deterministic) + one-time packing
# ----------------------------------------------------------------------------
def xavier_uniform(key, shape, fan_in, fan_out):
    bound = (6.0 / (fan_in + fan_out)) ** 0.5
    return jax.random.uniform(key, shape, jnp.float32, -bound, bound)


def init_det_encoder(key, input_dim, layers, z_dim):
    """Mirrors Det_Encoder.__init__ shapes (torch layouts)."""
    params = {"convs": []}
    prev_c = input_dim[0]
    for (out_c, ksize) in layers:
        key, kw, kb = jax.random.split(key, 3)
        fan_in = prev_c * ksize * ksize
        fan_out = out_c * ksize * ksize
        w = xavier_uniform(kw, (out_c, prev_c, ksize, ksize), fan_in, fan_out)
        bb = 1.0 / (fan_in ** 0.5)
        b = jax.random.uniform(kb, (out_c,), jnp.float32, -bb, bb)
        params["convs"].append((w, b))
        prev_c = out_c
    key, kw, kb = jax.random.split(key, 3)
    params["z_w"] = xavier_uniform(kw, (z_dim, 4096), 4096, z_dim)  # torch Linear layout
    bb = 1.0 / (4096.0 ** 0.5)
    params["z_b"] = jax.random.uniform(kb, (z_dim,), jnp.float32, -bb, bb)
    return params


def pack_det_encoder_params(raw, input_dim, layers, z_dim):
    """One-time layout work: matmul-ready weights for the fused kernel."""
    C, H, W, C1, k1, C2, k2, OH1, OW1, OH2, OW2 = _derive_dims(input_dim, layers)
    (w1t, b1t), (w2t, b2t) = raw["convs"]
    n_pos = OH2 * OW2
    feat = C2 * n_pos

    w1 = w1t.reshape(C1, C * k1 * k1).T                         # (C*k1*k1, C1)
    b1 = b1t.reshape(1, C1)
    w2 = w2t.transpose(2, 3, 1, 0).reshape(k2 * k2, C1, C2)     # (tap, C1, C2)
    b2 = b2t.reshape(1, C2)

    # kernel flat index k = q*C2 + c  <->  torch flatten index = c*n_pos + q
    k = jnp.arange(feat)
    torch_k = (k % C2) * n_pos + (k // C2)
    wz = raw["z_w"].T[torch_k]                                  # (4096, z_dim)
    bz = raw["z_b"].reshape(1, z_dim)
    return {"w1": w1, "b1": b1, "w2": w2, "b2": b2, "wz": wz, "bz": bz}


# ----------------------------------------------------------------------------
# Pure-JAX reference (sanity check, uses the raw torch-layout params)
# ----------------------------------------------------------------------------
def det_encoder_reference(raw, x):
    hidden = x
    for (w, b) in raw["convs"]:
        hidden = jax.lax.conv_general_dilated(
            hidden, w, window_strides=(2, 2), padding="VALID",
            dimension_numbers=("NCHW", "OIHW", "NCHW"))
        hidden = jax.nn.relu(hidden + b[None, :, None, None])
    B = hidden.shape[0]
    hidden = hidden.reshape(B, -1)
    return hidden @ raw["z_w"].T + raw["z_b"]


if __name__ == "__main__":
    # Shapes chosen so the flattened conv output is exactly 4096 (required by
    # the module's hard-coded nn.Linear(4096, z_dim)):
    #   (4, 35, 35) --conv(16,k3,s2)--> (16,17,17) --conv(64,k3,s2)--> (64,8,8)
    input_dim = (4, 35, 35)
    layers = [[16, 3], [64, 3]]
    z_dim = 32
    batch = 2

    key = jax.random.PRNGKey(0)
    key, k_params, k_x = jax.random.split(key, 3)
    raw = init_det_encoder(k_params, input_dim, layers, z_dim)
    packed = pack_det_encoder_params(raw, input_dim, layers, z_dim)
    fwd = make_det_encoder_forward(input_dim, layers, z_dim)

    x = jax.random.normal(k_x, (batch,) + input_dim, dtype=jnp.float32)

    z = jax.block_until_ready(fwd(packed, x))
    assert z.shape == (batch, z_dim), z.shape

    z_ref = jax.block_until_ready(det_encoder_reference(raw, x))
    assert jnp.allclose(z, z_ref, rtol=1e-3, atol=1e-3), (
        "mismatch vs reference, max abs err = "
        f"{float(jnp.max(jnp.abs(z - z_ref)))}")

    print("KERNEL_OK")
</pallas_src>

<mosaic_0001>
module attributes {stable_mosaic.version = 11 : i64} {
  func.func @_det_encoder_kernel(%arg0: i32, %arg1: memref<1x9x64x36xf32, #tpu.memory_space<vmem>>, %arg2: memref<36x16xf32, #tpu.memory_space<vmem>>, %arg3: memref<1x16xf32, #tpu.memory_space<vmem>>, %arg4: memref<9x16x64xf32, #tpu.memory_space<vmem>>, %arg5: memref<1x64xf32, #tpu.memory_space<vmem>>, %arg6: memref<4096x32xf32, #tpu.memory_space<vmem>>, %arg7: memref<1x32xf32, #tpu.memory_space<vmem>>, %arg8: memref<1x1x32xf32, #tpu.memory_space<vmem>>, %arg9: memref<1x4096xf32, #tpu.memory_space<vmem>>) attributes {dimension_semantics = [#tpu.dimension_semantics<parallel>], iteration_bounds = array<i64: 2>, scalar_prefetch = 0 : i64, scratch_operands = 1 : i64, tpu.core_type = #tpu.core_type<tc>, window_params = [{transform_indices = @transform_0, window_bounds = array<i64: 1, 9, 64, 36>}, {pipeline_mode = #tpu.pipeline_mode<synchronous>, transform_indices = @transform_1, window_bounds = array<i64: 36, 16>}, {pipeline_mode = #tpu.pipeline_mode<synchronous>, transform_indices = @transform_2, window_bounds = array<i64: 1, 16>}, {pipeline_mode = #tpu.pipeline_mode<synchronous>, transform_indices = @transform_3, window_bounds = array<i64: 9, 16, 64>}, {pipeline_mode = #tpu.pipeline_mode<synchronous>, transform_indices = @transform_4, window_bounds = array<i64: 1, 64>}, {pipeline_mode = #tpu.pipeline_mode<synchronous>, transform_indices = @transform_5, window_bounds = array<i64: 4096, 32>}, {pipeline_mode = #tpu.pipeline_mode<synchronous>, transform_indices = @transform_6, window_bounds = array<i64: 1, 32>}, {transform_indices = @transform_7, window_bounds = array<i64: 1, 1, 32>}]} {
    %cst = arith.constant 0.000000e+00 : f32
    %0 = vector.broadcast %cst : f32 to vector<64x64xf32>
    %c0 = arith.constant 0 : index
    %c0_0 = arith.constant 0 : index
    %c0_1 = arith.constant 0 : index
    %c0_2 = arith.constant 0 : index
    %1 = vector.load %arg1[%c0, %c0_0, %c0_1, %c0_2] : memref<1x9x64x36xf32, #tpu.memory_space<vmem>>, vector<1x1x64x36xf32>
    %2 = vector.shape_cast %1 : vector<1x1x64x36xf32> to vector<64x36xf32>
    %c0_3 = arith.constant 0 : index
    %c0_4 = arith.constant 0 : index
    %3 = vector.load %arg2[%c0_3, %c0_4] : memref<36x16xf32, #tpu.memory_space<vmem>>, vector<36x16xf32>
    %cst_5 = arith.constant dense<0.000000e+00> : vector<64x16xf32>
    %4 = tpu.matmul %2, %3, %cst_5 {dimension_numbers = #tpu.dot_dimension_numbers<[1], [0], [0], [1], [0, 0, 1, 1], [], []>} : vector<64x36xf32>, vector<36x16xf32>, vector<64x16xf32> -> vector<64x16xf32>
    %c0_6 = arith.constant 0 : index
    %c0_7 = arith.constant 0 : index
    %5 = vector.load %arg3[%c0_6, %c0_7] : memref<1x16xf32, #tpu.memory_space<vmem>>, vector<1x16xf32>
    %6 = vector.broadcast %5 : vector<1x16xf32> to vector<64x16xf32>
    %7 = arith.addf %4, %6 : vector<64x16xf32>
    %cst_8 = arith.constant 0.000000e+00 : f32
    %8 = vector.broadcast %cst_8 : f32 to vector<64x16xf32>
    %9 = arith.maximumf %7, %8 : vector<64x16xf32>
    %c0_9 = arith.constant 0 : index
    %c0_10 = arith.constant 0 : index
    %c0_11 = arith.constant 0 : index
    %10 = vector.load %arg4[%c0_9, %c0_10, %c0_11] : memref<9x16x64xf32, #tpu.memory_space<vmem>>, vector<1x16x64xf32>
    %11 = vector.shape_cast %10 : vector<1x16x64xf32> to vector<16x64xf32>
    %cst_12 = arith.constant dense<0.000000e+00> : vector<64x64xf32>
    %12 = tpu.matmul %9, %11, %cst_12 {dimension_numbers = #tpu.dot_dimension_numbers<[1], [0], [0], [1], [0, 0, 1, 1], [], []>} : vector<64x16xf32>, vector<16x64xf32>, vector<64x64xf32> -> vector<64x64xf32>
    %13 = arith.addf %0, %12 : vector<64x64xf32>
    %c0_13 = arith.constant 0 : index
    %c1 = arith.constant 1 : index
    %c0_14 = arith.constant 0 : index
    %c0_15 = arith.constant 0 : index
    %14 = vector.load %arg1[%c0_13, %c1, %c0_14, %c0_15] : memref<1x9x64x36xf32, #tpu.memory_space<vmem>>, vector<1x1x64x36xf32>
    %15 = vector.shape_cast %14 : vector<1x1x64x36xf32> to vector<64x36xf32>
    %c0_16 = arith.constant 0 : index
    %c0_17 = arith.constant 0 : index
    %16 = vector.load %arg2[%c0_16, %c0_17] : memref<36x16xf32, #tpu.memory_space<vmem>>, vector<36x16xf32>
    %cst_18 = arith.constant dense<0.000000e+00> : vector<64x16xf32>
    %17 = tpu.matmul %15, %16, %cst_18 {dimension_numbers = #tpu.dot_dimension_numbers<[1], [0], [0], [1], [0, 0, 1, 1], [], []>} : vector<64x36xf32>, vector<36x16xf32>, vector<64x16xf32> -> vector<64x16xf32>
    %c0_19 = arith.constant 0 : index
    %c0_20 = arith.constant 0 : index
    %18 = vector.load %arg3[%c0_19, %c0_20] : memref<1x16xf32, #tpu.memory_space<vmem>>, vector<1x16xf32>
    %19 = vector.broadcast %18 : vector<1x16xf32> to vector<64x16xf32>
    %20 = arith.addf %17, %19 : vector<64x16xf32>
    %cst_21 = arith.constant 0.000000e+00 : f32
    %21 = vector.broadcast %cst_21 : f32 to vector<64x16xf32>
    %22 = arith.maximumf %20, %21 : vector<64x16xf32>
    %c1_22 = arith.constant 1 : index
    %c0_23 = arith.constant 0 : index
    %c0_24 = arith.constant 0 : index
    %23 = vector.load %arg4[%c1_22, %c0_23, %c0_24] : memref<9x16x64xf32, #tpu.memory_space<vmem>>, vector<1x16x64xf32>
    %24 = vector.shape_cast %23 : vector<1x16x64xf32> to vector<16x64xf32>
    %cst_25 = arith.constant dense<0.000000e+00> : vector<64x64xf32>
    %25 = tpu.matmul %22, %24, %cst_25 {dimension_numbers = #tpu.dot_dimension_numbers<[1], [0], [0], [1], [0, 0, 1, 1], [], []>} : vector<64x16xf32>, vector<16x64xf32>, vector<64x64xf32> -> vector<64x64xf32>
    %26 = arith.addf %13, %25 : vector<64x64xf32>
    %c0_26 = arith.constant 0 : index
    %c2 = arith.constant 2 : index
    %c0_27 = arith.constant 0 : index
    %c0_28 = arith.constant 0 : index
    %27 = vector.load %arg1[%c0_26, %c2, %c0_27, %c0_28] : memref<1x9x64x36xf32, #tpu.memory_space<vmem>>, vector<1x1x64x36xf32>
    %28 = vector.shape_cast %27 : vector<1x1x64x36xf32> to vector<64x36xf32>
    %c0_29 = arith.constant 0 : index
    %c0_30 = arith.constant 0 : index
    %29 = vector.load %arg2[%c0_29, %c0_30] : memref<36x16xf32, #tpu.memory_space<vmem>>, vector<36x16xf32>
    %cst_31 = arith.constant dense<0.000000e+00> : vector<64x16xf32>
    %30 = tpu.matmul %28, %29, %cst_31 {dimension_numbers = #tpu.dot_dimension_numbers<[1], [0], [0], [1], [0, 0, 1, 1], [], []>} : vector<64x36xf32>, vector<36x16xf32>, vector<64x16xf32> -> vector<64x16xf32>
    %c0_32 = arith.constant 0 : index
    %c0_33 = arith.constant 0 : index
    %31 = vector.load %arg3[%c0_32, %c0_33] : memref<1x16xf32, #tpu.memory_space<vmem>>, vector<1x16xf32>
    %32 = vector.broadcast %31 : vector<1x16xf32> to vector<64x16xf32>
    %33 = arith.addf %30, %32 : vector<64x16xf32>
    %cst_34 = arith.constant 0.000000e+00 : f32
    %34 = vector.broadcast %cst_34 : f32 to vector<64x16xf32>
    %35 = arith.maximumf %33, %34 : vector<64x16xf32>
    %c2_35 = arith.constant 2 : index
    %c0_36 = arith.constant 0 : index
    %c0_37 = arith.constant 0 : index
    %36 = vector.load %arg4[%c2_35, %c0_36, %c0_37] : memref<9x16x64xf32, #tpu.memory_space<vmem>>, vector<1x16x64xf32>
    %37 = vector.shape_cast %36 : vector<1x16x64xf32> to vector<16x64xf32>
    %cst_38 = arith.constant dense<0.000000e+00> : vector<64x64xf32>
    %38 = tpu.matmul %35, %37, %cst_38 {dimension_numbers = #tpu.dot_dimension_numbers<[1], [0], [0], [1], [0, 0, 1, 1], [], []>} : vector<64x16xf32>, vector<16x64xf32>, vector<64x64xf32> -> vector<64x64xf32>
    %39 = arith.addf %26, %38 : vector<64x64xf32>
    %c0_39 = arith.constant 0 : index
    %c3 = arith.constant 3 : index
    %c0_40 = arith.constant 0 : index
    %c0_41 = arith.constant 0 : index
    %40 = vector.load %arg1[%c0_39, %c3, %c0_40, %c0_41] : memref<1x9x64x36xf32, #tpu.memory_space<vmem>>, vector<1x1x64x36xf32>
    %41 = vector.shape_cast %40 : vector<1x1x64x36xf32> to vector<64x36xf32>
    %c0_42 = arith.constant 0 : index
    %c0_43 = arith.constant 0 : index
    %42 = vector.load %arg2[%c0_42, %c0_43] : memref<36x16xf32, #tpu.memory_space<vmem>>, vector<36x16xf32>
    %cst_44 = arith.constant dense<0.000000e+00> : vector<64x16xf32>
    %43 = tpu.matmul %41, %42, %cst_44 {dimension_numbers = #tpu.dot_dimension_numbers<[1], [0], [0], [1], [0, 0, 1, 1], [], []>} : vector<64x36xf32>, vector<36x16xf32>, vector<64x16xf32> -> vector<64x16xf32>
    %c0_45 = arith.constant 0 : index
    %c0_46 = arith.constant 0 : index
    %44 = vector.load %arg3[%c0_45, %c0_46] : memref<1x16xf32, #tpu.memory_space<vmem>>, vector<1x16xf32>
    %45 = vector.broadcast %44 : vector<1x16xf32> to vector<64x16xf32>
    %46 = arith.addf %43, %45 : vector<64x16xf32>
    %cst_47 = arith.constant 0.000000e+00 : f32
    %47 = vector.broadcast %cst_47 : f32 to vector<64x16xf32>
    %48 = arith.maximumf %46, %47 : vector<64x16xf32>
    %c3_48 = arith.constant 3 : index
    %c0_49 = arith.constant 0 : index
    %c0_50 = arith.constant 0 : index
    %49 = vector.load %arg4[%c3_48, %c0_49, %c0_50] : memref<9x16x64xf32, #tpu.memory_space<vmem>>, vector<1x16x64xf32>
    %50 = vector.shape_cast %49 : vector<1x16x64xf32> to vector<16x64xf32>
    %cst_51 = arith.constant dense<0.000000e+00> : vector<64x64xf32>
    %51 = tpu.matmul %48, %50, %cst_51 {dimension_numbers = #tpu.dot_dimension_numbers<[1], [0], [0], [1], [0, 0, 1, 1], [], []>} : vector<64x16xf32>, vector<16x64xf32>, vector<64x64xf32> -> vector<64x64xf32>
    %52 = arith.addf %39, %51 : vector<64x64xf32>
    %c0_52 = arith.constant 0 : index
    %c4 = arith.constant 4 : index
    %c0_53 = arith.constant 0 : index
    %c0_54 = arith.constant 0 : index
    %53 = vector.load %arg1[%c0_52, %c4, %c0_53, %c0_54] : memref<1x9x64x36xf32, #tpu.memory_space<vmem>>, vector<1x1x64x36xf32>
    %54 = vector.shape_cast %53 : vector<1x1x64x36xf32> to vector<64x36xf32>
    %c0_55 = arith.constant 0 : index
    %c0_56 = arith.constant 0 : index
    %55 = vector.load %arg2[%c0_55, %c0_56] : memref<36x16xf32, #tpu.memory_space<vmem>>, vector<36x16xf32>
    %cst_57 = arith.constant dense<0.000000e+00> : vector<64x16xf32>
    %56 = tpu.matmul %54, %55, %cst_57 {dimension_numbers = #tpu.dot_dimension_numbers<[1], [0], [0], [1], [0, 0, 1, 1], [], []>} : vector<64x36xf32>, vector<36x16xf32>, vector<64x16xf32> -> vector<64x16xf32>
    %c0_58 = arith.constant 0 : index
    %c0_59 = arith.constant 0 : index
    %57 = vector.load %arg3[%c0_58, %c0_59] : memref<1x16xf32, #tpu.memory_space<vmem>>, vector<1x16xf32>
    %58 = vector.broadcast %57 : vector<1x16xf32> to vector<64x16xf32>
    %59 = arith.addf %56, %58 : vector<64x16xf32>
    %cst_60 = arith.constant 0.000000e+00 : f32
    %60 = vector.broadcast %cst_60 : f32 to vector<64x16xf32>
    %61 = arith.maximumf %59, %60 : vector<64x16xf32>
    %c4_61 = arith.constant 4 : index
    %c0_62 = arith.constant 0 : index
    %c0_63 = arith.constant 0 : index
    %62 = vector.load %arg4[%c4_61, %c0_62, %c0_63] : memref<9x16x64xf32, #tpu.memory_space<vmem>>, vector<1x16x64xf32>
    %63 = vector.shape_cast %62 : vector<1x16x64xf32> to vector<16x64xf32>
    %cst_64 = arith.constant dense<0.000000e+00> : vector<64x64xf32>
    %64 = tpu.matmul %61, %63, %cst_64 {dimension_numbers = #tpu.dot_dimension_numbers<[1], [0], [0], [1], [0, 0, 1, 1], [], []>} : vector<64x16xf32>, vector<16x64xf32>, vector<64x64xf32> -> vector<64x64xf32>
    %65 = arith.addf %52, %64 : vector<64x64xf32>
    %c0_65 = arith.constant 0 : index
    %c5 = arith.constant 5 : index
    %c0_66 = arith.constant 0 : index
    %c0_67 = arith.constant 0 : index
    %66 = vector.load %arg1[%c0_65, %c5, %c0_66, %c0_67] : memref<1x9x64x36xf32, #tpu.memory_space<vmem>>, vector<1x1x64x36xf32>
    %67 = vector.shape_cast %66 : vector<1x1x64x36xf32> to vector<64x36xf32>
    %c0_68 = arith.constant 0 : index
    %c0_69 = arith.constant 0 : index
    %68 = vector.load %arg2[%c0_68, %c0_69] : memref<36x16xf32, #tpu.memory_space<vmem>>, vector<36x16xf32>
    %cst_70 = arith.constant dense<0.000000e+00> : vector<64x16xf32>
    %69 = tpu.matmul %67, %68, %cst_70 {dimension_numbers = #tpu.dot_dimension_numbers<[1], [0], [0], [1], [0, 0, 1, 1], [], []>} : vector<64x36xf32>, vector<36x16xf32>, vector<64x16xf32> -> vector<64x16xf32>
    %c0_71 = arith.constant 0 : index
    %c0_72 = arith.constant 0 : index
    %70 = vector.load %arg3[%c0_71, %c0_72] : memref<1x16xf32, #tpu.memory_space<vmem>>, vector<1x16xf32>
    %71 = vector.broadcast %70 : vector<1x16xf32> to vector<64x16xf32>
    %72 = arith.addf %69, %71 : vector<64x16xf32>
    %cst_73 = arith.constant 0.000000e+00 : f32
    %73 = vector.broadcast %cst_73 : f32 to vector<64x16xf32>
    %74 = arith.maximumf %72, %73 : vector<64x16xf32>
    %c5_74 = arith.constant 5 : index
    %c0_75 = arith.constant 0 : index
    %c0_76 = arith.constant 0 : index
    %75 = vector.load %arg4[%c5_74, %c0_75, %c0_76] : memref<9x16x64xf32, #tpu.memory_space<vmem>>, vector<1x16x64xf32>
    %76 = vector.shape_cast %75 : vector<1x16x64xf32> to vector<16x64xf32>
    %cst_77 = arith.constant dense<0.000000e+00> : vector<64x64xf32>
    %77 = tpu.matmul %74, %76, %cst_77 {dimension_numbers = #tpu.dot_dimension_numbers<[1], [0], [0], [1], [0, 0, 1, 1], [], []>} : vector<64x16xf32>, vector<16x64xf32>, vector<64x64xf32> -> vector<64x64xf32>
    %78 = arith.addf %65, %77 : vector<64x64xf32>
    %c0_78 = arith.constant 0 : index
    %c6 = arith.constant 6 : index
    %c0_79 = arith.constant 0 : index
    %c0_80 = arith.constant 0 : index
    %79 = vector.load %arg1[%c0_78, %c6, %c0_79, %c0_80] : memref<1x9x64x36xf32, #tpu.memory_space<vmem>>, vector<1x1x64x36xf32>
    %80 = vector.shape_cast %79 : vector<1x1x64x36xf32> to vector<64x36xf32>
    %c0_81 = arith.constant 0 : index
    %c0_82 = arith.constant 0 : index
    %81 = vector.load %arg2[%c0_81, %c0_82] : memref<36x16xf32, #tpu.memory_space<vmem>>, vector<36x16xf32>
    %cst_83 = arith.constant dense<0.000000e+00> : vector<64x16xf32>
    %82 = tpu.matmul %80, %81, %cst_83 {dimension_numbers = #tpu.dot_dimension_numbers<[1], [0], [0], [1], [0, 0, 1, 1], [], []>} : vector<64x36xf32>, vector<36x16xf32>, vector<64x16xf32> -> vector<64x16xf32>
    %c0_84 = arith.constant 0 : index
    %c0_85 = arith.constant 0 : index
    %83 = vector.load %arg3[%c0_84, %c0_85] : memref<1x16xf32, #tpu.memory_space<vmem>>, vector<1x16xf32>
    %84 = vector.broadcast %83 : vector<1x16xf32> to vector<64x16xf32>
    %85 = arith.addf %82, %84 : vector<64x16xf32>
    %cst_86 = arith.constant 0.000000e+00 : f32
    %86 = vector.broadcast %cst_86 : f32 to vector<64x16xf32>
    %87 = arith.maximumf %85, %86 : vector<64x16xf32>
    %c6_87 = arith.constant 6 : index
    %c0_88 = arith.constant 0 : index
    %c0_89 = arith.constant 0 : index
    %88 = vector.load %arg4[%c6_87, %c0_88, %c0_89] : memref<9x16x64xf32, #tpu.memory_space<vmem>>, vector<1x16x64xf32>
    %89 = vector.shape_cast %88 : vector<1x16x64xf32> to vector<16x64xf32>
    %cst_90 = arith.constant dense<0.000000e+00> : vector<64x64xf32>
    %90 = tpu.matmul %87, %89, %cst_90 {dimension_numbers = #tpu.dot_dimension_numbers<[1], [0], [0], [1], [0, 0, 1, 1], [], []>} : vector<64x16xf32>, vector<16x64xf32>, vector<64x64xf32> -> vector<64x64xf32>
    %91 = arith.addf %78, %90 : vector<64x64xf32>
    %c0_91 = arith.constant 0 : index
    %c7 = arith.constant 7 : index
    %c0_92 = arith.constant 0 : index
    %c0_93 = arith.constant 0 : index
    %92 = vector.load %arg1[%c0_91, %c7, %c0_92, %c0_93] : memref<1x9x64x36xf32, #tpu.memory_space<vmem>>, vector<1x1x64x36xf32>
    %93 = vector.shape_cast %92 : vector<1x1x64x36xf32> to vector<64x36xf32>
    %c0_94 = arith.constant 0 : index
    %c0_95 = arith.constant 0 : index
    %94 = vector.load %arg2[%c0_94, %c0_95] : memref<36x16xf32, #tpu.memory_space<vmem>>, vector<36x16xf32>
    %cst_96 = arith.constant dense<0.000000e+00> : vector<64x16xf32>
    %95 = tpu.matmul %93, %94, %cst_96 {dimension_numbers = #tpu.dot_dimension_numbers<[1], [0], [0], [1], [0, 0, 1, 1], [], []>} : vector<64x36xf32>, vector<36x16xf32>, vector<64x16xf32> -> vector<64x16xf32>
    %c0_97 = arith.constant 0 : index
    %c0_98 = arith.constant 0 : index
    %96 = vector.load %arg3[%c0_97, %c0_98] : memref<1x16xf32, #tpu.memory_space<vmem>>, vector<1x16xf32>
    %97 = vector.broadcast %96 : vector<1x16xf32> to vector<64x16xf32>
    %98 = arith.addf %95, %97 : vector<64x16xf32>
    %cst_99 = arith.constant 0.000000e+00 : f32
    %99 = vector.broadcast %cst_99 : f32 to vector<64x16xf32>
    %100 = arith.maximumf %98, %99 : vector<64x16xf32>
    %c7_100 = arith.constant 7 : index
    %c0_101 = arith.constant 0 : index
    %c0_102 = arith.constant 0 : index
    %101 = vector.load %arg4[%c7_100, %c0_101, %c0_102] : memref<9x16x64xf32, #tpu.memory_space<vmem>>, vector<1x16x64xf32>
    %102 = vector.shape_cast %101 : vector<1x16x64xf32> to vector<16x64xf32>
    %cst_103 = arith.constant dense<0.000000e+00> : vector<64x64xf32>
    %103 = tpu.matmul %100, %102, %cst_103 {dimension_numbers = #tpu.dot_dimension_numbers<[1], [0], [0], [1], [0, 0, 1, 1], [], []>} : vector<64x16xf32>, vector<16x64xf32>, vector<64x64xf32> -> vector<64x64xf32>
    %104 = arith.addf %91, %103 : vector<64x64xf32>
    %c0_104 = arith.constant 0 : index
    %c8 = arith.constant 8 : index
    %c0_105 = arith.constant 0 : index
    %c0_106 = arith.constant 0 : index
    %105 = vector.load %arg1[%c0_104, %c8, %c0_105, %c0_106] : memref<1x9x64x36xf32, #tpu.memory_space<vmem>>, vector<1x1x64x36xf32>
    %106 = vector.shape_cast %105 : vector<1x1x64x36xf32> to vector<64x36xf32>
    %c0_107 = arith.constant 0 : index
    %c0_108 = arith.constant 0 : index
    %107 = vector.load %arg2[%c0_107, %c0_108] : memref<36x16xf32, #tpu.memory_space<vmem>>, vector<36x16xf32>
    %cst_109 = arith.constant dense<0.000000e+00> : vector<64x16xf32>
    %108 = tpu.matmul %106, %107, %cst_109 {dimension_numbers = #tpu.dot_dimension_numbers<[1], [0], [0], [1], [0, 0, 1, 1], [], []>} : vector<64x36xf32>, vector<36x16xf32>, vector<64x16xf32> -> vector<64x16xf32>
    %c0_110 = arith.constant 0 : index
    %c0_111 = arith.constant 0 : index
    %109 = vector.load %arg3[%c0_110, %c0_111] : memref<1x16xf32, #tpu.memory_space<vmem>>, vector<1x16xf32>
    %110 = vector.broadcast %109 : vector<1x16xf32> to vector<64x16xf32>
    %111 = arith.addf %108, %110 : vector<64x16xf32>
    %cst_112 = arith.constant 0.000000e+00 : f32
    %112 = vector.broadcast %cst_112 : f32 to vector<64x16xf32>
    %113 = arith.maximumf %111, %112 : vector<64x16xf32>
    %c8_113 = arith.constant 8 : index
    %c0_114 = arith.constant 0 : index
    %c0_115 = arith.constant 0 : index
    %114 = vector.load %arg4[%c8_113, %c0_114, %c0_115] : memref<9x16x64xf32, #tpu.memory_space<vmem>>, vector<1x16x64xf32>
    %115 = vector.shape_cast %114 : vector<1x16x64xf32> to vector<16x64xf32>
    %cst_116 = arith.constant dense<0.000000e+00> : vector<64x64xf32>
    %116 = tpu.matmul %113, %115, %cst_116 {dimension_numbers = #tpu.dot_dimension_numbers<[1], [0], [0], [1], [0, 0, 1, 1], [], []>} : vector<64x16xf32>, vector<16x64xf32>, vector<64x64xf32> -> vector<64x64xf32>
    %117 = arith.addf %104, %116 : vector<64x64xf32>
    %c0_117 = arith.constant 0 : index
    %c0_118 = arith.constant 0 : index
    %118 = vector.load %arg5[%c0_117, %c0_118] : memref<1x64xf32, #tpu.memory_space<vmem>>, vector<1x64xf32>
    %119 = vector.broadcast %118 : vector<1x64xf32> to vector<64x64xf32>
    %120 = arith.addf %117, %119 : vector<64x64xf32>
    %cst_119 = arith.constant 0.000000e+00 : f32
    %121 = vector.broadcast %cst_119 : f32 to vector<64x64xf32>
    %122 = arith.maximumf %120, %121 : vector<64x64xf32>
    %123 = vector.extract_strided_slice %122 {offsets = [0, 0], sizes = [1, 64], strides = [1, 1]} : vector<64x64xf32> to vector<1x64xf32>
    %c0_120 = arith.constant 0 : index
    %c0_121 = arith.constant 0 : index
    %124 = vector.load %arg9[%c0_120, %c0_121] : memref<1x4096xf32, #tpu.memory_space<vmem>>, vector<1x64xf32>
    tpu.vector_store %arg9[%c0_120, %c0_121], %123 {strides = array<i32>} : memref<1x4096xf32, #tpu.memory_space<vmem>>, vector<1x64xf32>,
    %125 = vector.extract_strided_slice %122 {offsets = [1, 0], sizes = [1, 64], strides = [1, 1]} : vector<64x64xf32> to vector<1x64xf32>
    %c0_122 = arith.constant 0 : index
    %c64 = arith.constant 64 : index
    %126 = vector.load %arg9[%c0_122, %c64] : memref<1x4096xf32, #tpu.memory_space<vmem>>, vector<1x64xf32>
    tpu.vector_store %arg9[%c0_122, %c64], %125 {strides = array<i32>} : memref<1x4096xf32, #tpu.memory_space<vmem>>, vector<1x64xf32>,
    %127 = vector.extract_strided_slice %122 {offsets = [2, 0], sizes = [1, 64], strides = [1, 1]} : vector<64x64xf32> to vector<1x64xf32>
    %c0_123 = arith.constant 0 : index
    %c128 = arith.constant 128 : index
    %128 = vector.load %arg9[%c0_123, %c128] : memref<1x4096xf32, #tpu.memory_space<vmem>>, vector<1x64xf32>
    tpu.vector_store %arg9[%c0_123, %c128], %127 {strides = array<i32>} : memref<1x4096xf32, #tpu.memory_space<vmem>>, vector<1x64xf32>,
    %129 = vector.extract_strided_slice %122 {offsets = [3, 0], sizes = [1, 64], strides = [1, 1]} : vector<64x64xf32> to vector<1x64xf32>
    %c0_124 = arith.constant 0 : index
    %c192 = arith.constant 192 : index
    %130 = vector.load %arg9[%c0_124, %c192] : memref<1x4096xf32, #tpu.memory_space<vmem>>, vector<1x64xf32>
    tpu.vector_store %arg9[%c0_124, %c192], %129 {strides = array<i32>} : memref<1x4096xf32, #tpu.memory_space<vmem>>, vector<1x64xf32>,
    %131 = vector.extract_strided_slice %122 {offsets = [4, 0], sizes = [1, 64], strides = [1, 1]} : vector<64x64xf32> to vector<1x64xf32>
    %c0_125 = arith.constant 0 : index
    %c256 = arith.constant 256 : index
    %132 = vector.load %arg9[%c0_125, %c256] : memref<1x4096xf32, #tpu.memory_space<vmem>>, vector<1x64xf32>
    tpu.vector_store %arg9[%c0_125, %c256], %131 {strides = array<i32>} : memref<1x4096xf32, #tpu.memory_space<vmem>>, vector<1x64xf32>,
    %133 = vector.extract_strided_slice %122 {offsets = [5, 0], sizes = [1, 64], strides = [1, 1]} : vector<64x64xf32> to vector<1x64xf32>
    %c0_126 = arith.constant 0 : index
    %c320 = arith.constant 320 : index
    %134 = vector.load %arg9[%c0_126, %c320] : memref<1x4096xf32, #tpu.memory_space<vmem>>, vector<1x64xf32>
    tpu.vector_store %arg9[%c0_126, %c320], %133 {strides = array<i32>} : memref<1x4096xf32, #tpu.memory_space<vmem>>, vector<1x64xf32>,
    %135 = vector.extract_strided_slice %122 {offsets = [6, 0], sizes = [1, 64], strides = [1, 1]} : vector<64x64xf32> to vector<1x64xf32>
    %c0_127 = arith.constant 0 : index
    %c384 = arith.constant 384 : index
    %136 = vector.load %arg9[%c0_127, %c384] : memref<1x4096xf32, #tpu.memory_space<vmem>>, vector<1x64xf32>
    tpu.vector_store %arg9[%c0_127, %c384], %135 {strides = array<i32>} : memref<1x4096xf32, #tpu.memory_space<vmem>>, vector<1x64xf32>,
    %137 = vector.extract_strided_slice %122 {offsets = [7, 0], sizes = [1, 64], strides = [1, 1]} : vector<64x64xf32> to vector<1x64xf32>
    %c0_128 = arith.constant 0 : index
    %c448 = arith.constant 448 : index
    %138 = vector.load %arg9[%c0_128, %c448] : memref<1x4096xf32, #tpu.memory_space<vmem>>, vector<1x64xf32>
    tpu.vector_store %arg9[%c0_128, %c448], %137 {strides = array<i32>} : memref<1x4096xf32, #tpu.memory_space<vmem>>, vector<1x64xf32>,
    %139 = vector.extract_strided_slice %122 {offsets = [8, 0], sizes = [1, 64], strides = [1, 1]} : vector<64x64xf32> to vector<1x64xf32>
    %c0_129 = arith.constant 0 : index
    %c512 = arith.constant 512 : index
    %140 = vector.load %arg9[%c0_129, %c512] : memref<1x4096xf32, #tpu.memory_space<vmem>>, vector<1x64xf32>
    tpu.vector_store %arg9[%c0_129, %c512], %139 {strides = array<i32>} : memref<1x4096xf32, #tpu.memory_space<vmem>>, vector<1x64xf32>,
    %141 = vector.extract_strided_slice %122 {offsets = [9, 0], sizes = [1, 64], strides = [1, 1]} : vector<64x64xf32> to vector<1x64xf32>
    %c0_130 = arith.constant 0 : index
    %c576 = arith.constant 576 : index
    %142 = vector.load %arg9[%c0_130, %c576] : memref<1x4096xf32, #tpu.memory_space<vmem>>, vector<1x64xf32>
    tpu.vector_store %arg9[%c0_130, %c576], %141 {strides = array<i32>} : memref<1x4096xf32, #tpu.memory_space<vmem>>, vector<1x64xf32>,
    %143 = vector.extract_strided_slice %122 {offsets = [10, 0], sizes = [1, 64], strides = [1, 1]} : vector<64x64xf32> to vector<1x64xf32>
    %c0_131 = arith.constant 0 : index
    %c640 = arith.constant 640 : index
    %144 = vector.load %arg9[%c0_131, %c640] : memref<1x4096xf32, #tpu.memory_space<vmem>>, vector<1x64xf32>
    tpu.vector_store %arg9[%c0_131, %c640], %143 {strides = array<i32>} : memref<1x4096xf32, #tpu.memory_space<vmem>>, vector<1x64xf32>,
    %145 = vector.extract_strided_slice %122 {offsets = [11, 0], sizes = [1, 64], strides = [1, 1]} : vector<64x64xf32> to vector<1x64xf32>
    %c0_132 = arith.constant 0 : index
    %c704 = arith.constant 704 : index
    %146 = vector.load %arg9[%c0_132, %c704] : memref<1x4096xf32, #tpu.memory_space<vmem>>, vector<1x64xf32>
    tpu.vector_store %arg9[%c0_132, %c704], %145 {strides = array<i32>} : memref<1x4096xf32, #tpu.memory_space<vmem>>, vector<1x64xf32>,
    %147 = vector.extract_strided_slice %122 {offsets = [12, 0], sizes = [1, 64], strides = [1, 1]} : vector<64x64xf32> to vector<1x64xf32>
    %c0_133 = arith.constant 0 : index
    %c768 = arith.constant 768 : index
    %148 = vector.load %arg9[%c0_133, %c768] : memref<1x4096xf32, #tpu.memory_space<vmem>>, vector<1x64xf32>
    tpu.vector_store %arg9[%c0_133, %c768], %147 {strides = array<i32>} : memref<1x4096xf32, #tpu.memory_space<vmem>>, vector<1x64xf32>,
    %149 = vector.extract_strided_slice %122 {offsets = [13, 0], sizes = [1, 64], strides = [1, 1]} : vector<64x64xf32> to vector<1x64xf32>
    %c0_134 = arith.constant 0 : index
    %c832 = arith.constant 832 : index
    %150 = vector.load %arg9[%c0_134, %c832] : memref<1x4096xf32, #tpu.memory_space<vmem>>, vector<1x64xf32>
    tpu.vector_store %arg9[%c0_134, %c832], %149 {strides = array<i32>} : memref<1x4096xf32, #tpu.memory_space<vmem>>, vector<1x64xf32>,
    %151 = vector.extract_strided_slice %122 {offsets = [14, 0], sizes = [1, 64], strides = [1, 1]} : vector<64x64xf32> to vector<1x64xf32>
    %c0_135 = arith.constant 0 : index
    %c896 = arith.constant 896 : index
    %152 = vector.load %arg9[%c0_135, %c896] : memref<1x4096xf32, #tpu.memory_space<vmem>>, vector<1x64xf32>
    tpu.vector_store %arg9[%c0_135, %c896], %151 {strides = array<i32>} : memref<1x4096xf32, #tpu.memory_space<vmem>>, vector<1x64xf32>,
    %153 = vector.extract_strided_slice %122 {offsets = [15, 0], sizes = [1, 64], strides = [1, 1]} : vector<64x64xf32> to vector<1x64xf32>
    %c0_136 = arith.constant 0 : index
    %c960 = arith.constant 960 : index
    %154 = vector.load %arg9[%c0_136, %c960] : memref<1x4096xf32, #tpu.memory_space<vmem>>, vector<1x64xf32>
    tpu.vector_store %arg9[%c0_136, %c960], %153 {strides = array<i32>} : memref<1x4096xf32, #tpu.memory_space<vmem>>, vector<1x64xf32>,
    %155 = vector.extract_strided_slice %122 {offsets = [16, 0], sizes = [1, 64], strides = [1, 1]} : vector<64x64xf32> to vector<1x64xf32>
    %c0_137 = arith.constant 0 : index
    %c1024 = arith.constant 1024 : index
    %156 = vector.load %arg9[%c0_137, %c1024] : memref<1x4096xf32, #tpu.memory_space<vmem>>, vector<1x64xf32>
    tpu.vector_store %arg9[%c0_137, %c1024], %155 {strides = array<i32>} : memref<1x4096xf32, #tpu.memory_space<vmem>>, vector<1x64xf32>,
    %157 = vector.extract_strided_slice %122 {offsets = [17, 0], sizes = [1, 64], strides = [1, 1]} : vector<64x64xf32> to vector<1x64xf32>
    %c0_138 = arith.constant 0 : index
    %c1088 = arith.constant 1088 : index
    %158 = vector.load %arg9[%c0_138, %c1088] : memref<1x4096xf32, #tpu.memory_space<vmem>>, vector<1x64xf32>
    tpu.vector_store %arg9[%c0_138, %c1088], %157 {strides = array<i32>} : memref<1x4096xf32, #tpu.memory_space<vmem>>, vector<1x64xf32>,
    %159 = vector.extract_strided_slice %122 {offsets = [18, 0], sizes = [1, 64], strides = [1, 1]} : vector<64x64xf32> to vector<1x64xf32>
    %c0_139 = arith.constant 0 : index
    %c1152 = arith.constant 1152 : index
    %160 = vector.load %arg9[%c0_139, %c1152] : memref<1x4096xf32, #tpu.memory_space<vmem>>, vector<1x64xf32>
    tpu.vector_store %arg9[%c0_139, %c1152], %159 {strides = array<i32>} : memref<1x4096xf32, #tpu.memory_space<vmem>>, vector<1x64xf32>,
    %161 = vector.extract_strided_slice %122 {offsets = [19, 0], sizes = [1, 64], strides = [1, 1]} : vector<64x64xf32> to vector<1x64xf32>
    %c0_140 = arith.constant 0 : index
    %c1216 = arith.constant 1216 : index
    %162 = vector.load %arg9[%c0_140, %c1216] : memref<1x4096xf32, #tpu.memory_space<vmem>>, vector<1x64xf32>
    tpu.vector_store %arg9[%c0_140, %c1216], %161 {strides = array<i32>} : memref<1x4096xf32, #tpu.memory_space<vmem>>, vector<1x64xf32>,
    %163 = vector.extract_strided_slice %122 {offsets = [20, 0], sizes = [1, 64], strides = [1, 1]} : vector<64x64xf32> to vector<1x64xf32>
    %c0_141 = arith.constant 0 : index
    %c1280 = arith.constant 1280 : index
    %164 = vector.load %arg9[%c0_141, %c1280] : memref<1x4096xf32, #tpu.memory_space<vmem>>, vector<1x64xf32>
    tpu.vector_store %arg9[%c0_141, %c1280], %163 {strides = array<i32>} : memref<1x4096xf32, #tpu.memory_space<vmem>>, vector<1x64xf32>,
    %165 = vector.extract_strided_slice %122 {offsets = [21, 0], sizes = [1, 64], strides = [1, 1]} : vector<64x64xf32> to vector<1x64xf32>
    %c0_142 = arith.constant 0 : index
    %c1344 = arith.constant 1344 : index
    %166 = vector.load %arg9[%c0_142, %c1344] : memref<1x4096xf32, #tpu.memory_space<vmem>>, vector<1x64xf32>
    tpu.vector_store %arg9[%c0_142, %c1344], %165 {strides = array<i32>} : memref<1x4096xf32, #tpu.memory_space<vmem>>, vector<1x64xf32>,
    %167 = vector.extract_strided_slice %122 {offsets = [22, 0], sizes = [1, 64], strides = [1, 1]} : vector<64x64xf32> to vector<1x64xf32>
    %c0_143 = arith.constant 0 : index
    %c1408 = arith.constant 1408 : index
    %168 = vector.load %arg9[%c0_143, %c1408] : memref<1x4096xf32, #tpu.memory_space<vmem>>, vector<1x64xf32>
    tpu.vector_store %arg9[%c0_143, %c1408], %167 {strides = array<i32>} : memref<1x4096xf32, #tpu.memory_space<vmem>>, vector<1x64xf32>,
    %169 = vector.extract_strided_slice %122 {offsets = [23, 0], sizes = [1, 64], strides = [1, 1]} : vector<64x64xf32> to vector<1x64xf32>
    %c0_144 = arith.constant 0 : index
    %c1472 = arith.constant 1472 : index
    %170 = vector.load %arg9[%c0_144, %c1472] : memref<1x4096xf32, #tpu.memory_space<vmem>>, vector<1x64xf32>
    tpu.vector_store %arg9[%c0_144, %c1472], %169 {strides = array<i32>} : memref<1x4096xf32, #tpu.memory_space<vmem>>, vector<1x64xf32>,
    %171 = vector.extract_strided_slice %122 {offsets = [24, 0], sizes = [1, 64], strides = [1, 1]} : vector<64x64xf32> to vector<1x64xf32>
    %c0_145 = arith.constant 0 : index
    %c1536 = arith.constant 1536 : index
    %172 = vector.load %arg9[%c0_145, %c1536] : memref<1x4096xf32, #tpu.memory_space<vmem>>, vector<1x64xf32>
    tpu.vector_store %arg9[%c0_145, %c1536], %171 {strides = array<i32>} : memref<1x4096xf32, #tpu.memory_space<vmem>>, vector<1x64xf32>,
    %173 = vector.extract_strided_slice %122 {offsets = [25, 0], sizes = [1, 64], strides = [1, 1]} : vector<64x64xf32> to vector<1x64xf32>
    %c0_146 = arith.constant 0 : index
    %c1600 = arith.constant 1600 : index
    %174 = vector.load %arg9[%c0_146, %c1600] : memref<1x4096xf32, #tpu.memory_space<vmem>>, vector<1x64xf32>
    tpu.vector_store %arg9[%c0_146, %c1600], %173 {strides = array<i32>} : memref<1x4096xf32, #tpu.memory_space<vmem>>, vector<1x64xf32>,
    %175 = vector.extract_strided_slice %122 {offsets = [26, 0], sizes = [1, 64], strides = [1, 1]} : vector<64x64xf32> to vector<1x64xf32>
    %c0_147 = arith.constant 0 : index
    %c1664 = arith.constant 1664 : index
    %176 = vector.load %arg9[%c0_147, %c1664] : memref<1x4096xf32, #tpu.memory_space<vmem>>, vector<1x64xf32>
    tpu.vector_store %arg9[%c0_147, %c1664], %175 {strides = array<i32>} : memref<1x4096xf32, #tpu.memory_space<vmem>>, vector<1x64xf32>,
    %177 = vector.extract_strided_slice %122 {offsets = [27, 0], sizes = [1, 64], strides = [1, 1]} : vector<64x64xf32> to vector<1x64xf32>
    %c0_148 = arith.constant 0 : index
    %c1728 = arith.constant 1728 : index
    %178 = vector.load %arg9[%c0_148, %c1728] : memref<1x4096xf32, #tpu.memory_space<vmem>>, vector<1x64xf32>
    tpu.vector_store %arg9[%c0_148, %c1728], %177 {strides = array<i32>} : memref<1x4096xf32, #tpu.memory_space<vmem>>, vector<1x64xf32>,
    %179 = vector.extract_strided_slice %122 {offsets = [28, 0], sizes = [1, 64], strides = [1, 1]} : vector<64x64xf32> to vector<1x64xf32>
    %c0_149 = arith.constant 0 : index
    %c1792 = arith.constant 1792 : index
    %180 = vector.load %arg9[%c0_149, %c1792] : memref<1x4096xf32, #tpu.memory_space<vmem>>, vector<1x64xf32>
    tpu.vector_store %arg9[%c0_149, %c1792], %179 {strides = array<i32>} : memref<1x4096xf32, #tpu.memory_space<vmem>>, vector<1x64xf32>,
    %181 = vector.extract_strided_slice %122 {offsets = [29, 0], sizes = [1, 64], strides = [1, 1]} : vector<64x64xf32> to vector<1x64xf32>
    %c0_150 = arith.constant 0 : index
    %c1856 = arith.constant 1856 : index
    %182 = vector.load %arg9[%c0_150, %c1856] : memref<1x4096xf32, #tpu.memory_space<vmem>>, vector<1x64xf32>
    tpu.vector_store %arg9[%c0_150, %c1856], %181 {strides = array<i32>} : memref<1x4096xf32, #tpu.memory_space<vmem>>, vector<1x64xf32>,
    %183 = vector.extract_strided_slice %122 {offsets = [30, 0], sizes = [1, 64], strides = [1, 1]} : vector<64x64xf32> to vector<1x64xf32>
    %c0_151 = arith.constant 0 : index
    %c1920 = arith.constant 1920 : index
    %184 = vector.load %arg9[%c0_151, %c1920] : memref<1x4096xf32, #tpu.memory_space<vmem>>, vector<1x64xf32>
    tpu.vector_store %arg9[%c0_151, %c1920], %183 {strides = array<i32>} : memref<1x4096xf32, #tpu.memory_space<vmem>>, vector<1x64xf32>,
    %185 = vector.extract_strided_slice %122 {offsets = [31, 0], sizes = [1, 64], strides = [1, 1]} : vector<64x64xf32> to vector<1x64xf32>
    %c0_152 = arith.constant 0 : index
    %c1984 = arith.constant 1984 : index
    %186 = vector.load %arg9[%c0_152, %c1984] : memref<1x4096xf32, #tpu.memory_space<vmem>>, vector<1x64xf32>
    tpu.vector_store %arg9[%c0_152, %c1984], %185 {strides = array<i32>} : memref<1x4096xf32, #tpu.memory_space<vmem>>, vector<1x64xf32>,
    %187 = vector.extract_strided_slice %122 {offsets = [32, 0], sizes = [1, 64], strides = [1, 1]} : vector<64x64xf32> to vector<1x64xf32>
    %c0_153 = arith.constant 0 : index
    %c2048 = arith.constant 2048 : index
    %188 = vector.load %arg9[%c0_153, %c2048] : memref<1x4096xf32, #tpu.memory_space<vmem>>, vector<1x64xf32>
    tpu.vector_store %arg9[%c0_153, %c2048], %187 {strides = array<i32>} : memref<1x4096xf32, #tpu.memory_space<vmem>>, vector<1x64xf32>,
    %189 = vector.extract_strided_slice %122 {offsets = [33, 0], sizes = [1, 64], strides = [1, 1]} : vector<64x64xf32> to vector<1x64xf32>
    %c0_154 = arith.constant 0 : index
    %c2112 = arith.constant 2112 : index
    %190 = vector.load %arg9[%c0_154, %c2112] : memref<1x4096xf32, #tpu.memory_space<vmem>>, vector<1x64xf32>
    tpu.vector_store %arg9[%c0_154, %c2112], %189 {strides = array<i32>} : memref<1x4096xf32, #tpu.memory_space<vmem>>, vector<1x64xf32>,
    %191 = vector.extract_strided_slice %122 {offsets = [34, 0], sizes = [1, 64], strides = [1, 1]} : vector<64x64xf32> to vector<1x64xf32>
    %c0_155 = arith.constant 0 : index
    %c2176 = arith.constant 2176 : index
    %192 = vector.load %arg9[%c0_155, %c2176] : memref<1x4096xf32, #tpu.memory_space<vmem>>, vector<1x64xf32>
    tpu.vector_store %arg9[%c0_155, %c2176], %191 {strides = array<i32>} : memref<1x4096xf32, #tpu.memory_space<vmem>>, vector<1x64xf32>,
    %193 = vector.extract_strided_slice %122 {offsets = [35, 0], sizes = [1, 64], strides = [1, 1]} : vector<64x64xf32> to vector<1x64xf32>
    %c0_156 = arith.constant 0 : index
    %c2240 = arith.constant 2240 : index
    %194 = vector.load %arg9[%c0_156, %c2240] : memref<1x4096xf32, #tpu.memory_space<vmem>>, vector<1x64xf32>
    tpu.vector_store %arg9[%c0_156, %c2240], %193 {strides = array<i32>} : memref<1x4096xf32, #tpu.memory_space<vmem>>, vector<1x64xf32>,
    %195 = vector.extract_strided_slice %122 {offsets = [36, 0], sizes = [1, 64], strides = [1, 1]} : vector<64x64xf32> to vector<1x64xf32>
    %c0_157 = arith.constant 0 : index
    %c2304 = arith.constant 2304 : index
    %196 = vector.load %arg9[%c0_157, %c2304] : memref<1x4096xf32, #tpu.memory_space<vmem>>, vector<1x64xf32>
    tpu.vector_store %arg9[%c0_157, %c2304], %195 {strides = array<i32>} : memref<1x4096xf32, #tpu.memory_space<vmem>>, vector<1x64xf32>,
    %197 = vector.extract_strided_slice %122 {offsets = [37, 0], sizes = [1, 64], strides = [1, 1]} : vector<64x64xf32> to vector<1x64xf32>
    %c0_158 = arith.constant 0 : index
    %c2368 = arith.constant 2368 : index
    %198 = vector.load %arg9[%c0_158, %c2368] : memref<1x4096xf32, #tpu.memory_space<vmem>>, vector<1x64xf32>
    tpu.vector_store %arg9[%c0_158, %c2368], %197 {strides = array<i32>} : memref<1x4096xf32, #tpu.memory_space<vmem>>, vector<1x64xf32>,
    %199 = vector.extract_strided_slice %122 {offsets = [38, 0], sizes = [1, 64], strides = [1, 1]} : vector<64x64xf32> to vector<1x64xf32>
    %c0_159 = arith.constant 0 : index
    %c2432 = arith.constant 2432 : index
    %200 = vector.load %arg9[%c0_159, %c2432] : memref<1x4096xf32, #tpu.memory_space<vmem>>, vector<1x64xf32>
    tpu.vector_store %arg9[%c0_159, %c2432], %199 {strides = array<i32>} : memref<1x4096xf32, #tpu.memory_space<vmem>>, vector<1x64xf32>,
    %201 = vector.extract_strided_slice %122 {offsets = [39, 0], sizes = [1, 64], strides = [1, 1]} : vector<64x64xf32> to vector<1x64xf32>
    %c0_160 = arith.constant 0 : index
    %c2496 = arith.constant 2496 : index
    %202 = vector.load %arg9[%c0_160, %c2496] : memref<1x4096xf32, #tpu.memory_space<vmem>>, vector<1x64xf32>
    tpu.vector_store %arg9[%c0_160, %c2496], %201 {strides = array<i32>} : memref<1x4096xf32, #tpu.memory_space<vmem>>, vector<1x64xf32>,
    %203 = vector.extract_strided_slice %122 {offsets = [40, 0], sizes = [1, 64], strides = [1, 1]} : vector<64x64xf32> to vector<1x64xf32>
    %c0_161 = arith.constant 0 : index
    %c2560 = arith.constant 2560 : index
    %204 = vector.load %arg9[%c0_161, %c2560] : memref<1x4096xf32, #tpu.memory_space<vmem>>, vector<1x64xf32>
    tpu.vector_store %arg9[%c0_161, %c2560], %203 {strides = array<i32>} : memref<1x4096xf32, #tpu.memory_space<vmem>>, vector<1x64xf32>,
    %205 = vector.extract_strided_slice %122 {offsets = [41, 0], sizes = [1, 64], strides = [1, 1]} : vector<64x64xf32> to vector<1x64xf32>
    %c0_162 = arith.constant 0 : index
    %c2624 = arith.constant 2624 : index
    %206 = vector.load %arg9[%c0_162, %c2624] : memref<1x4096xf32, #tpu.memory_space<vmem>>, vector<1x64xf32>
    tpu.vector_store %arg9[%c0_162, %c2624], %205 {strides = array<i32>} : memref<1x4096xf32, #tpu.memory_space<vmem>>, vector<1x64xf32>,
    %207 = vector.extract_strided_slice %122 {offsets = [42, 0], sizes = [1, 64], strides = [1, 1]} : vector<64x64xf32> to vector<1x64xf32>
    %c0_163 = arith.constant 0 : index
    %c2688 = arith.constant 2688 : index
    %208 = vector.load %arg9[%c0_163, %c2688] : memref<1x4096xf32, #tpu.memory_space<vmem>>, vector<1x64xf32>
    tpu.vector_store %arg9[%c0_163, %c2688], %207 {strides = array<i32>} : memref<1x4096xf32, #tpu.memory_space<vmem>>, vector<1x64xf32>,
    %209 = vector.extract_strided_slice %122 {offsets = [43, 0], sizes = [1, 64], strides = [1, 1]} : vector<64x64xf32> to vector<1x64xf32>
    %c0_164 = arith.constant 0 : index
    %c2752 = arith.constant 2752 : index
    %210 = vector.load %arg9[%c0_164, %c2752] : memref<1x4096xf32, #tpu.memory_space<vmem>>, vector<1x64xf32>
    tpu.vector_store %arg9[%c0_164, %c2752], %209 {strides = array<i32>} : memref<1x4096xf32, #tpu.memory_space<vmem>>, vector<1x64xf32>,
    %211 = vector.extract_strided_slice %122 {offsets = [44, 0], sizes = [1, 64], strides = [1, 1]} : vector<64x64xf32> to vector<1x64xf32>
    %c0_165 = arith.constant 0 : index
    %c2816 = arith.constant 2816 : index
    %212 = vector.load %arg9[%c0_165, %c2816] : memref<1x4096xf32, #tpu.memory_space<vmem>>, vector<1x64xf32>
    tpu.vector_store %arg9[%c0_165, %c2816], %211 {strides = array<i32>} : memref<1x4096xf32, #tpu.memory_space<vmem>>, vector<1x64xf32>,
    %213 = vector.extract_strided_slice %122 {offsets = [45, 0], sizes = [1, 64], strides = [1, 1]} : vector<64x64xf32> to vector<1x64xf32>
    %c0_166 = arith.constant 0 : index
    %c2880 = arith.constant 2880 : index
    %214 = vector.load %arg9[%c0_166, %c2880] : memref<1x4096xf32, #tpu.memory_space<vmem>>, vector<1x64xf32>
    tpu.vector_store %arg9[%c0_166, %c2880], %213 {strides = array<i32>} : memref<1x4096xf32, #tpu.memory_space<vmem>>, vector<1x64xf32>,
    %215 = vector.extract_strided_slice %122 {offsets = [46, 0], sizes = [1, 64], strides = [1, 1]} : vector<64x64xf32> to vector<1x64xf32>
    %c0_167 = arith.constant 0 : index
    %c2944 = arith.constant 2944 : index
    %216 = vector.load %arg9[%c0_167, %c2944] : memref<1x4096xf32, #tpu.memory_space<vmem>>, vector<1x64xf32>
    tpu.vector_store %arg9[%c0_167, %c2944], %215 {strides = array<i32>} : memref<1x4096xf32, #tpu.memory_space<vmem>>, vector<1x64xf32>,
    %217 = vector.extract_strided_slice %122 {offsets = [47, 0], sizes = [1, 64], strides = [1, 1]} : vector<64x64xf32> to vector<1x64xf32>
    %c0_168 = arith.constant 0 : index
    %c3008 = arith.constant 3008 : index
    %218 = vector.load %arg9[%c0_168, %c3008] : memref<1x4096xf32, #tpu.memory_space<vmem>>, vector<1x64xf32>
    tpu.vector_store %arg9[%c0_168, %c3008], %217 {strides = array<i32>} : memref<1x4096xf32, #tpu.memory_space<vmem>>, vector<1x64xf32>,
    %219 = vector.extract_strided_slice %122 {offsets = [48, 0], sizes = [1, 64], strides = [1, 1]} : vector<64x64xf32> to vector<1x64xf32>
    %c0_169 = arith.constant 0 : index
    %c3072 = arith.constant 3072 : index
    %220 = vector.load %arg9[%c0_169, %c3072] : memref<1x4096xf32, #tpu.memory_space<vmem>>, vector<1x64xf32>
    tpu.vector_store %arg9[%c0_169, %c3072], %219 {strides = array<i32>} : memref<1x4096xf32, #tpu.memory_space<vmem>>, vector<1x64xf32>,
    %221 = vector.extract_strided_slice %122 {offsets = [49, 0], sizes = [1, 64], strides = [1, 1]} : vector<64x64xf32> to vector<1x64xf32>
    %c0_170 = arith.constant 0 : index
    %c3136 = arith.constant 3136 : index
    %222 = vector.load %arg9[%c0_170, %c3136] : memref<1x4096xf32, #tpu.memory_space<vmem>>, vector<1x64xf32>
    tpu.vector_store %arg9[%c0_170, %c3136], %221 {strides = array<i32>} : memref<1x4096xf32, #tpu.memory_space<vmem>>, vector<1x64xf32>,
    %223 = vector.extract_strided_slice %122 {offsets = [50, 0], sizes = [1, 64], strides = [1, 1]} : vector<64x64xf32> to vector<1x64xf32>
    %c0_171 = arith.constant 0 : index
    %c3200 = arith.constant 3200 : index
    %224 = vector.load %arg9[%c0_171, %c3200] : memref<1x4096xf32, #tpu.memory_space<vmem>>, vector<1x64xf32>
    tpu.vector_store %arg9[%c0_171, %c3200], %223 {strides = array<i32>} : memref<1x4096xf32, #tpu.memory_space<vmem>>, vector<1x64xf32>,
    %225 = vector.extract_strided_slice %122 {offsets = [51, 0], sizes = [1, 64], strides = [1, 1]} : vector<64x64xf32> to vector<1x64xf32>
    %c0_172 = arith.constant 0 : index
    %c3264 = arith.constant 3264 : index
    %226 = vector.load %arg9[%c0_172, %c3264] : memref<1x4096xf32, #tpu.memory_space<vmem>>, vector<1x64xf32>
    tpu.vector_store %arg9[%c0_172, %c3264], %225 {strides = array<i32>} : memref<1x4096xf32, #tpu.memory_space<vmem>>, vector<1x64xf32>,
    %227 = vector.extract_strided_slice %122 {offsets = [52, 0], sizes = [1, 64], strides = [1, 1]} : vector<64x64xf32> to vector<1x64xf32>
    %c0_173 = arith.constant 0 : index
    %c3328 = arith.constant 3328 : index
    %228 = vector.load %arg9[%c0_173, %c3328] : memref<1x4096xf32, #tpu.memory_space<vmem>>, vector<1x64xf32>
    tpu.vector_store %arg9[%c0_173, %c3328], %227 {strides = array<i32>} : memref<1x4096xf32, #tpu.memory_space<vmem>>, vector<1x64xf32>,
    %229 = vector.extract_strided_slice %122 {offsets = [53, 0], sizes = [1, 64], strides = [1, 1]} : vector<64x64xf32> to vector<1x64xf32>
    %c0_174 = arith.constant 0 : index
    %c3392 = arith.constant 3392 : index
    %230 = vector.load %arg9[%c0_174, %c3392] : memref<1x4096xf32, #tpu.memory_space<vmem>>, vector<1x64xf32>
    tpu.vector_store %arg9[%c0_174, %c3392], %229 {strides = array<i32>} : memref<1x4096xf32, #tpu.memory_space<vmem>>, vector<1x64xf32>,
    %231 = vector.extract_strided_slice %122 {offsets = [54, 0], sizes = [1, 64], strides = [1, 1]} : vector<64x64xf32> to vector<1x64xf32>
    %c0_175 = arith.constant 0 : index
    %c3456 = arith.constant 3456 : index
    %232 = vector.load %arg9[%c0_175, %c3456] : memref<1x4096xf32, #tpu.memory_space<vmem>>, vector<1x64xf32>
    tpu.vector_store %arg9[%c0_175, %c3456], %231 {strides = array<i32>} : memref<1x4096xf32, #tpu.memory_space<vmem>>, vector<1x64xf32>,
    %233 = vector.extract_strided_slice %122 {offsets = [55, 0], sizes = [1, 64], strides = [1, 1]} : vector<64x64xf32> to vector<1x64xf32>
    %c0_176 = arith.constant 0 : index
    %c3520 = arith.constant 3520 : index
    %234 = vector.load %arg9[%c0_176, %c3520] : memref<1x4096xf32, #tpu.memory_space<vmem>>, vector<1x64xf32>
    tpu.vector_store %arg9[%c0_176, %c3520], %233 {strides = array<i32>} : memref<1x4096xf32, #tpu.memory_space<vmem>>, vector<1x64xf32>,
    %235 = vector.extract_strided_slice %122 {offsets = [56, 0], sizes = [1, 64], strides = [1, 1]} : vector<64x64xf32> to vector<1x64xf32>
    %c0_177 = arith.constant 0 : index
    %c3584 = arith.constant 3584 : index
    %236 = vector.load %arg9[%c0_177, %c3584] : memref<1x4096xf32, #tpu.memory_space<vmem>>, vector<1x64xf32>
    tpu.vector_store %arg9[%c0_177, %c3584], %235 {strides = array<i32>} : memref<1x4096xf32, #tpu.memory_space<vmem>>, vector<1x64xf32>,
    %237 = vector.extract_strided_slice %122 {offsets = [57, 0], sizes = [1, 64], strides = [1, 1]} : vector<64x64xf32> to vector<1x64xf32>
    %c0_178 = arith.constant 0 : index
    %c3648 = arith.constant 3648 : index
    %238 = vector.load %arg9[%c0_178, %c3648] : memref<1x4096xf32, #tpu.memory_space<vmem>>, vector<1x64xf32>
    tpu.vector_store %arg9[%c0_178, %c3648], %237 {strides = array<i32>} : memref<1x4096xf32, #tpu.memory_space<vmem>>, vector<1x64xf32>,
    %239 = vector.extract_strided_slice %122 {offsets = [58, 0], sizes = [1, 64], strides = [1, 1]} : vector<64x64xf32> to vector<1x64xf32>
    %c0_179 = arith.constant 0 : index
    %c3712 = arith.constant 3712 : index
    %240 = vector.load %arg9[%c0_179, %c3712] : memref<1x4096xf32, #tpu.memory_space<vmem>>, vector<1x64xf32>
    tpu.vector_store %arg9[%c0_179, %c3712], %239 {strides = array<i32>} : memref<1x4096xf32, #tpu.memory_space<vmem>>, vector<1x64xf32>,
    %241 = vector.extract_strided_slice %122 {offsets = [59, 0], sizes = [1, 64], strides = [1, 1]} : vector<64x64xf32> to vector<1x64xf32>
    %c0_180 = arith.constant 0 : index
    %c3776 = arith.constant 3776 : index
    %242 = vector.load %arg9[%c0_180, %c3776] : memref<1x4096xf32, #tpu.memory_space<vmem>>, vector<1x64xf32>
    tpu.vector_store %arg9[%c0_180, %c3776], %241 {strides = array<i32>} : memref<1x4096xf32, #tpu.memory_space<vmem>>, vector<1x64xf32>,
    %243 = vector.extract_strided_slice %122 {offsets = [60, 0], sizes = [1, 64], strides = [1, 1]} : vector<64x64xf32> to vector<1x64xf32>
    %c0_181 = arith.constant 0 : index
    %c3840 = arith.constant 3840 : index
    %244 = vector.load %arg9[%c0_181, %c3840] : memref<1x4096xf32, #tpu.memory_space<vmem>>, vector<1x64xf32>
    tpu.vector_store %arg9[%c0_181, %c3840], %243 {strides = array<i32>} : memref<1x4096xf32, #tpu.memory_space<vmem>>, vector<1x64xf32>,
    %245 = vector.extract_strided_slice %122 {offsets = [61, 0], sizes = [1, 64], strides = [1, 1]} : vector<64x64xf32> to vector<1x64xf32>
    %c0_182 = arith.constant 0 : index
    %c3904 = arith.constant 3904 : index
    %246 = vector.load %arg9[%c0_182, %c3904] : memref<1x4096xf32, #tpu.memory_space<vmem>>, vector<1x64xf32>
    tpu.vector_store %arg9[%c0_182, %c3904], %245 {strides = array<i32>} : memref<1x4096xf32, #tpu.memory_space<vmem>>, vector<1x64xf32>,
    %247 = vector.extract_strided_slice %122 {offsets = [62, 0], sizes = [1, 64], strides = [1, 1]} : vector<64x64xf32> to vector<1x64xf32>
    %c0_183 = arith.constant 0 : index
    %c3968 = arith.constant 3968 : index
    %248 = vector.load %arg9[%c0_183, %c3968] : memref<1x4096xf32, #tpu.memory_space<vmem>>, vector<1x64xf32>
    tpu.vector_store %arg9[%c0_183, %c3968], %247 {strides = array<i32>} : memref<1x4096xf32, #tpu.memory_space<vmem>>, vector<1x64xf32>,
    %249 = vector.extract_strided_slice %122 {offsets = [63, 0], sizes = [1, 64], strides = [1, 1]} : vector<64x64xf32> to vector<1x64xf32>
    %c0_184 = arith.constant 0 : index
    %c4032 = arith.constant 4032 : index
    %250 = vector.load %arg9[%c0_184, %c4032] : memref<1x4096xf32, #tpu.memory_space<vmem>>, vector<1x64xf32>
    tpu.vector_store %arg9[%c0_184, %c4032], %249 {strides = array<i32>} : memref<1x4096xf32, #tpu.memory_space<vmem>>, vector<1x64xf32>,
    %c0_185 = arith.constant 0 : index
    %c0_186 = arith.constant 0 : index
    %251 = vector.load %arg9[%c0_185, %c0_186] : memref<1x4096xf32, #tpu.memory_space<vmem>>, vector<1x4096xf32>
    %c0_187 = arith.constant 0 : index
    %c0_188 = arith.constant 0 : index
    %252 = vector.load %arg6[%c0_187, %c0_188] : memref<4096x32xf32, #tpu.memory_space<vmem>>, vector<4096x32xf32>
    %cst_189 = arith.constant dense<0.000000e+00> : vector<1x32xf32>
    %253 = tpu.matmul %251, %252, %cst_189 {dimension_numbers = #tpu.dot_dimension_numbers<[1], [0], [0], [1], [0, 0, 1, 1], [], []>} : vector<1x4096xf32>, vector<4096x32xf32>, vector<1x32xf32> -> vector<1x32xf32>
    %c0_190 = arith.constant 0 : index
    %c0_191 = arith.constant 0 : index
    %254 = vector.load %arg7[%c0_190, %c0_191] : memref<1x32xf32, #tpu.memory_space<vmem>>, vector<1x32xf32>
    %255 = arith.addf %253, %254 : vector<1x32xf32>
    %c0_192 = arith.constant 0 : index
    %c0_193 = arith.constant 0 : index
    %c0_194 = arith.constant 0 : index
    %256 = vector.load %arg8[%c0_192, %c0_193, %c0_194] : memref<1x1x32xf32, #tpu.memory_space<vmem>>, vector<1x1x32xf32>
    %257 = vector.shape_cast %256 : vector<1x1x32xf32> to vector<1x32xf32>
    %258 = vector.shape_cast %255 : vector<1x32xf32> to vector<1x1x32xf32>
    tpu.vector_store %arg8[%c0_192, %c0_193, %c0_194], %258 {strides = array<i32>} : memref<1x1x32xf32, #tpu.memory_space<vmem>>, vector<1x1x32xf32>,
    return
  }
  func.func @transform_0(%arg0: i32) -> (i32, i32, i32, i32) {
    %c0_i32 = arith.constant 0 : i32
    %c0_i32_0 = arith.constant 0 : i32
    %c0_i32_1 = arith.constant 0 : i32
    %c0_i32_2 = arith.constant 0 : i32
    return %arg0, %c0_i32, %c0_i32_0, %c0_i32_1 : i32, i32, i32, i32
  }
  func.func @transform_1(%arg0: i32) -> (i32, i32) {
    %c0_i32 = arith.constant 0 : i32
    %c0_i32_0 = arith.constant 0 : i32
    %c0_i32_1 = arith.constant 0 : i32
    return %c0_i32, %c0_i32_0 : i32, i32
  }
  func.func @transform_2(%arg0: i32) -> (i32, i32) {
    %c0_i32 = arith.constant 0 : i32
    %c0_i32_0 = arith.constant 0 : i32
    %c0_i32_1 = arith.constant 0 : i32
    return %c0_i32, %c0_i32_0 : i32, i32
  }
  func.func @transform_3(%arg0: i32) -> (i32, i32, i32) {
    %c0_i32 = arith.constant 0 : i32
    %c0_i32_0 = arith.constant 0 : i32
    %c0_i32_1 = arith.constant 0 : i32
    %c0_i32_2 = arith.constant 0 : i32
    return %c0_i32, %c0_i32_0, %c0_i32_1 : i32, i32, i32
  }
  func.func @transform_4(%arg0: i32) -> (i32, i32) {
    %c0_i32 = arith.constant 0 : i32
    %c0_i32_0 = arith.constant 0 : i32
    %c0_i32_1 = arith.constant 0 : i32
    return %c0_i32, %c0_i32_0 : i32, i32
  }
  func.func @transform_5(%arg0: i32) -> (i32, i32) {
    %c0_i32 = arith.constant 0 : i32
    %c0_i32_0 = arith.constant 0 : i32
    %c0_i32_1 = arith.constant 0 : i32
    return %c0_i32, %c0_i32_0 : i32, i32
  }
  func.func @transform_6(%arg0: i32) -> (i32, i32) {
    %c0_i32 = arith.constant 0 : i32
    %c0_i32_0 = arith.constant 0 : i32
    %c0_i32_1 = arith.constant 0 : i32
    return %c0_i32, %c0_i32_0 : i32, i32
  }
  func.func @transform_7(%arg0: i32) -> (i32, i32, i32) {
    %c0_i32 = arith.constant 0 : i32
    %c0_i32_0 = arith.constant 0 : i32
    %c0_i32_1 = arith.constant 0 : i32
    return %arg0, %c0_i32, %c0_i32_0 : i32, i32, i32
  }
}

</mosaic_0001>

<bundles_post_ra>
// kernel: forward.1
= control target key start
LH: loop header
LB: loop body
LE: loop exit
PB: predicated region body
PF: predicated region fallthrough
CT: control target
= control target key end

     0   :  { %12 = vsyncpa [#allocation4], 0  ;;  %s10227_s0 = inlined_call_operand.vmem [shape: f32[2,9,64,36], index: 0, kind: input, shape index: {}]   ;;  %s10228_s1 = inlined_call_operand.vmem [shape: f32[36,16], index: 1, kind: input, shape index: {}]   ;;  %s10229_s2 = inlined_call_operand.vmem [shape: f32[1,16], index: 2, kind: input, shape index: {}]   ;;  %s10230_s3 = inlined_call_operand.vmem [shape: f32[9,16,64], index: 3, kind: input, shape index: {}]   ;;  %s10231_s4 = inlined_call_operand.vmem [shape: f32[1,64], index: 4, kind: input, shape index: {}]   ;;  %s10232_s5 = inlined_call_operand.vmem [shape: f32[4096,32], index: 5, kind: input, shape index: {}]   ;;  %s10233_s6 = inlined_call_operand.vmem [shape: f32[1,32], index: 6, kind: input, shape index: {}]   ;;  %s10234_s7 = inlined_call_operand.hbm [shape: f32[2,1,32], index: 7, kind: output, shape index: {}]  }
   0x1   :  { %14 = vsyncpa [#allocation4 + $0x1], 0  ;;  %s7526_s24 = smov 0   ;;  %s7528_s25 = smov 0  }
   0x2   :  { %s7530_s26 = smov 0   ;;  %s7532_s27 = smov 0  }
   0x3 LB: > { %s7547_s28 = sadd.s32 4294967295, %s7481_s27   ;;  %s5335_s29 = sadd.s32 4294967294, %s7481_s27   ;;  %s7481_s27 = sphi %s7532_s27, %s10250_s27   ;;  %s7477_s26 = sphi %s7530_s26, %s10249_s26   ;;  %s7473_s25 = sphi %s7528_s25, %s10248_s25   ;;  %s7469_s24 = sphi %s7526_s24, %s10247_s24  }
   0x4   : > { %s7551_s30 = sadd.s32 1, %s7481_s27   ;;  %s179_s8 = sadd.s32 1, %s7477_s26 }
   0x5   : > { %s176_s9 = ssub.s32 %s7481_s27, %s7551_s30  ;;  %p189_p0 = scmp.ne.s32.totalorder %s7477_s26, %s7473_s25 }
   0x6   : > { %p177_p1 = scmp.eq.s32.totalorder %s176_s9, 0  ;;  %p190_p2 = scmp.eq.s32.totalorder %s7547_s28, 1 }
   0x7   : > { %p195_p3 = scmp.ne.s32.totalorder %s7473_s25, %s7469_s24  ;;  %p196_p4 = scmp.eq.s32.totalorder %s5335_s29, 1 }
   0x8   : > { %s7562_s10 = scalar_select %p177_p1, %s7477_s26, %s179_s8  }
   0x9   : > { %p7564_p5 = por %p190_p2, %p189_p0  ;;  %p7568_p6 = por %p196_p4, %p195_p3 }
   0xa   : > { %p5338_p7 = scmp.ge.s32.totalorder %s7481_s27, 1  ;;  %p240_p8 = scmp.lt.s32.totalorder %s7481_s27, 3 }
   0xc   : > { %p241_p9 = pnand %p5338_p7, %p240_p8 }
   0xe   : > { %244 = sbr.rel (%p241_p9) target bundleno = 1433 (0x599), region = 48 }
  0x15   : > { %v284_v0 = vld [vmem:[%s10228_s1] sm:$0xff]  ;;  %v285_v1 = vld [vmem:[%s10228_s1 + $0x8] sm:$0xff]  ;;  %v286_v2 = vld [vmem:[%s10228_s1 + $0x10] sm:$0xff]  ;;  %p271_p10 = scmp.lt.s32.totalorder %s7547_s28, 1  ;;  %vm296_vm0 = vcmask 293888   ;;  %vm321_vm1 = vcmask 1043456  }
  0x16   : > { %v7584_v3 = vpack.c.bf16 %v285_v1, %v284_v0  ;;  %v287_v4 = vld [vmem:[%s10228_s1 + $0x18] sm:$0xff]  ;;  %v7598_v6 = vld [vmem:[%s10228_s1 + $0x20] sm:$0xf]  ;;  %v5367_v23 = vld [vmem:[%s10230_s3 + $0x10] sm:$0xff]  ;;  %vm589_vm2 = vcmask 130048   ;;  %s7484_s20 = smov 64  }
  0x17   : > { %v7589_v5 = vpack.c.bf16 %v287_v4, %v286_v2  ;;  %s272_s21 = scalar_select %p271_p10, %s7547_s28, 1  ;;  %v5368_v24 = vld [vmem:[%s10230_s3 + $0x18] sm:$0xff]  ;;  %v438_v26 = vld [vmem:[%s10230_s3] sm:$0xff]  ;;  %v439_v27 = vld [vmem:[%s10230_s3 + $0x8] sm:$0xff]  ;;  %vm5265_vm7 = vcmask 253952  }
  0x18   : > { %6688 = vmatprep.subr.bf16.mxu1 %v7584_v3  ;;  %v6703_v25 = vpack.c.bf16 %v5368_v24, %v5367_v23  ;;  %v7671_v28 = vpack.c.bf16 %v439_v27, %v438_v26  ;;  %v7832_v23 = vld [vmem:[%s10229_s2] ss:$0 sm:$0xff]  ;;  %s5575_s23 = sshll.u32 %s7547_s28, 4  ;;  %s7485_s28 = smov [#allocation3]  }
  0x19   : > { %6690 = vmatpush3.bf16.msra.mxu1 %v7584_v3  ;;  %s7377_s22 = smul.u32 576, %s272_s21 }
  0x1a   : > { %6692 = vmatprep.subr.bf16.mxu1 %v7589_v5  ;;  %6704 = vmatprep.subr.bf16.mxu0 %v6703_v25 }
  0x1b   : > { %s7603_s13 = scalar_lea.vmem %s10227_s0, %s7377_s22  ;;  %6706 = vmatpush3.bf16.msra.mxu0 %v6703_v25  ;;  %s269_s22 = sand.u32 1, %s7473_s25  }
  0x1c   : > { %v276_v7 = vld [vmem:[%s7603_s13] sm:$0xff]  ;;  %v277_v8 = vld [vmem:[%s7603_s13 + $0x8] sm:$0xff]  ;;  %v278_v9 = vld [vmem:[%s7603_s13 + $0x10] sm:$0xff]  ;;  %6708 = vmatprep.subr.bf16.mxu0 %v7671_v28  ;;  %s270_s29 = scalar_lea.vmem [#allocation3], %s269_s22  ;;  %s5268_s15 = scalar_lea.sflag [#allocation4], %s269_s22 }
  0x1d   : > { %6694 = vmatpush3.bf16.msra.mxu1 %v7589_v5  ;;  %6355 = vmatprep.mubr.msk.f32.mxu1 %vm296_vm0, %v276_v7  ;;  %v279_v10 = vld [vmem:[%s7603_s13 + $0x18] sm:$0xff]  ;;  %v280_v11 = vld [vmem:[%s7603_s13 + $0x20] sm:$0xff]  ;;  %v281_v12 = vld [vmem:[%s7603_s13 + $0x28] sm:$0xff]  ;;  %s5280_s8 = sshll.u32 %s270_s29, 4  ;;  %s10187_s8 = int_to_ptr.vmem [resolvable:$true] %s5280_s8 }
  0x1e   : > { %6353 = vmatprep.subr.msk.mxu1 %vm321_vm1, %v7598_v6  ;;  %v282_v13 = vld [vmem:[%s7603_s13 + $0x30] sm:$0xff]  ;;  %v283_v14 = vld [vmem:[%s7603_s13 + $0x38] sm:$0xff]  ;;  %v5350_v15 = vld [vmem:[%s7603_s13 + $0x40] sm:$0xff]  ;;  %s7419_s16 = scalar_lea.vmem %s10187_s8, 16 }
  0x1f   : > { %v5351_v16 = vld [vmem:[%s7603_s13 + $0x48] sm:$0xff]  ;;  %v5352_v17 = vld [vmem:[%s7603_s13 + $0x50] sm:$0xff]  ;;  %v5353_v18 = vld [vmem:[%s7603_s13 + $0x58] sm:$0xff]  ;;  %p7420_p11 = scmp.ne.s32.totalorder %s10187_s8, %s7419_s16 }
  0x20   : > { %v5354_v19 = vld [vmem:[%s7603_s13 + $0x60] sm:$0xff]  ;;  %v5355_v20 = vld [vmem:[%s7603_s13 + $0x68] sm:$0xff]  ;;  %v5356_v21 = vld [vmem:[%s7603_s13 + $0x70] sm:$0xff] }
  0x21   : > { %6354 = vmatpush3.msk.msra.mxu1 %vm321_vm1, %v7598_v6  ;;  %v5357_v22 = vld [vmem:[%s7603_s13 + $0x78] sm:$0xff]  ;;  %v5387_v29 = vld [vmem:[%s7603_s13 + $0x90] sm:$0xff]  ;;  %v5389_v31 = vld [vmem:[%s7603_s13 + $0xa0] sm:$0xff]  ;;  %p7421_p12 = pnand %p7420_p11, %p7564_p5 }
  0x22   : > { %6356 = vmatmul.mubr.msk.f32.vlgmr.msra.gmra.mrb[0].mxu1 %vm296_vm0, %v277_v8  ;;  %6696 = vmatprep.subr.bf16.mxu1 %v7584_v3  ;;  %v5388_v30 = vld [vmem:[%s7603_s13 + $0x98] sm:$0xff]  ;;  %v5390_v32 = vld [vmem:[%s7603_s13 + $0xa8] sm:$0xff]  ;;  %v5391_v33 = vld [vmem:[%s7603_s13 + $0xb0] sm:$0xff] }
  0x23   : > { %6698 = vmatpush3.bf16.msra.mxu1 %v7584_v3  ;;  %6358 = vmatprep.mubr.msk.f32.mxu1 %vm296_vm0, %v278_v9  ;;  %v5392_v34 = vld [vmem:[%s7603_s13 + $0xb8] sm:$0xff]  ;;  %v5412_v35 = vld [vmem:[%s7603_s13 + $0xc0] sm:$0xff]  ;;  %v5413_v36 = vld [vmem:[%s7603_s13 + $0xc8] sm:$0xff]  ;;  %p7422_p13 = pneg %p7421_p12 }
  0x24   : > { %6700 = vmatprep.subr.bf16.mxu1 %v7589_v5  ;;  %v5414_v37 = vld [vmem:[%s7603_s13 + $0xd0] sm:$0xff]  ;;  %v5415_v38 = vld [vmem:[%s7603_s13 + $0xd8] sm:$0xff]  ;;  %v5416_v39 = vld [vmem:[%s7603_s13 + $0xe0] sm:$0xff] }
  0x25   : > { %v5417_v40 = vld [vmem:[%s7603_s13 + $0xe8] sm:$0xff]  ;;  %v5418_v41 = vld [vmem:[%s7603_s13 + $0xf0] sm:$0xff]  ;;  %v5419_v42 = vld [vmem:[%s7603_s13 + $0xf8] sm:$0xff] }
  0x26   : > { %6359 = vmatmul.mubr.msk.f32.gmra.mrb[2].mxu1 %vm296_vm0, %v279_v10  ;;  %v5439_v43 = vld [vmem:[%s7603_s13 + $0x100] sm:$0xff]  ;;  %v5440_v44 = vld [vmem:[%s7603_s13 + $0x108] sm:$0xff]  ;;  %v5441_v45 = vld [vmem:[%s7603_s13 + $0x110] sm:$0xff] }
  0x27   : > { %6361 = vmatprep.mubr.msk.f32.mxu1 %vm296_vm0, %v280_v11  ;;  %6702 = vmatpush3.bf16.msra.mxu1 %v7589_v5  ;;  %v5442_v46 = vld [vmem:[%s7603_s13 + $0x118] sm:$0xff]  ;;  %v5443_v47 = vld [vmem:[%s7603_s13 + $0x120] sm:$0xff]  ;;  %v5444_v48 = vld [vmem:[%s7603_s13 + $0x128] sm:$0xff] }
  0x28   : > { %6375 = vmatprep.subr.msk.mxu1 %vm321_vm1, %v7598_v6  ;;  %v5445_v49 = vld [vmem:[%s7603_s13 + $0x130] sm:$0xff]  ;;  %v5446_v50 = vld [vmem:[%s7603_s13 + $0x138] sm:$0xff]  ;;  %v5466_v51 = vld [vmem:[%s7603_s13 + $0x140] sm:$0xff] }
  0x29   : > { %v5467_v52 = vld [vmem:[%s7603_s13 + $0x148] sm:$0xff]  ;;  %v5468_v53 = vld [vmem:[%s7603_s13 + $0x150] sm:$0xff]  ;;  %v5469_v54 = vld [vmem:[%s7603_s13 + $0x158] sm:$0xff] }
  0x2a   : > { %6362 = vmatmul.mubr.msk.f32.gmra.mrb[4].mxu1 %vm296_vm0, %v281_v12  ;;  %v5470_v55 = vld [vmem:[%s7603_s13 + $0x160] sm:$0xff]  ;;  %v5471_v56 = vld [vmem:[%s7603_s13 + $0x168] sm:$0xff]  ;;  %v5472_v57 = vld [vmem:[%s7603_s13 + $0x170] sm:$0xff] }
  0x2b   : > { %6364 = vmatprep.mubr.msk.f32.mxu1 %vm296_vm0, %v282_v13  ;;  %6376 = vmatpush3.msk.msra.mxu1 %vm321_vm1, %v7598_v6  ;;  %v5473_v58 = vld [vmem:[%s7603_s13 + $0x178] sm:$0xff]  ;;  %v5493_v59 = vld [vmem:[%s7603_s13 + $0x180] sm:$0xff]  ;;  %v5494_v60 = vld [vmem:[%s7603_s13 + $0x188] sm:$0xff] }
  0x2c   : > { %7307 = vmatprep.subr.bf16.mxu1 %v7584_v3  ;;  %v5495_v61 = vld [vmem:[%s7603_s13 + $0x190] sm:$0xff]  ;;  %v5496_v62 = vld [vmem:[%s7603_s13 + $0x198] sm:$0xff]  ;;  %v5497_v63 = vld [vmem:[%s7603_s13 + $0x1a0] sm:$0xff] }
  0x2d   : > { %v5498_v0 = vld [vmem:[%s7603_s13 + $0x1a8] sm:$0xff]  ;;  %v5499_v1 = vld [vmem:[%s7603_s13 + $0x1b0] sm:$0xff]  ;;  %v5500_v2 = vld [vmem:[%s7603_s13 + $0x1b8] sm:$0xff] }
  0x2e   : > { %6365 = vmatmul.mubr.msk.f32.gmra.mrb[6].mxu1 %vm296_vm0, %v283_v14  ;;  %v5520_v4 = vld [vmem:[%s7603_s13 + $0x1c0] sm:$0xff]  ;;  %v5521_v9 = vld [vmem:[%s7603_s13 + $0x1c8] sm:$0xff]  ;;  %v5522_v10 = vld [vmem:[%s7603_s13 + $0x1d0] sm:$0xff] }
  0x2f   : > { %6377 = vmatprep.mubr.msk.f32.mxu1 %vm296_vm0, %v5350_v15  ;;  %v5523_v13 = vld [vmem:[%s7603_s13 + $0x1d8] sm:$0xff]  ;;  %v5524_v14 = vld [vmem:[%s7603_s13 + $0x1e0] sm:$0xff] }
  0x32   : > { %6378 = vmatmul.mubr.msk.f32.vlgmr.msra.gmra.mrb[8].mxu1 %vm296_vm0, %v5351_v16 }
  0x33   : > { %6380 = vmatprep.mubr.msk.f32.mxu1 %vm296_vm0, %v5352_v17  ;;  %7310 = vmatpush3.bf16.msra.mxu1 %v7584_v3  ;;  %v5525_v17 = vld [vmem:[%s7603_s13 + $0x1e8] sm:$0xff] }
  0x34   : > { %7308 = vmatprep.subr.bf16.mxu1 %v7589_v5 }
  0x36   : > { %6381 = vmatmul.mubr.msk.f32.gmra.mrb[10].mxu1 %vm296_vm0, %v5353_v18  ;;  %v5526_v18 = vld [vmem:[%s7603_s13 + $0x1f0] sm:$0xff] }
  0x37   : > { %6383 = vmatprep.mubr.msk.f32.mxu1 %vm296_vm0, %v5354_v19  ;;  %7311 = vmatpush3.bf16.msra.mxu1 %v7589_v5 }
  0x38   : > { %7309 = vmatprep.subr.msk.mxu1 %vm321_vm1, %v7598_v6 }
  0x3a   : > { %6384 = vmatmul.mubr.msk.f32.gmra.mrb[12].mxu1 %vm296_vm0, %v5355_v20 }
  0x3b   : > { %6386 = vmatprep.mubr.msk.f32.mxu1 %vm296_vm0, %v5356_v21  ;;  %7312 = vmatpush3.msk.msra.mxu1 %vm321_vm1, %v7598_v6  ;;  %v5527_v21 = vld [vmem:[%s7603_s13 + $0x1f8] sm:$0xff] }
  0x3c   : > { %6724 = vmatprep.subr.bf16.mxu1 %v7584_v3 }
  0x3e   : > { %6387 = vmatmul.mubr.msk.f32.gmra.mrb[14].mxu1 %vm296_vm0, %v5357_v22  ;;  %v5547_v22 = vld [vmem:[%s7603_s13 + $0x200] sm:$0xff] }
  0x3f   : > { %6434 = vmatprep.mubr.msk.f32.mxu1 %vm296_vm0, %v5387_v29  ;;  %v5548_v29 = vld [vmem:[%s7603_s13 + $0x208] sm:$0xff] }
  0x42   : > { %6435 = vmatmul.mubr.msk.f32.vlgmr.msra.gmra.mrb[16].mxu1 %vm296_vm0, %v5388_v30  ;;  %v5549_v30 = vld [vmem:[%s7603_s13 + $0x210] sm:$0xff] }
  0x43   : > { %6726 = vmatpush3.bf16.msra.mxu1 %v7584_v3  ;;  %6437 = vmatprep.mubr.msk.f32.mxu1 %vm296_vm0, %v5389_v31 }
  0x44   : > { %6728 = vmatprep.subr.bf16.mxu1 %v7589_v5 }
  0x46   : > { %6438 = vmatmul.mubr.msk.f32.gmra.mrb[18].mxu1 %vm296_vm0, %v5390_v32 }
  0x47   : > { %6730 = vmatpush3.bf16.msra.mxu1 %v7589_v5  ;;  %6440 = vmatprep.mubr.msk.f32.mxu1 %vm296_vm0, %v5391_v33 }
  0x48   : > { %6467 = vmatprep.subr.msk.mxu1 %vm321_vm1, %v7598_v6 }
  0x4a   : > { %6441 = vmatmul.mubr.msk.f32.gmra.mrb[20].mxu1 %vm296_vm0, %v5392_v34 }
  0x4b   : > { %6468 = vmatpush3.msk.msra.mxu1 %vm321_vm1, %v7598_v6  ;;  %6469 = vmatprep.mubr.msk.f32.mxu1 %vm296_vm0, %v5412_v35 }
  0x4c   : > { %6736 = vmatprep.subr.bf16.mxu1 %v7584_v3 }
  0x4e   : > { %6470 = vmatmul.mubr.msk.f32.vlgmr.msra.gmra.mrb[22].mxu1 %vm296_vm0, %v5413_v36 }
  0x4f   : > { %6738 = vmatpush3.bf16.msra.mxu1 %v7584_v3  ;;  %6472 = vmatprep.mubr.msk.f32.mxu1 %vm296_vm0, %v5414_v37  ;;  %v5550_v37 = vld [vmem:[%s7603_s13 + $0x218] sm:$0xff] }
  0x50   : > { %6740 = vmatprep.subr.bf16.mxu1 %v7589_v5 }
  0x52   : > { %6473 = vmatmul.mubr.msk.f32.gmra.mrb[24].mxu1 %vm296_vm0, %v5415_v38  ;;  %v5551_v38 = vld [vmem:[%s7603_s13 + $0x220] sm:$0xff] }
  0x53   : > { %6475 = vmatprep.mubr.msk.f32.mxu1 %vm296_vm0, %v5416_v39  ;;  %6742 = vmatpush3.bf16.msra.mxu1 %v7589_v5 }
  0x54   : > { %6505 = vmatprep.subr.msk.mxu1 %vm321_vm1, %v7598_v6 }
  0x56   : > { %6476 = vmatmul.mubr.msk.f32.gmra.mrb[26].mxu1 %vm296_vm0, %v5417_v40 }
  0x57   : > { %6478 = vmatprep.mubr.msk.f32.mxu1 %vm296_vm0, %v5418_v41  ;;  %6506 = vmatpush3.msk.msra.mxu1 %vm321_vm1, %v7598_v6 }
  0x58   : > { %6748 = vmatprep.subr.bf16.mxu1 %v7584_v3 }
  0x5a   : > { %6479 = vmatmul.mubr.msk.f32.gmra.mrb[28].mxu1 %vm296_vm0, %v5419_v42 }
  0x5b   : > { %6507 = vmatprep.mubr.msk.f32.mxu1 %vm296_vm0, %v5439_v43 }
  0x5e   : > { %6508 = vmatmul.mubr.msk.f32.vlgmr.msra.gmra.mrb[30].mxu1 %vm296_vm0, %v5440_v44 }
  0x5f   : > { %6750 = vmatpush3.bf16.msra.mxu1 %v7584_v3  ;;  %6510 = vmatprep.mubr.msk.f32.mxu1 %vm296_vm0, %v5441_v45  ;;  %v5552_v45 = vld [vmem:[%s7603_s13 + $0x228] sm:$0xff] }
  0x60   : > { %6752 = vmatprep.subr.bf16.mxu1 %v7589_v5 }
  0x62   : > { %6511 = vmatmul.mubr.msk.f32.gmra.mrb[32].mxu1 %vm296_vm0, %v5442_v46  ;;  %v5553_v46 = vld [vmem:[%s7603_s13 + $0x230] sm:$0xff] }
  0x63   : > { %6513 = vmatprep.mubr.msk.f32.mxu1 %vm296_vm0, %v5443_v47  ;;  %6754 = vmatpush3.bf16.msra.mxu1 %v7589_v5 }
  0x64   : > { %6543 = vmatprep.subr.msk.mxu1 %vm321_vm1, %v7598_v6 }
  0x66   : > { %6514 = vmatmul.mubr.msk.f32.gmra.mrb[34].mxu1 %vm296_vm0, %v5444_v48 }
  0x67   : > { %6516 = vmatprep.mubr.msk.f32.mxu1 %vm296_vm0, %v5445_v49  ;;  %6544 = vmatpush3.msk.msra.mxu1 %vm321_vm1, %v7598_v6 }
  0x68   : > { %6760 = vmatprep.subr.bf16.mxu1 %v7584_v3 }
  0x6a   : > { %6517 = vmatmul.mubr.msk.f32.gmra.mrb[36].mxu1 %vm296_vm0, %v5446_v50 }
  0x6b   : > { %6545 = vmatprep.mubr.msk.f32.mxu1 %vm296_vm0, %v5466_v51 }
  0x6e   : > { %6546 = vmatmul.mubr.msk.f32.vlgmr.msra.gmra.mrb[38].mxu1 %vm296_vm0, %v5467_v52 }
  0x6f   : > { %6762 = vmatpush3.bf16.msra.mxu1 %v7584_v3  ;;  %6548 = vmatprep.mubr.msk.f32.mxu1 %vm296_vm0, %v5468_v53  ;;  %v5554_v53 = vld [vmem:[%s7603_s13 + $0x238] sm:$0xff] }
  0x70   : > { %6764 = vmatprep.subr.bf16.mxu1 %v7589_v5 }
  0x72   : > { %6549 = vmatmul.mubr.msk.f32.gmra.mrb[40].mxu1 %vm296_vm0, %v5469_v54 }
  0x73   : > { %6551 = vmatprep.mubr.msk.f32.mxu1 %vm296_vm0, %v5470_v55  ;;  %6766 = vmatpush3.bf16.msra.mxu1 %v7589_v5 }
  0x74   : > { %6581 = vmatprep.subr.msk.mxu1 %vm321_vm1, %v7598_v6 }
  0x76   : > { %6552 = vmatmul.mubr.msk.f32.gmra.mrb[42].mxu1 %vm296_vm0, %v5471_v56 }
  0x77   : > { %6554 = vmatprep.mubr.msk.f32.mxu1 %vm296_vm0, %v5472_v57  ;;  %6582 = vmatpush3.msk.msra.mxu1 %vm321_vm1, %v7598_v6 }
  0x78   : > { %6772 = vmatprep.subr.bf16.mxu1 %v7584_v3 }
  0x7a   : > { %6555 = vmatmul.mubr.msk.f32.gmra.mrb[44].mxu1 %vm296_vm0, %v5473_v58 }
  0x7b   : > { %6583 = vmatprep.mubr.msk.f32.mxu1 %vm296_vm0, %v5493_v59 }
  0x7e   : > { %6584 = vmatmul.mubr.msk.f32.vlgmr.msra.gmra.mrb[46].mxu1 %vm296_vm0, %v5494_v60 }
  0x7f   : > { %6774 = vmatpush3.bf16.msra.mxu1 %v7584_v3  ;;  %6586 = vmatprep.mubr.msk.f32.mxu1 %vm296_vm0, %v5495_v61 }
  0x80   : > { %6776 = vmatprep.subr.bf16.mxu1 %v7589_v5 }
  0x82   : > { %6587 = vmatmul.mubr.msk.f32.gmra.mrb[48].mxu1 %vm296_vm0, %v5496_v62 }
  0x83   : > { %6589 = vmatprep.mubr.msk.f32.mxu1 %vm296_vm0, %v5497_v63  ;;  %6778 = vmatpush3.bf16.msra.mxu1 %v7589_v5 }
  0x84   : > { %6619 = vmatprep.subr.msk.mxu1 %vm321_vm1, %v7598_v6 }
  0x86   : > { %6590 = vmatmul.mubr.msk.f32.gmra.mrb[50].mxu1 %vm296_vm0, %v5498_v0 }
  0x87   : > { %6592 = vmatprep.mubr.msk.f32.mxu1 %vm296_vm0, %v5499_v1  ;;  %6620 = vmatpush3.msk.msra.mxu1 %vm321_vm1, %v7598_v6 }
  0x88   : > { %6784 = vmatprep.subr.bf16.mxu1 %v7584_v3 }
  0x8a   : > { %6593 = vmatmul.mubr.msk.f32.gmra.mrb[52].mxu1 %vm296_vm0, %v5500_v2 }
  0x8b   : > { %6621 = vmatprep.mubr.msk.f32.mxu1 %vm296_vm0, %v5520_v4 }
  0x8e   : > { %6622 = vmatmul.mubr.msk.f32.vlgmr.msra.gmra.mrb[54].mxu1 %vm296_vm0, %v5521_v9  ;;  %v5385_v9 = vld [vmem:[%s7603_s13 + $0x80] sm:$0xff] }
  0x8f   : > { %6786 = vmatpush3.bf16.msra.mxu1 %v7584_v3  ;;  %6624 = vmatprep.mubr.msk.f32.mxu1 %vm296_vm0, %v5522_v10  ;;  %v5402_v10 = vld [vmem:[%s10230_s3 + $0x20] sm:$0xff] }
  0x90   : > { %6788 = vmatprep.subr.bf16.mxu1 %v7589_v5 }
  0x92   : > { %6625 = vmatmul.mubr.msk.f32.gmra.mrb[56].mxu1 %vm296_vm0, %v5523_v13 }
  0x93   : > { %6627 = vmatprep.mubr.msk.f32.mxu1 %vm296_vm0, %v5524_v14  ;;  %6790 = vmatpush3.bf16.msra.mxu1 %v7589_v5  ;;  %v5429_v14 = vld [vmem:[%s10230_s3 + $0x30] sm:$0xff] }
  0x94   : > { %6657 = vmatprep.subr.msk.mxu1 %vm321_vm1, %v7598_v6 }
  0x96   : > { %6628 = vmatmul.mubr.msk.f32.gmra.mrb[58].mxu1 %vm296_vm0, %v5525_v17 }
  0x97   : > { %6630 = vmatprep.mubr.msk.f32.mxu1 %vm296_vm0, %v5526_v18  ;;  %6658 = vmatpush3.msk.msra.mxu1 %vm321_vm1, %v7598_v6 }
  0x9a   : > { %6631 = vmatmul.mubr.msk.f32.gmra.mrb[60].mxu1 %vm296_vm0, %v5527_v21 }
  0x9b   : > { %6659 = vmatprep.mubr.msk.f32.mxu1 %vm296_vm0, %v5547_v22 }
  0x9e   : > { %6660 = vmatmul.mubr.msk.f32.vlgmr.msra.gmra.mrb[62].mxu1 %vm296_vm0, %v5548_v29 }
  0x9f   : > { %6662 = vmatprep.mubr.msk.f32.mxu1 %vm296_vm0, %v5549_v30 }
  0xa2   : > { %6663 = vmatmul.mubr.msk.f32.gmra.mrb[64].mxu1 %vm296_vm0, %v5550_v37 }
  0xa3   : > { %6665 = vmatprep.mubr.msk.f32.mxu1 %vm296_vm0, %v5551_v38 }
  0xa6   : > { %6666 = vmatmul.mubr.msk.f32.gmra.mrb[66].mxu1 %vm296_vm0, %v5552_v45 }
  0xa7   : > { %6668 = vmatprep.mubr.msk.f32.mxu1 %vm296_vm0, %v5553_v46 }
  0xaa   : > { %6669 = vmatmul.mubr.msk.f32.gmra.mrb[68].mxu1 %vm296_vm0, %v5554_v53 }
  0xf5   : > { %v7790_v7 = vpop.f32.mrb[0].mxu1 }
  0xf6   : > { %v7792_v8 = vpop.f32.mrb[1].mxu1  ;;  %v397_v55 = vadd.f32 %v7790_v7, %v7832_v23 }
  0xf7   : > { %v392_v51 = vadd.f32 %v7832_v23, %v7792_v8 }
  0xf8   : > { %v431_v59 = vmax.f32 %v397_v55, 0.0 }
  0xf9   : > { %v7798_v11 = vpop.f32.mrb[2].mxu1  ;;  %v430_v57 = vmax.f32 %v392_v51, 0.0 }
  0xfa   : > { %v7800_v12 = vpop.f32.mrb[3].mxu1  ;;  %v407_v60 = vadd.f32 %v7798_v11, %v7832_v23  ;;  %v5403_v11 = vld [vmem:[%s10230_s3 + $0x28] sm:$0xff] }
  0xfb   : > { %v402_v58 = vadd.f32 %v7832_v23, %v7800_v12  ;;  %v6719_v12 = vpack.c.bf16 %v5403_v11, %v5402_v10 }
  0xfc   : > { %v433_v63 = vmax.f32 %v407_v60, 0.0 }
  0xfd   : > { %v7808_v15 = vpop.f32.mrb[4].mxu1  ;;  %v432_v61 = vmax.f32 %v402_v58, 0.0 }
  0xfe   : > { %v7810_v16 = vpop.f32.mrb[5].mxu1  ;;  %v417_v0 = vadd.f32 %v7808_v15, %v7832_v23  ;;  %v5430_v15 = vld [vmem:[%s10230_s3 + $0x38] sm:$0xff] }
  0xff   : > { %v412_v62 = vadd.f32 %v7832_v23, %v7810_v16  ;;  %v7919_v17 = vpack.c.bf16 %v5430_v15, %v5429_v14  ;;  %v5457_v14 = vld [vmem:[%s10230_s3 + $0x48] sm:$0xff] }
 0x100   : > { %v435_v4 = vmax.f32 %v417_v0, 0.0 }
 0x101   : > { %v7819_v19 = vpop.f32.mrb[6].mxu1  ;;  %v434_v1 = vmax.f32 %v412_v62, 0.0 }
 0x102   : > { %v7821_v20 = vpop.f32.mrb[7].mxu1 }
 0x103   : > { %v422_v2 = vadd.f32 %v7832_v23, %v7821_v20 }
 0x105   : > { %v6379_v24 = vpop.f32.mrb[8].mxu1  ;;  %v436_v7 = vmax.f32 %v422_v2, 0.0 }
 0x106   : > { %v545_v25 = vadd.f32 %v6379_v24, %v7832_v23  ;;  %v539_v26 = vpop.f32.mrb[9].mxu1 }
 0x107   : > { %v540_v27 = vadd.f32 %v7832_v23, %v539_v26 }
 0x108   : > { %v579_v33 = vmax.f32 %v545_v25, 0.0 }
 0x109   : > { %v578_v31 = vmax.f32 %v540_v27, 0.0  ;;  %v6382_v32 = vpop.f32.mrb[10].mxu1 }
 0x10a   : > { %v555_v34 = vadd.f32 %v6382_v32, %v7832_v23  ;;  %v549_v35 = vpop.f32.mrb[11].mxu1 }
 0x10b   : > { %v550_v36 = vadd.f32 %v7832_v23, %v549_v35  ;;  %6393 = vmatprep.mubr.msk.f32.mxu0 %vm589_vm2, %v578_v31 }
 0x10c   : > { %6394 = vmatmul.mubr.msk.f32.vlgmr.msra.gmra.mrb[0].mxu0 %vm589_vm2, %v579_v33  ;;  %v581_v41 = vmax.f32 %v555_v34, 0.0 }
 0x10d   : > { %v580_v39 = vmax.f32 %v550_v36, 0.0  ;;  %v6385_v40 = vpop.f32.mrb[12].mxu1  ;;  %6710 = vmatpush3.bf16.msra.mxu0 %v7671_v28 }
 0x10e   : > { %v565_v42 = vadd.f32 %v6385_v40, %v7832_v23  ;;  %v559_v43 = vpop.f32.mrb[13].mxu1  ;;  %6712 = vmatprep.subr.bf16.mxu0 %v7584_v3 }
 0x10f   : > { %v560_v44 = vadd.f32 %v7832_v23, %v559_v43  ;;  %6396 = vmatprep.mubr.msk.f32.mxu0 %vm589_vm2, %v580_v39 }
 0x110   : > { %6397 = vmatmul.mubr.msk.f32.gmra.mrb[2].mxu0 %vm589_vm2, %v581_v41  ;;  %v583_v48 = vmax.f32 %v565_v42, 0.0 }
 0x111   : > { %v582_v28 = vmax.f32 %v560_v44, 0.0  ;;  %v6388_v47 = vpop.f32.mrb[14].mxu1 }
 0x112   : > { %v575_v49 = vadd.f32 %v6388_v47, %v7832_v23  ;;  %v569_v50 = vpop.f32.mrb[15].mxu1 }
 0x113   : > { %v570_v52 = vadd.f32 %v7832_v23, %v569_v50  ;;  %6399 = vmatprep.mubr.msk.f32.mxu0 %vm589_vm2, %v582_v28 }
 0x114   : > { %6400 = vmatmul.mubr.msk.f32.gmra.mrb[4].mxu0 %vm589_vm2, %v583_v48  ;;  %v585_v56 = vmax.f32 %v575_v49, 0.0 }
 0x115   : > { %v584_v54 = vmax.f32 %v570_v52, 0.0 }
 0x117   : > { %6402 = vmatprep.mubr.msk.f32.mxu0 %vm589_vm2, %v584_v54 }
 0x118   : > { %6403 = vmatmul.mubr.msk.f32.gmra.mrb[6].mxu0 %vm589_vm2, %v585_v56 }
 0x119   : > { %6409 = vmatprep.mubr.msk.f32.mxu0 %vm589_vm2, %v430_v57 }
 0x11c   : > { %6410 = vmatmul.mubr.msk.f32.vlgmr.msra.gmra.mrb[0].mxu0 %vm589_vm2, %v431_v59 }
 0x11d   : > { %6412 = vmatprep.mubr.msk.f32.mxu0 %vm589_vm2, %v432_v61  ;;  %6714 = vmatpush3.bf16.msra.mxu0 %v7584_v3  ;;  %v427_v3 = vadd.f32 %v7819_v19, %v7832_v23 }
 0x11e   : > { %6716 = vmatprep.subr.bf16.mxu0 %v7589_v5 }
 0x11f   : > { %v437_v8 = vmax.f32 %v427_v3, 0.0 }
 0x120   : > { %6413 = vmatmul.mubr.msk.f32.gmra.mrb[2].mxu0 %vm589_vm2, %v433_v63 }
 0x121   : > { %6415 = vmatprep.mubr.msk.f32.mxu0 %vm589_vm2, %v434_v1  ;;  %6718 = vmatpush3.bf16.msra.mxu0 %v7589_v5  ;;  %v5386_v5 = vld [vmem:[%s7603_s13 + $0x88] sm:$0xff]  ;;  %s7423_s13 = sshll.u32 %s7485_s28, 4  ;;  %s7424_s13 = int_to_ptr.vmem [resolvable:$false] %s7423_s13 }
 0x122   : > { %6429 = vmatprep.subr.msk.mxu0 %vm321_vm1, %v7598_v6  ;;  %s7425_s17 = scalar_lea.vmem %s7424_s13, 32  ;;  %p7426_p0 = scmp.lt.s32.totalorder %s10187_s8, %s7424_s13 }
 0x123   : > { %p7427_p1 = scmp.lt.s32.totalorder %s7425_s17, %s7419_s16 }
 0x124   : > { %6416 = vmatmul.mubr.msk.f32.gmra.mrb[4].mxu0 %vm589_vm2, %v435_v4 }
 0x125   : > { %6418 = vmatprep.mubr.msk.f32.mxu0 %vm589_vm2, %v436_v7  ;;  %6430 = vmatpush3.msk.msra.mxu0 %vm321_vm1, %v7598_v6  ;;  %v7909_v6 = vpop.f32.mrb[16].mxu1  ;;  %p7428_p2 = por %p7427_p1, %p7426_p0 }
 0x126   : > { %6720 = vmatprep.subr.bf16.mxu0 %v6719_v12  ;;  %v957_v13 = vpop.f32.mrb[17].mxu1 }
 0x127   : > { %v7917_v16 = vpop.f32.mrb[18].mxu1  ;;  %p7429_p3 = pnand %p7428_p2, %p7422_p13 }
 0x128   : > { %6419 = vmatmul.mubr.msk.f32.gmra.mrb[6].mxu0 %vm589_vm2, %v437_v8  ;;  %v967_v18 = vpop.f32.mrb[19].mxu1 }
 0x129   : > { %6431 = vmatprep.mubr.msk.f32.mxu0 %vm296_vm0, %v5385_v9  ;;  %v7922_v19 = vpop.f32.mrb[20].mxu1  ;;  %v958_v9 = vadd.f32 %v7832_v23, %v957_v13  ;;  %v963_v13 = vadd.f32 %v7909_v6, %v7832_v23 }
 0x12a   : > { %v7924_v20 = vpop.f32.mrb[21].mxu1 }
 0x12b   : > { %v7926_v21 = vpop.f32.mrb[22].mxu1 }
 0x12c   : > { %6432 = vmatmul.mubr.msk.f32.vlgmr.msra.gmra.mrb[8].mxu0 %vm296_vm0, %v5386_v5  ;;  %v7928_v22 = vpop.f32.mrb[23].mxu1 }
 0x12d   : > { %6722 = vmatpush3.bf16.msra.mxu0 %v6719_v12  ;;  %v7930_v24 = vpop.f32.mrb[24].mxu1  ;;  %v5456_v12 = vld [vmem:[%s10230_s3 + $0x40] sm:$0xff] }
 0x12e   : > { %6732 = vmatprep.subr.bf16.mxu0 %v7919_v17  ;;  %v7932_v25 = vpop.f32.mrb[25].mxu1 }
 0x12f   : > { %v7934_v26 = vpop.f32.mrb[26].mxu1 }
 0x130   : > { %v7936_v27 = vpop.f32.mrb[27].mxu1 }
 0x131   : > { %v7938_v29 = vpop.f32.mrb[28].mxu1 }
 0x132   : > { %v7940_v30 = vpop.f32.mrb[29].mxu1 }
 0x133   : > { %v7942_v31 = vpop.f32.mrb[30].mxu1 }
 0x134   : > { %v7944_v32 = vpop.f32.mrb[31].mxu1 }
 0x135   : > { %v7946_v33 = vpop.f32.mrb[32].mxu1 }
 0x136   : > { %v7948_v34 = vpop.f32.mrb[33].mxu1 }
 0x139   : > { %v7950_v35 = vpop.f32.mrb[34].mxu1 }
 0x13a   : > { %v7952_v36 = vpop.f32.mrb[35].mxu1 }
 0x13d   : > { %v7954_v37 = vpop.f32.mrb[36].mxu1 }
 0x13e   : > { %v7956_v38 = vpop.f32.mrb[37].mxu1 }
 0x141   : > { %v7958_v39 = vpop.f32.mrb[38].mxu1 }
 0x142   : > { %v7960_v40 = vpop.f32.mrb[39].mxu1 }
 0x145   : > { %v7962_v41 = vpop.f32.mrb[40].mxu1 }
 0x146   : > { %v7964_v42 = vpop.f32.mrb[41].mxu1 }
 0x149   : > { %v7966_v43 = vpop.f32.mrb[42].mxu1 }
 0x14a   : > { %v7968_v44 = vpop.f32.mrb[43].mxu1 }
 0x14d   : > { %v7970_v45 = vpop.f32.mrb[44].mxu1 }
 0x14e   : > { %v7972_v46 = vpop.f32.mrb[45].mxu1 }
 0x151   : > { %v7974_v28 = vpop.f32.mrb[46].mxu1 }
 0x152   : > { %v7976_v47 = vpop.f32.mrb[47].mxu1 }
 0x155   : > { %v7978_v48 = vpop.f32.mrb[48].mxu1 }
 0x156   : > { %v7980_v49 = vpop.f32.mrb[49].mxu1 }
 0x159   : > { %v7982_v50 = vpop.f32.mrb[50].mxu1 }
 0x15a   : > { %v7984_v51 = vpop.f32.mrb[51].mxu1 }
 0x15d   : > { %v7986_v52 = vpop.f32.mrb[52].mxu1 }
 0x15e   : > { %v7988_v53 = vpop.f32.mrb[53].mxu1 }
 0x161   : > { %v7990_v54 = vpop.f32.mrb[54].mxu1 }
 0x162   : > { %v7992_v55 = vpop.f32.mrb[55].mxu1 }
 0x165   : > { %v7994_v56 = vpop.f32.mrb[56].mxu1 }
 0x166   : > { %v7996_v57 = vpop.f32.mrb[57].mxu1 }
 0x169   : > { %v7998_v58 = vpop.f32.mrb[58].mxu1 }
 0x16a   : > { %v8000_v59 = vpop.f32.mrb[59].mxu1 }
 0x16d   : > { %v8002_v60 = vpop.f32.mrb[60].mxu1 }
 0x16e   : > { %v8004_v61 = vpop.f32.mrb[61].mxu1 }
 0x171   : > { %v8006_v62 = vpop.f32.mrb[62].mxu1 }
 0x172   : > { %v8008_v63 = vpop.f32.mrb[63].mxu1 }
 0x175   : > { %v8010_v0 = vpop.f32.mrb[64].mxu1 }
 0x176   : > { %v8012_v1 = vpop.f32.mrb[65].mxu1 }
 0x179   : > { %v8014_v2 = vpop.f32.mrb[66].mxu1 }
 0x17a   : > { %10237 = vst [vmem:[#allocation6_spill] sm:$0xff] %v8014_v2  ;;  %v8016_v4 = vpop.f32.mrb[67].mxu1 }
 0x17d   : > { %v8018_v3 = vpop.f32.mrb[68].mxu1 }
 0x17e   : > { %10238 = vst [vmem:[#allocation7_spill] sm:$0xff] %v8018_v3  ;;  %v8020_v7 = vpop.f32.mrb[69].mxu1  ;;  %v988_v3 = vmax.f32 %v958_v9, 0.0  ;;  %v989_v9 = vmax.f32 %v963_v13, 0.0 }
 0x17f   : > { %10239 = vst [vmem:[#allocation8_spill] sm:$0xff] %v8020_v7  ;;  %v968_v7 = vadd.f32 %v7832_v23, %v967_v18  ;;  %v973_v18 = vadd.f32 %v7917_v16, %v7832_v23  ;;  %v1244_v16 = vadd.f32 %v7832_v23, %v7932_v25  ;;  %v1254_v25 = vadd.f32 %v7832_v23, %v7936_v27 }
 0x181   : > { %v1276_v13 = vmax.f32 %v1254_v25, 0.0 }
 0x1ff   : > { %v6433_v8 = vpop.f32.mrb[8].mxu0 }
 0x200   : > { %v953_v5 = vadd.f32 %v6433_v8, %v7832_v23  ;;  %v947_v10 = vpop.f32.mrb[9].mxu0  ;;  %v6743_v8 = vpack.c.bf16 %v5457_v14, %v5456_v12  ;;  %v1274_v12 = vmax.f32 %v1244_v16, 0.0 }
 0x201   : > { %v948_v11 = vadd.f32 %v7832_v23, %v947_v10  ;;  %v990_v10 = vmax.f32 %v968_v7, 0.0 }
 0x202   : > { %v987_v2 = vmax.f32 %v953_v5, 0.0  ;;  %v1239_v5 = vadd.f32 %v7926_v21, %v7832_v23  ;;  %v1249_v21 = vadd.f32 %v7930_v24, %v7832_v23  ;;  %v1520_v24 = vadd.f32 %v7832_v23, %v7944_v32  ;;  %v5510_v32 = vld [vmem:[%s10230_s3 + $0x60] sm:$0xff] }
 0x203   : > { %v986_v15 = vmax.f32 %v948_v11, 0.0  ;;  %v978_v11 = vadd.f32 %v7832_v23, %v7924_v20 }
 0x204   : > { %v1273_v14 = vmax.f32 %v1239_v5, 0.0 }
 0x205   : > { %6447 = vmatprep.mubr.msk.f32.mxu0 %vm589_vm2, %v986_v15  ;;  %v992_v6 = vmax.f32 %v978_v11, 0.0  ;;  %v1275_v11 = vmax.f32 %v1249_v21, 0.0 }
 0x206   : > { %6448 = vmatmul.mubr.msk.f32.vlgmr.msra.gmra.mrb[0].mxu0 %vm589_vm2, %v987_v2  ;;  %v1234_v2 = vadd.f32 %v7832_v23, %v7928_v22  ;;  %v5483_v22 = vld [vmem:[%s10230_s3 + $0x50] sm:$0xff] }
 0x207   : > { %6734 = vmatpush3.bf16.msra.mxu0 %v7919_v17  ;;  %6450 = vmatprep.mubr.msk.f32.mxu0 %vm589_vm2, %v988_v3  ;;  %v991_v17 = vmax.f32 %v973_v18, 0.0  ;;  %v983_v3 = vadd.f32 %v7922_v19, %v7832_v23  ;;  %v5484_v19 = vld [vmem:[%s10230_s3 + $0x58] sm:$0xff]  ;;  %v1269_v18 = vadd.f32 %v7938_v29, %v7832_v23  ;;  %v5511_v29 = vld [vmem:[%s10230_s3 + $0x68] sm:$0xff] }
 0x208   : > { %6744 = vmatprep.subr.bf16.mxu0 %v6743_v8  ;;  %v1272_v20 = vmax.f32 %v1234_v2, 0.0  ;;  %v6755_v15 = vpack.c.bf16 %v5484_v19, %v5483_v22  ;;  %v1525_v2 = vadd.f32 %v7942_v31, %v7832_v23  ;;  %v1535_v31 = vadd.f32 %v7946_v33, %v7832_v23 }
 0x209   : > { %v993_v7 = vmax.f32 %v983_v3, 0.0  ;;  %v1545_v22 = vadd.f32 %v7950_v35, %v7832_v23  ;;  %v1806_v33 = vadd.f32 %v7832_v23, %v7960_v40  ;;  %v1816_v35 = vadd.f32 %v7832_v23, %v7964_v42  ;;  %v5537_v40 = vld [vmem:[%s10230_s3 + $0x70] sm:$0xff] }
 0x20a   : > { %6451 = vmatmul.mubr.msk.f32.gmra.mrb[2].mxu0 %vm589_vm2, %v989_v9  ;;  %v1259_v9 = vadd.f32 %v7934_v26, %v7832_v23  ;;  %v1530_v26 = vadd.f32 %v7832_v23, %v7948_v34  ;;  %v1540_v34 = vadd.f32 %v7832_v23, %v7952_v36  ;;  %v1559_v3 = vmax.f32 %v1525_v2, 0.0 }
 0x20b   : > { %6453 = vmatprep.mubr.msk.f32.mxu0 %vm589_vm2, %v990_v10  ;;  %v1264_v10 = vadd.f32 %v7832_v23, %v7940_v30  ;;  %v1558_v30 = vmax.f32 %v1520_v24, 0.0  ;;  %v1561_v5 = vmax.f32 %v1535_v31, 0.0  ;;  %v1563_v19 = vmax.f32 %v1545_v22, 0.0 }
 0x20c   : > { %v1562_v16 = vmax.f32 %v1540_v34, 0.0  ;;  %v1846_v21 = vmax.f32 %v1816_v35, 0.0  ;;  %v1826_v42 = vadd.f32 %v7832_v23, %v7968_v44  ;;  %v2117_v34 = vadd.f32 %v7982_v50, %v7832_v23 }
 0x20d   : > { %v1278_v27 = vmax.f32 %v1264_v10, 0.0  ;;  %v2127_v31 = vadd.f32 %v7986_v52, %v7832_v23  ;;  %v2388_v50 = vadd.f32 %v7832_v23, %v7996_v57  ;;  %v2398_v52 = vadd.f32 %v7832_v23, %v8000_v59 }
 0x20e   : > { %6454 = vmatmul.mubr.msk.f32.gmra.mrb[4].mxu0 %vm589_vm2, %v991_v17  ;;  %v1560_v17 = vmax.f32 %v1530_v26, 0.0  ;;  %v1848_v10 = vmax.f32 %v1826_v42, 0.0  ;;  %v10242_v42 = vld [vmem:[#allocation7_spill] sm:$0xff] }
 0x20f   : > { %6456 = vmatprep.mubr.msk.f32.mxu0 %vm589_vm2, %v992_v6  ;;  %v1279_v6 = vmax.f32 %v1269_v18, 0.0  ;;  %v2420_v57 = vmax.f32 %v2398_v52, 0.0  ;;  %v3521_v52 = vld [vmem:[%s10232_s5 + $0x1a8] sm:$0xff] }
 0x212   : > { %6457 = vmatmul.mubr.msk.f32.gmra.mrb[6].mxu0 %vm589_vm2, %v993_v7  ;;  %v1550_v7 = vadd.f32 %v7832_v23, %v7956_v38  ;;  %v1844_v38 = vmax.f32 %v1806_v33, 0.0 }
 0x213   : > { %6485 = vmatprep.mubr.msk.f32.mxu0 %vm589_vm2, %v1272_v20  ;;  %v6767_v20 = vpack.c.bf16 %v5511_v29, %v5510_v32  ;;  %v2122_v29 = vadd.f32 %v7832_v23, %v7988_v53 }
 0x214   : > { %v1564_v36 = vmax.f32 %v1550_v7, 0.0  ;;  %v2418_v7 = vmax.f32 %v2388_v50, 0.0  ;;  %v3488_v50 = vld [vmem:[%s10232_s5 + $0xa0] sm:$0xff] }
 0x216   : > { %6486 = vmatmul.mubr.msk.f32.vlgmr.msra.gmra.mrb[0].mxu0 %vm589_vm2, %v1273_v14  ;;  %v1811_v14 = vadd.f32 %v7958_v39, %v7832_v23  ;;  %v1821_v39 = vadd.f32 %v7962_v41, %v7832_v23  ;;  %v2092_v41 = vadd.f32 %v7832_v23, %v7976_v47  ;;  %v5564_v47 = vld [vmem:[%s10230_s3 + $0x80] sm:$0xff] }
 0x217   : > { %6746 = vmatpush3.bf16.msra.mxu0 %v6743_v8  ;;  %6488 = vmatprep.mubr.msk.f32.mxu0 %vm589_vm2, %v1274_v12  ;;  %v1277_v8 = vmax.f32 %v1259_v9, 0.0  ;;  %v1555_v12 = vadd.f32 %v7954_v37, %v7832_v23  ;;  %v5538_v37 = vld [vmem:[%s10230_s3 + $0x78] sm:$0xff] }
 0x218   : > { %6756 = vmatprep.subr.bf16.mxu0 %v6755_v15  ;;  %v1847_v9 = vmax.f32 %v1821_v39, 0.0 }
 0x219   : > { %v1565_v25 = vmax.f32 %v1555_v12, 0.0 }
 0x21a   : > { %6489 = vmatmul.mubr.msk.f32.gmra.mrb[2].mxu0 %vm589_vm2, %v1275_v11  ;;  %v1836_v11 = vadd.f32 %v7832_v23, %v7972_v46  ;;  %v2130_v46 = vmax.f32 %v2092_v41, 0.0 }
 0x21b   : > { %6491 = vmatprep.mubr.msk.f32.mxu0 %vm589_vm2, %v1276_v13  ;;  %v6779_v13 = vpack.c.bf16 %v5538_v37, %v5537_v40 }
 0x21c   : > { %v1850_v44 = vmax.f32 %v1836_v11, 0.0 }
 0x21e   : > { %6492 = vmatmul.mubr.msk.f32.gmra.mrb[4].mxu0 %vm589_vm2, %v1277_v8  ;;  %v1841_v8 = vadd.f32 %v7970_v45, %v7832_v23  ;;  %v5565_v45 = vld [vmem:[%s10230_s3 + $0x88] sm:$0xff] }
 0x21f   : > { %6494 = vmatprep.mubr.msk.f32.mxu0 %vm589_vm2, %v1278_v27  ;;  %v1831_v27 = vadd.f32 %v7966_v43, %v7832_v23  ;;  %v2102_v43 = vadd.f32 %v7832_v23, %v7980_v49  ;;  %v2112_v49 = vadd.f32 %v7832_v23, %v7984_v51  ;;  %v6791_v2 = vpack.c.bf16 %v5565_v45, %v5564_v47  ;;  %v3518_v47 = vld [vmem:[%s10232_s5 + $0x190] sm:$0xff]  ;;  %v3519_v45 = vld [vmem:[%s10232_s5 + $0x198] sm:$0xff] }
 0x220   : > { %v1851_v18 = vmax.f32 %v1841_v8, 0.0  ;;  %v2136_v51 = vmax.f32 %v2122_v29, 0.0  ;;  %v3500_v8 = vld [vmem:[%s10232_s5 + $0x100] sm:$0xff]  ;;  %v3503_v29 = vld [vmem:[%s10232_s5 + $0x118] sm:$0xff] }
 0x221   : > { %v1849_v24 = vmax.f32 %v1831_v27, 0.0  ;;  %v2132_v26 = vmax.f32 %v2102_v43, 0.0  ;;  %v2134_v32 = vmax.f32 %v2112_v49, 0.0  ;;  %v3468_v27 = vld [vmem:[%s10232_s5] sm:$0xff]  ;;  %v3486_v43 = vld [vmem:[%s10232_s5 + $0x90] sm:$0xff]  ;;  %v6831_v49 = vpack.c.bf16 %v3519_v45, %v3518_v47 }
 0x222   : > { %6495 = vmatmul.mubr.msk.f32.gmra.mrb[6].mxu0 %vm589_vm2, %v1279_v6 }
 0x223   : > { %6523 = vmatprep.mubr.msk.f32.mxu0 %vm589_vm2, %v1558_v30  ;;  %v2097_v30 = vadd.f32 %v7974_v28, %v7832_v23  ;;  %v2107_v28 = vadd.f32 %v7978_v48, %v7832_v23  ;;  %v2378_v48 = vadd.f32 %v7832_v23, %v7992_v55 }
 0x225   : > { %v2131_v6 = vmax.f32 %v2097_v30, 0.0  ;;  %v2416_v53 = vmax.f32 %v2378_v48, 0.0  ;;  %v3487_v30 = vld [vmem:[%s10232_s5 + $0x98] sm:$0xff] }
 0x226   : > { %6524 = vmatmul.mubr.msk.f32.vlgmr.msra.gmra.mrb[0].mxu0 %vm589_vm2, %v1559_v3  ;;  %v2135_v3 = vmax.f32 %v2117_v34, 0.0  ;;  %v2873_v34 = vlaneseq }
 0x227   : > { %6758 = vmatpush3.bf16.msra.mxu0 %v6755_v15  ;;  %6526 = vmatprep.mubr.msk.f32.mxu0 %vm589_vm2, %v1560_v17  ;;  %v1845_v15 = vmax.f32 %v1811_v14, 0.0  ;;  %v2133_v17 = vmax.f32 %v2107_v28, 0.0  ;;  %v3471_v28 = vld [vmem:[%s10232_s5 + $0x18] sm:$0xff] }
 0x228   : > { %6768 = vmatprep.subr.bf16.mxu0 %v6767_v20  ;;  %vm8303_vm3 = vcmp.lt.s32.totalorder %v2873_v34, 64  ;;  %vm2904_vm4 = vcmp.ge.s32.totalorder %v2873_v34, 64  ;;  %vm2905_vm5 = vcmp.lt.s32.totalorder %v2873_v34, 128 }
 0x229   : > { %vm8678_vm6 = vmand %vm2904_vm4, %vm2905_vm5 }
 0x22a   : > { %6527 = vmatmul.mubr.msk.f32.gmra.mrb[2].mxu0 %vm589_vm2, %v1561_v5  ;;  %v2393_v5 = vadd.f32 %v7994_v56, %v7832_v23  ;;  %v2664_v56 = vadd.f32 %v7832_v23, %v8008_v63  ;;  %v2679_v63 = vadd.f32 %v8010_v0, %v7832_v23 }
 0x22b   : > { %6529 = vmatprep.mubr.msk.f32.mxu0 %vm589_vm2, %v1562_v16  ;;  %v2383_v16 = vadd.f32 %v7990_v54, %v7832_v23  ;;  %v2408_v54 = vadd.f32 %v7832_v23, %v8004_v61 }
 0x22c   : > { %v2419_v22 = vmax.f32 %v2393_v5, 0.0  ;;  %v2702_v12 = vmax.f32 %v2664_v56, 0.0  ;;  %v2705_v14 = vmax.f32 %v2679_v63, 0.0  ;;  %v3473_v5 = vld [vmem:[%s10232_s5 + $0x28] sm:$0xff]  ;;  %v3491_v63 = vld [vmem:[%s10232_s5 + $0xb8] sm:$0xff] }
 0x22d   : > { %v2417_v55 = vmax.f32 %v2383_v16, 0.0  ;;  %v2422_v59 = vmax.f32 %v2408_v54, 0.0  ;;  %v3520_v16 = vld [vmem:[%s10232_s5 + $0x1a0] sm:$0xff] }
 0x22e   : > { %6530 = vmatmul.mubr.msk.f32.gmra.mrb[4].mxu0 %vm589_vm2, %v1563_v19  ;;  %v2413_v19 = vadd.f32 %v8002_v60, %v7832_v23  ;;  %v2684_v60 = vadd.f32 %v7832_v23, %v8016_v4  ;;  %v6835_v54 = vpack.c.bf16 %v3521_v52, %v3520_v16 }
 0x22f   : > { %6532 = vmatprep.mubr.msk.f32.mxu0 %vm589_vm2, %v1564_v36  ;;  %v2403_v36 = vadd.f32 %v7998_v58, %v7832_v23  ;;  %v2674_v58 = vadd.f32 %v7832_v23, %v8012_v1  ;;  %v10240_v1 = vld [vmem:[#allocation6_spill] sm:$0xff] }
 0x230   : > { %v2423_v61 = vmax.f32 %v2413_v19, 0.0  ;;  %v2689_v40 = vadd.f32 %v10240_v1, %v7832_v23  ;;  %v2706_v37 = vmax.f32 %v2684_v60, 0.0  ;;  %v3474_v1 = vld [vmem:[%s10232_s5 + $0x30] sm:$0xff] }
 0x231   : > { %v2421_v33 = vmax.f32 %v2403_v36, 0.0  ;;  %v2704_v35 = vmax.f32 %v2674_v58, 0.0  ;;  %v3504_v36 = vld [vmem:[%s10232_s5 + $0x120] sm:$0xff] }
 0x232   : > { %6533 = vmatmul.mubr.msk.f32.gmra.mrb[6].mxu0 %vm589_vm2, %v1565_v25  ;;  %v2707_v0 = vmax.f32 %v2689_v40, 0.0  ;;  %v3475_v40 = vld [vmem:[%s10232_s5 + $0x38] sm:$0xff] }
 0x233   : > { %6561 = vmatprep.mubr.msk.f32.mxu0 %vm589_vm2, %v1844_v38  ;;  %v2669_v38 = vadd.f32 %v8006_v62, %v7832_v23  ;;  %v10241_v62 = vld [vmem:[#allocation8_spill] sm:$0xff] }
 0x235   : > { %v2703_v25 = vmax.f32 %v2669_v38, 0.0  ;;  %v3490_v38 = vld [vmem:[%s10232_s5 + $0xb0] sm:$0xff] }
 0x236   : > { %6562 = vmatmul.mubr.msk.f32.vlgmr.msra.gmra.mrb[0].mxu0 %vm589_vm2, %v1845_v15  ;;  %v2699_v15 = vadd.f32 %v10242_v42, %v7832_v23  ;;  %v3506_v42 = vld [vmem:[%s10232_s5 + $0x130] sm:$0xff] }
 0x237   : > { %6770 = vmatpush3.bf16.msra.mxu0 %v6767_v20  ;;  %6564 = vmatprep.mubr.msk.f32.mxu0 %vm589_vm2, %v1846_v21  ;;  %v2137_v20 = vmax.f32 %v2127_v31, 0.0  ;;  %v2694_v21 = vadd.f32 %v7832_v23, %v10241_v62  ;;  %v3516_v23 = vld [vmem:[%s10232_s5 + $0x180] sm:$0xff] }
 0x238   : > { %6780 = vmatprep.subr.bf16.mxu0 %v6779_v13  ;;  %v2709_v39 = vmax.f32 %v2699_v15, 0.0  ;;  %v3507_v15 = vld [vmem:[%s10232_s5 + $0x138] sm:$0xff] }
 0x239   : > { %v2708_v4 = vmax.f32 %v2694_v21, 0.0 }
 0x23a   : > { %6565 = vmatmul.mubr.msk.f32.gmra.mrb[2].mxu0 %vm589_vm2, %v1847_v9  ;;  %v3517_v9 = vld [vmem:[%s10232_s5 + $0x188] sm:$0xff] }
 0x23b   : > { %6567 = vmatprep.mubr.msk.f32.mxu0 %vm589_vm2, %v1848_v10  ;;  %v3485_v10 = vld [vmem:[%s10232_s5 + $0x88] sm:$0xff]  ;;  %v6827_v41 = vpack.c.bf16 %v3517_v9, %v3516_v23 }
 0x23e   : > { %6568 = vmatmul.mubr.msk.f32.gmra.mrb[4].mxu0 %vm589_vm2, %v1849_v24 }
 0x23f   : > { %6570 = vmatprep.mubr.msk.f32.mxu0 %vm589_vm2, %v1850_v44  ;;  %v3469_v44 = vld [vmem:[%s10232_s5 + $0x8] sm:$0xff] }
 0x240   : > { %v6797_v24 = vpack.c.bf16 %v3469_v44, %v3468_v27 }
 0x242   : > { %6571 = vmatmul.mubr.msk.f32.gmra.mrb[6].mxu0 %vm589_vm2, %v1851_v18 }
 0x243   : > { %6599 = vmatprep.mubr.msk.f32.mxu0 %vm589_vm2, %v2130_v46  ;;  %v3501_v46 = vld [vmem:[%s10232_s5 + $0x108] sm:$0xff] }
 0x244   : > { %v6829_v18 = vpack.c.bf16 %v3501_v46, %v3500_v8 }
 0x246   : > { %6600 = vmatmul.mubr.msk.f32.vlgmr.msra.gmra.mrb[0].mxu0 %vm589_vm2, %v2131_v6  ;;  %v3470_v6 = vld [vmem:[%s10232_s5 + $0x10] sm:$0xff] }
 0x247   : > { %6782 = vmatpush3.bf16.msra.mxu0 %v6779_v13  ;;  %6602 = vmatprep.mubr.msk.f32.mxu0 %vm589_vm2, %v2132_v26  ;;  %v3484_v13 = vld [vmem:[%s10232_s5 + $0x80] sm:$0xff]  ;;  %v6799_v26 = vpack.c.bf16 %v3487_v30, %v3486_v43 }
 0x248   : > { %6792 = vmatprep.subr.bf16.mxu0 %v6791_v2  ;;  %v6795_v11 = vpack.c.bf16 %v3485_v10, %v3484_v13  ;;  %v6841_v10 = vpack.c.bf16 %v3507_v15, %v3506_v42  ;;  %v3508_v15 = vld [vmem:[%s10232_s5 + $0x140] sm:$0xff] }
 0x24a   : > { %6603 = vmatmul.mubr.msk.f32.gmra.mrb[2].mxu0 %vm589_vm2, %v2133_v17  ;;  %6796 = vmatprep.subr.bf16.mxu1 %v6795_v11 }
 0x24b   : > { %6605 = vmatprep.mubr.msk.f32.mxu0 %vm589_vm2, %v2134_v32  ;;  %6798 = vmatpush3.bf16.msra.mxu1 %v6797_v24  ;;  %v6801_v32 = vpack.c.bf16 %v3471_v28, %v3470_v6 }
 0x24c   : > { %6800 = vmatprep.subr.bf16.mxu1 %v6799_v26 }
 0x24e   : > { %6606 = vmatmul.mubr.msk.f32.gmra.mrb[4].mxu0 %vm589_vm2, %v2135_v3  ;;  %v8268_v3 = vld [vmem:[%s10231_s4] ss:$0 sm:$0xff] }
 0x24f   : > { %6608 = vmatprep.mubr.msk.f32.mxu0 %vm589_vm2, %v2136_v51  ;;  %6802 = vmatpush3.bf16.msra.mxu1 %v6801_v32  ;;  %v7483_v51 = vmov 1966171168  }
 0x250   : > { %v2880_v48 = vunpack.c.l.s4 %v7483_v51 }
 0x252   : > { %6609 = vmatmul.mubr.msk.f32.gmra.mrb[6].mxu0 %vm589_vm2, %v2137_v20  ;;  %v2881_v31 = vunpack.c.0.s8 %v2880_v48  ;;  %v3489_v20 = vld [vmem:[%s10232_s5 + $0xa8] sm:$0xff] }
 0x253   : > { %6637 = vmatprep.mubr.msk.f32.mxu0 %vm589_vm2, %v2416_v53  ;;  %v8271_v53 = vshrl.u32 %v2873_v34, 7 }
 0x256   : > { %6638 = vmatmul.mubr.msk.f32.vlgmr.msra.gmra.mrb[0].mxu0 %vm589_vm2, %v2417_v55  ;;  %v3472_v55 = vld [vmem:[%s10232_s5 + $0x20] sm:$0xff] }
 0x257   : > { %6794 = vmatpush3.bf16.msra.mxu0 %v6791_v2  ;;  %6640 = vmatprep.mubr.msk.f32.mxu0 %vm589_vm2, %v2418_v7  ;;  %v3502_v2 = vld [vmem:[%s10232_s5 + $0x110] sm:$0xff]  ;;  %v6803_v7 = vpack.c.bf16 %v3489_v20, %v3488_v50 }
 0x258   : > { %6828 = vmatprep.subr.bf16.mxu0 %v6827_v41  ;;  %v6833_v17 = vpack.c.bf16 %v3503_v29, %v3502_v2 }
 0x259   : > { %6804 = vmatprep.subr.bf16.mxu1 %v6803_v7 }
 0x25a   : > { %6641 = vmatmul.mubr.msk.f32.gmra.mrb[2].mxu0 %vm589_vm2, %v2419_v22  ;;  %v6805_v22 = vpack.c.bf16 %v3473_v5, %v3472_v55 }
 0x25b   : > { %6643 = vmatprep.mubr.msk.f32.mxu0 %vm589_vm2, %v2420_v57 }
 0x25c   : > { %6806 = vmatpush3.bf16.msra.mxu1 %v6805_v22 }
 0x25e   : > { %6644 = vmatmul.mubr.msk.f32.gmra.mrb[4].mxu0 %vm589_vm2, %v2421_v33  ;;  %v8299_v33 = vsub.s32 %v2881_v31, %v8271_v53 }
 0x25f   : > { %6646 = vmatprep.mubr.msk.f32.mxu0 %vm589_vm2, %v2422_v59  ;;  %v3505_v59 = vld [vmem:[%s10232_s5 + $0x128] sm:$0xff] }
 0x262   : > { %6647 = vmatmul.mubr.msk.f32.gmra.mrb[6].mxu0 %vm589_vm2, %v2423_v61 }
 0x263   : > { %6675 = vmatprep.mubr.msk.f32.mxu0 %vm589_vm2, %v2702_v12  ;;  %v6837_v12 = vpack.c.bf16 %v3505_v59, %v3504_v36 }
 0x266   : > { %6676 = vmatmul.mubr.msk.f32.vlgmr.msra.gmra.mrb[0].mxu0 %vm589_vm2, %v2703_v25  ;;  %v6807_v25 = vpack.c.bf16 %v3491_v63, %v3490_v38 }
 0x267   : > { %6678 = vmatprep.mubr.msk.f32.mxu0 %vm589_vm2, %v2704_v35  ;;  %6830 = vmatpush3.bf16.msra.mxu0 %v6829_v18  ;;  %v3522_v35 = vld [vmem:[%s10232_s5 + $0x1b0] sm:$0xff] }
 0x268   : > { %6832 = vmatprep.subr.bf16.mxu0 %v6831_v49  ;;  %6808 = vmatprep.subr.bf16.mxu1 %v6807_v25  ;;  %v3524_v25 = vld [vmem:[%s10232_s5 + $0x1c0] sm:$0xff] }
 0x26a   : > { %6679 = vmatmul.mubr.msk.f32.gmra.mrb[2].mxu0 %vm589_vm2, %v2705_v14  ;;  %v3523_v14 = vld [vmem:[%s10232_s5 + $0x1b8] sm:$0xff] }
 0x26b   : > { %6681 = vmatprep.mubr.msk.f32.mxu0 %vm589_vm2, %v2706_v37  ;;  %6834 = vmatpush3.bf16.msra.mxu0 %v6833_v17  ;;  %v6839_v21 = vpack.c.bf16 %v3523_v14, %v3522_v35  ;;  %v3492_v35 = vld [vmem:[%s10232_s5 + $0xc0] sm:$0xff] }
 0x26c   : > { %6836 = vmatprep.subr.bf16.mxu0 %v6835_v54 }
 0x26e   : > { %6682 = vmatmul.mubr.msk.f32.gmra.mrb[4].mxu0 %vm589_vm2, %v2707_v0  ;;  %v6809_v0 = vpack.c.bf16 %v3475_v40, %v3474_v1  ;;  %v3525_v40 = vld [vmem:[%s10232_s5 + $0x1c8] sm:$0xff] }
 0x26f   : > { %6684 = vmatprep.mubr.msk.f32.mxu0 %vm589_vm2, %v2708_v4  ;;  %6838 = vmatpush3.bf16.msra.mxu0 %v6837_v12 }
 0x270   : > { %6840 = vmatprep.subr.bf16.mxu0 %v6839_v21  ;;  %6810 = vmatpush3.bf16.msra.mxu1 %v6809_v0 }
 0x272   : > { %6685 = vmatmul.mubr.msk.f32.gmra.mrb[6].mxu0 %vm589_vm2, %v2709_v39 }
 0x273   : > { %6842 = vmatpush3.bf16.msra.mxu0 %v6841_v10 }
 0x339   : > { %v6677_v57 = vpop.f32.mrb[0].mxu0 }
 0x33a   : > { %v2858_v56 = vadd.f32 %v6677_v57, %v8268_v3  ;;  %v2803_v19 = vpop.f32.mrb[1].mxu0 }
 0x33b   : > { %v2857_v58 = vadd.f32 %v8268_v3, %v2803_v19 }
 0x33c   : > { %v2866_v60 = vmax.f32 %v2858_v56, 0.0 }
 0x33d   : > { %v2865_v37 = vmax.f32 %v2857_v58, 0.0  ;;  %v6680_v62 = vpop.f32.mrb[2].mxu0 }
 0x33e   : > { %v2860_v4 = vadd.f32 %v6680_v62, %v8268_v3  ;;  %v2813_v39 = vpop.f32.mrb[3].mxu0  ;;  %v2961_v13 = vrot.slane %v2866_v60, %v8299_v33  ;;  %2953 = vst.msk [vmem:[#allocation2 + $0x4] sm:$0x1] %vm8303_vm3, %v2866_v60  ;;  %v2989_v27 = vcombine.high %v2866_v60, %v2866_v60  ;;  %v3493_v60 = vld [vmem:[%s10232_s5 + $0xc8] sm:$0xff] }
 0x33f   : > { %v2885_v23 = vrot.slane %v2865_v37, %v8299_v33  ;;  %v2916_v11 = vcombine.high %v2865_v37, %v2865_v37  ;;  %v2859_v9 = vadd.f32 %v8268_v3, %v2813_v39  ;;  %2877 = vst.msk [vmem:[#allocation2] sm:$0x1] %vm8303_vm3, %v2865_v37  ;;  %v3476_v37 = vld [vmem:[%s10232_s5 + $0x40] sm:$0xff]  ;;  %v3477_v62 = vld [vmem:[%s10232_s5 + $0x48] sm:$0xff]  ;;  %v3494_v39 = vld [vmem:[%s10232_s5 + $0xd0] sm:$0xff] }
 0x340   : > { %v2868_v44 = vmax.f32 %v2860_v4, 0.0  ;;  %v2962_v41 = vcombine.high %v2961_v13, %v2961_v13  ;;  %v8350_v26 = vrot.slane %v2989_v27, %v8299_v33  ;;  %v2969_v56 = vrot.slane %v2961_v13, %v8299_v33  ;;  %v3509_v4 = vld [vmem:[%s10232_s5 + $0x148] sm:$0xff]  ;;  %v3526_v27 = vld [vmem:[%s10232_s5 + $0x1d0] sm:$0xff] }
 0x341   : > { %v8340_v24 = vrot.slane %v2916_v11, %v8299_v33  ;;  %v2867_v8 = vmax.f32 %v2859_v9, 0.0  ;;  %v6683_v46 = vpop.f32.mrb[4].mxu0  ;;  %v2886_v47 = vcombine.high %v2885_v23, %v2885_v23  ;;  %v2893_v63 = vrot.slane %v2885_v23, %v8299_v33  ;;  %v3495_v9 = vld [vmem:[%s10232_s5 + $0xd8] sm:$0xff] }
 0x342   : > { %v2862_v43 = vadd.f32 %v6683_v46, %v8268_v3  ;;  %v2823_v18 = vpop.f32.mrb[5].mxu0  ;;  %v2976_v30 = vrot.slane %v2962_v41, %v8299_v33  ;;  %3099 = vst.msk [vmem:[#allocation2 + $0xc] sm:$0x1] %vm8303_vm3, %v2868_v44  ;;  %v8370_v31 = vrot.slane %v2868_v44, %v8299_v33  ;;  %v3006_v16 = vcombine.high %v8350_v26, %v8350_v26 }
 0x343   : > { %v2861_v45 = vadd.f32 %v8268_v3, %v2823_v18  ;;  %3026 = vst.msk [vmem:[#allocation2 + $0x8] sm:$0x1] %vm8303_vm3, %v2867_v8  ;;  %v2933_v28 = vcombine.high %v8340_v24, %v8340_v24  ;;  %v2900_v51 = vrot.slane %v2886_v47, %v8299_v33  ;;  %v8387_v55 = vrot.slane %v2867_v8, %v8299_v33  ;;  %v3479_v18 = vld [vmem:[%s10232_s5 + $0x58] sm:$0xff] }
 0x344   : > { %v8352_v49 = vmax.f32 %v2862_v43, 0.0  ;;  %2977 = vrot.lane.b32.xlu0 %v2976_v30, %s7484_s20  ;;  %v2984_v6 = vcombine.high %v2976_v30, %v2976_v30  ;;  %v3062_v5 = vcombine.high %v2867_v8, %v2867_v8  ;;  %v3013_v54 = vrot.slane %v3006_v16, %v8299_v33  ;;  %v3478_v43 = vld [vmem:[%s10232_s5 + $0x50] sm:$0xff]  ;;  %v3528_v16 = vld [vmem:[%s10232_s5 + $0x1e0] sm:$0xff] }
 0x345   : > { %v8357_v2 = vmax.f32 %v2861_v45, 0.0  ;;  %v6686_v32 = vpop.f32.mrb[6].mxu0  ;;  %v2940_v20 = vrot.slane %v2933_v28, %v8299_v33  ;;  %v2911_v52 = vcombine.high %v2900_v51, %v2900_v51  ;;  %v3108_v22 = vcombine.high %v8370_v31, %v8370_v31  ;;  %v3510_v28 = vld [vmem:[%s10232_s5 + $0x150] sm:$0xff] }
 0x346   : > { %v2864_v29 = vadd.f32 %v6686_v32, %v8268_v3  ;;  %2985 = vrot.lane.b32.xlu1 %v2984_v6, %s7484_s20  ;;  %v2833_v17 = vpop.f32.mrb[7].mxu0  ;;  %3245 = vst.msk [vmem:[#allocation2 + $0x14] sm:$0x1] %vm8303_vm3, %v8352_v49  ;;  %v3135_v36 = vcombine.high %v2868_v44, %v2868_v44  ;;  %v8402_v19 = vrot.slane %v3062_v5, %v8299_v33  ;;  %v3527_v44 = vld [vmem:[%s10232_s5 + $0x1d8] sm:$0xff] }
 0x347   : > { %v2863_v48 = vadd.f32 %v8268_v3, %v2833_v17  ;;  %3172 = vst.msk [vmem:[#allocation2 + $0x10] sm:$0x1] %vm8303_vm3, %v8357_v2  ;;  %v2948_v57 = vcombine.high %v2940_v20, %v2940_v20  ;;  %v3035_v12 = vcombine.high %v8387_v55, %v8387_v55  ;;  %v3021_v58 = vcombine.high %v3013_v54, %v3013_v54  ;;  %v3511_v32 = vld [vmem:[%s10232_s5 + $0x158] sm:$0xff] }
 0x348   : > { %v8372_v50 = vmax.f32 %v2864_v29, 0.0  ;;  %2901 = vrot.lane.b32.xlu0 %v2900_v51, %s7484_s20  ;;  %v3122_v38 = vrot.slane %v3108_v22, %v8299_v33  ;;  %v8419_v14 = vrot.slane %v3135_v36, %v8299_v33  ;;  %v8434_v21 = vrot.slane %v8352_v49, %v8299_v33  ;;  %v3496_v29 = vld [vmem:[%s10232_s5 + $0xe0] sm:$0xff] }
 0x349   : > { %v8378_v7 = vmax.f32 %v2863_v48, 0.0  ;;  %v3281_v0 = vcombine.high %v8352_v49, %v8352_v49  ;;  %v2981_v42 = vcombine.high %v2969_v56, %v2969_v56  ;;  %v3049_v13 = vrot.slane %v3035_v12, %v8299_v33  ;;  %v3480_v36 = vld [vmem:[%s10232_s5 + $0x60] sm:$0xff]  ;;  %v3481_v56 = vld [vmem:[%s10232_s5 + $0x68] sm:$0xff] }
 0x34a   : > { %v3427_v3 = vcombine.high %v8372_v50, %v8372_v50  ;;  %2941 = vrot.lane.b32.xlu1 %v2940_v20, %s7484_s20  ;;  %3391 = vst.msk [vmem:[#allocation2 + $0x1c] sm:$0x1] %vm8303_vm3, %v8372_v50  ;;  %v3079_v10 = vcombine.high %v8402_v19, %v8402_v19  ;;  %v2930_v11 = vrot.slane %v8340_v24, %v8299_v33  ;;  %v3497_v20 = vld [vmem:[%s10232_s5 + $0xe8] sm:$0xff]  ;;  %v3512_v12 = vld [vmem:[%s10232_s5 + $0x160] sm:$0xff] }
 0x34b   : > { %3318 = vst.msk [vmem:[#allocation2 + $0x18] sm:$0x1] %vm8303_vm3, %v8378_v7  ;;  %v3130_v41 = vcombine.high %v3122_v38, %v3122_v38  ;;  %2983 = vst.msk [vmem:[#allocation2 + $0x5] sm:$0x1] %vm8303_vm3, %v2981_v42  ;;  %v2908_v8 = vcombine.high %v2893_v63, %v2893_v63  ;;  %v6811_v24 = vpack.c.bf16 %v3493_v60, %v3492_v35  ;;  %v3513_v63 = vld [vmem:[%s10232_s5 + $0x168] sm:$0xff]  ;;  %v3498_v60 = vld [vmem:[%s10232_s5 + $0xf0] sm:$0xff] }
 0x34c   : > { %2912 = vrot.lane.b32.xlu0 %v2911_v52, %s7484_s20  ;;  %v8397_v59 = vrot.slane %v3427_v3, %v8299_v33  ;;  %v6843_v46 = vpack.c.bf16 %v3525_v40, %v3524_v25  ;;  %v3152_v30 = vcombine.high %v8419_v14, %v8419_v14  ;;  %2932 = vst.msk [vmem:[#allocation2 + $0x2] sm:$0x1] %vm8303_vm3, %v2930_v11  ;;  %v3529_v3 = vld [vmem:[%s10232_s5 + $0x1e8] sm:$0xff]  ;;  %v3499_v25 = vld [vmem:[%s10232_s5 + $0xf8] sm:$0xff] }
 0x34d   : > { %v6813_v47 = vpack.c.bf16 %v3477_v62, %v3476_v37  ;;  %v6845_v45 = vpack.c.bf16 %v3509_v4, %v3508_v15  ;;  %v2945_v6 = vcombine.high %v2930_v11, %v2930_v11  ;;  %2910 = vst.msk [vmem:[#allocation2 + $0x1] sm:$0x1] %vm8303_vm3, %v2908_v8  ;;  %6812 = vmatprep.subr.bf16.mxu1 %v6811_v24  ;;  %v3531_v62 = vld [vmem:[%s10232_s5 + $0x1f8] sm:$0xff]  ;;  %v3482_v11 = vld [vmem:[%s10232_s5 + $0x70] sm:$0xff]  ;;  %v3549_v49 = vld [vmem:[%s10232_s5 + $0x288] sm:$0xff] }
 0x34e   : > { %2949 = vrot.lane.b32.xlu1 %v2948_v57, %s7484_s20  ;;  %v3444_v1 = vcombine.high %v8397_v59, %v8397_v59  ;;  %v3003_v17 = vrot.slane %v8350_v26, %v8299_v33  ;;  %v6815_v51 = vpack.c.bf16 %v3495_v9, %v3494_v39  ;;  %v6847_v48 = vpack.c.bf16 %v3527_v44, %v3526_v27  ;;  %v3514_v27 = vld [vmem:[%s10232_s5 + $0x170] sm:$0xff]  ;;  %v3515_v44 = vld [vmem:[%s10232_s5 + $0x178] sm:$0xff] }
 0x34f   : > { %v8503_v52 = vrot.slane %v8357_v2, %v8299_v33  ;;  %v3086_v26 = vrot.slane %v3079_v10, %v8299_v33  ;;  %6844 = vmatprep.subr.bf16.mxu0 %v6843_v46  ;;  %6814 = vmatpush3.bf16.msra.mxu1 %v6813_v47  ;;  %2947 = vst.msk [vmem:[#allocation2 + $0x3] sm:$0x1] %vm8303_vm3, %v2945_v6 }
 0x350   : > { %3014 = vrot.lane.b32.xlu0 %v3013_v54, %s7484_s20  ;;  %v8452_v23 = vrot.slane %v3444_v1, %v8299_v33  ;;  %v6817_v5 = vpack.c.bf16 %v3479_v18, %v3478_v43  ;;  %v3057_v57 = vcombine.high %v3049_v13, %v3049_v13  ;;  %6846 = vmatpush3.bf16.msra.mxu0 %v6845_v45 }
 0x351   : > { %3005 = vst.msk [vmem:[#allocation2 + $0x6] sm:$0x1] %vm8303_vm3, %v3003_v17  ;;  %v6849_v54 = vpack.c.bf16 %v3511_v32, %v3510_v28  ;;  %v3018_v22 = vcombine.high %v3003_v17, %v3003_v17  ;;  %6816 = vmatprep.subr.bf16.mxu1 %v6815_v51  ;;  %6848 = vmatprep.subr.bf16.mxu0 %v6847_v48 }
 0x352   : > { %3022 = vrot.lane.b32.xlu1 %v3021_v58, %s7484_s20  ;;  %v6819_v58 = vpack.c.bf16 %v3497_v20, %v3496_v29  ;;  %v3115_v35 = vrot.slane %v8370_v31, %v8299_v33  ;;  %v3208_v1 = vcombine.high %v8357_v2, %v8357_v2  ;;  %v3159_v40 = vrot.slane %v3152_v30, %v8299_v33  ;;  %v3530_v31 = vld [vmem:[%s10232_s5 + $0x1f0] sm:$0xff] }
 0x353   : > { %v3254_v37 = vcombine.high %v8434_v21, %v8434_v21  ;;  %3020 = vst.msk [vmem:[#allocation2 + $0x7] sm:$0x1] %vm8303_vm3, %v3018_v22  ;;  %v3042_v2 = vrot.slane %v8387_v55, %v8299_v33  ;;  %v3094_v42 = vcombine.high %v3086_v26, %v3086_v26  ;;  %6818 = vmatpush3.bf16.msra.mxu1 %v6817_v5  ;;  %v3483_v55 = vld [vmem:[%s10232_s5 + $0x78] sm:$0xff] }
 0x354   : > { %3123 = vrot.lane.b32.xlu0 %v3122_v38, %s7484_s20  ;;  %v6851_v38 = vpack.c.bf16 %v3529_v3, %v3528_v16  ;;  %v6821_v15 = vpack.c.bf16 %v3481_v56, %v3480_v36  ;;  %v3127_v4 = vcombine.high %v3115_v35, %v3115_v35  ;;  %v3076_v39 = vrot.slane %v8402_v19, %v8299_v33 }
 0x355   : > { %6850 = vmatpush3.bf16.msra.mxu0 %v6849_v54  ;;  %v6823_v10 = vpack.c.bf16 %v3499_v25, %v3498_v60  ;;  %v3054_v9 = vcombine.high %v3042_v2, %v3042_v2  ;;  %6820 = vmatprep.subr.bf16.mxu1 %v6819_v58  ;;  %v6855_v19 = vpack.c.bf16 %v3531_v62, %v3530_v31 }
 0x356   : > { %3131 = vrot.lane.b32.xlu1 %v3130_v41, %s7484_s20  ;;  %6852 = vmatprep.subr.bf16.mxu0 %v6851_v38  ;;  %3129 = vst.msk [vmem:[#allocation2 + $0xd] sm:$0x1] %vm8303_vm3, %v3127_v4  ;;  %3078 = vst.msk [vmem:[#allocation2 + $0xa] sm:$0x1] %vm8303_vm3, %v3076_v39  ;;  %v3548_v41 = vld [vmem:[%s10232_s5 + $0x280] sm:$0xff]  ;;  %v3091_v8 = vcombine.high %v3076_v39, %v3076_v39  ;;  %v3149_v24 = vrot.slane %v8419_v14, %v8299_v33 }
 0x357   : > { %v8575_v46 = vrot.slane %v3281_v0, %v8299_v33  ;;  %v3215_v43 = vrot.slane %v3208_v1, %v8299_v33  ;;  %v8580_v18 = vrot.slane %v8372_v50, %v8299_v33  ;;  %v3354_v30 = vcombine.high %v8378_v7, %v8378_v7  ;;  %3056 = vst.msk [vmem:[#allocation2 + $0x9] sm:$0x1] %vm8303_vm3, %v3054_v9  ;;  %v3580_v14 = vld [vmem:[%s10232_s5 + $0x380] sm:$0xff]  ;;  %v3581_v50 = vld [vmem:[%s10232_s5 + $0x388] sm:$0xff] }
 0x358   : > { %3050 = vrot.lane.b32.xlu0 %v3049_v13, %s7484_s20  ;;  %v6853_v13 = vpack.c.bf16 %v3513_v63, %v3512_v12  ;;  %v3268_v0 = vrot.slane %v3254_v37, %v8299_v33  ;;  %v3181_v47 = vcombine.high %v8503_v52, %v8503_v52  ;;  %6822 = vmatpush3.bf16.msra.mxu1 %v6821_v15 }
 0x359   : > { %v6825_v45 = vpack.c.bf16 %v3483_v55, %v3482_v11  ;;  %3093 = vst.msk [vmem:[#allocation2 + $0xb] sm:$0x1] %vm8303_vm3, %v3091_v8  ;;  %3151 = vst.msk [vmem:[#allocation2 + $0xe] sm:$0x1] %vm8303_vm3, %v3149_v24  ;;  %v3164_v6 = vcombine.high %v3149_v24, %v3149_v24  ;;  %v3167_v28 = vcombine.high %v3159_v40, %v3159_v40  ;;  %6824 = vmatprep.subr.bf16.mxu1 %v6823_v10 }
 0x35a   : > { %3058 = vrot.lane.b32.xlu1 %v3057_v57, %s7484_s20  ;;  %6854 = vmatpush3.bf16.msra.mxu0 %v6853_v13  ;;  %v6857_v32 = vpack.c.bf16 %v3515_v44, %v3514_v27  ;;  %v3261_v29 = vrot.slane %v8434_v21, %v8299_v33  ;;  %v6859_v17 = vpack.c.bf16 %v3549_v49, %v3548_v41  ;;  %v8715_v49 = vsub.s32 0, %v8271_v53 }
 0x35b   : > { %6856 = vmatprep.subr.bf16.mxu0 %v6855_v19  ;;  %v6891_v51 = vpack.c.bf16 %v3581_v50, %v3580_v14  ;;  %3166 = vst.msk [vmem:[#allocation2 + $0xf] sm:$0x1] %vm8303_vm3, %v3164_v6  ;;  %v3188_v48 = vrot.slane %v8503_v52, %v8299_v33  ;;  %v3326_v20 = vrot.slane %v8378_v7, %v8299_v33  ;;  %v8718_v14 = vsub.s32 2, %v8271_v53  ;;  %v3564_v50 = vld [vmem:[%s10232_s5 + $0x300] sm:$0xff]  ;;  %v3551_v6 = vld [vmem:[%s10232_s5 + $0x298] sm:$0xff] }
 0x35c   : > { %3087 = vrot.lane.b32.xlu0 %v3086_v26, %s7484_s20  ;;  %v3361_v16 = vrot.slane %v3354_v30, %v8299_v33  ;;  %v3273_v3 = vcombine.high %v3261_v29, %v3261_v29  ;;  %v3222_v21 = vrot.slane %v3215_v43, %v8299_v33  ;;  %v3195_v26 = vrot.slane %v3181_v47, %v8299_v33 }
 0x35d   : > { %v3225_v5 = vcombine.high %v3215_v43, %v3215_v43  ;;  %6826 = vmatpush3.bf16.msra.mxu1 %v6825_v45  ;;  %v3200_v57 = vcombine.high %v3188_v48, %v3188_v48  ;;  %v3295_v54 = vrot.slane %v8575_v46, %v8299_v33  ;;  %v3276_v52 = vcombine.high %v3268_v0, %v3268_v0  ;;  %v3533_v43 = vld [vmem:[%s10232_s5 + $0x208] sm:$0xff]  ;;  %v3550_v45 = vld [vmem:[%s10232_s5 + $0x290] sm:$0xff] }
 0x35e   : > { %3095 = vrot.lane.b32.xlu1 %v3094_v42, %s7484_s20  ;;  %6858 = vmatpush3.bf16.msra.mxu0 %v6857_v32  ;;  %3275 = vst.msk [vmem:[#allocation2 + $0x15] sm:$0x1] %vm8303_vm3, %v3273_v3  ;;  %3224 = vst.msk [vmem:[#allocation2 + $0x12] sm:$0x1] %vm8303_vm3, %v3222_v21  ;;  %v3237_v7 = vcombine.high %v3222_v21, %v3222_v21  ;;  %v3407_v22 = vrot.slane %v8580_v18, %v8299_v33  ;;  %v8712_v30 = vsub.s32 3, %v8271_v53 }
 0x35f   : > { %6860 = vmatprep.subr.bf16.mxu1 %v6859_v17  ;;  %6892 = vmatprep.subr.bf16.mxu0 %v6891_v51  ;;  %3202 = vst.msk [vmem:[#allocation2 + $0x11] sm:$0x1] %vm8303_vm3, %v3200_v57  ;;  %3297 = vst.msk [vmem:[#allocation2 + $0x16] sm:$0x1] %vm8303_vm3, %v3295_v54  ;;  %v3310_v36 = vcombine.high %v3295_v54, %v3295_v54  ;;  %v3334_v12 = vrot.slane %v3326_v20, %v8299_v33  ;;  %v8737_v51 = vsub.s32 5, %v8271_v53  ;;  %v3534_v57 = vld [vmem:[%s10232_s5 + $0x210] sm:$0xff] }
 0x360   : > { %3160 = vrot.lane.b32.xlu0 %v3159_v40, %s7484_s20  ;;  %3239 = vst.msk [vmem:[#allocation2 + $0x13] sm:$0x1] %vm8303_vm3, %v3237_v7  ;;  %v3419_v56 = vcombine.high %v3407_v22, %v3407_v22  ;;  %v3368_v58 = vrot.slane %v3361_v16, %v8299_v33  ;;  %v3298_v38 = vcombine.high %v8575_v46, %v8575_v46  ;;  %v3532_v46 = vld [vmem:[%s10232_s5 + $0x200] sm:$0xff]  ;;  %v8740_v48 = vsub.s32 7, %v8271_v53  ;;  %v3535_v54 = vld [vmem:[%s10232_s5 + $0x218] sm:$0xff]  ;;  %v3566_v7 = vld [vmem:[%s10232_s5 + $0x310] sm:$0xff] }
 0x361   : > { %3312 = vst.msk [vmem:[#allocation2 + $0x17] sm:$0x1] %vm8303_vm3, %v3310_v36  ;;  %v3441_v63 = vrot.slane %v8397_v59, %v8299_v33  ;;  %v3203_v35 = vcombine.high %v3195_v26, %v3195_v26  ;;  %v3232_v60 = vrot.slane %v3225_v5, %v8299_v33  ;;  %v3346_v25 = vcombine.high %v3334_v12, %v3334_v12  ;;  %v3567_v22 = vld [vmem:[%s10232_s5 + $0x318] sm:$0xff]  ;;  %v3552_v36 = vld [vmem:[%s10232_s5 + $0x2a0] sm:$0xff] }
 0x362   : > { %3168 = vrot.lane.b32.xlu1 %v3167_v28, %s7484_s20  ;;  %3421 = vst.msk [vmem:[#allocation2 + $0x1d] sm:$0x1] %vm8303_vm3, %v3419_v56  ;;  %3370 = vst.msk [vmem:[#allocation2 + $0x1a] sm:$0x1] %vm8303_vm3, %v3368_v58  ;;  %v3383_v1 = vcombine.high %v3368_v58, %v3368_v58  ;;  %v3305_v37 = vrot.slane %v3298_v38, %v8299_v33  ;;  %v3400_v31 = vcombine.high %v8580_v18, %v8580_v18  ;;  %v3553_v58 = vld [vmem:[%s10232_s5 + $0x2a8] sm:$0xff]  ;;  %v3584_v38 = vld [vmem:[%s10232_s5 + $0x3a0] sm:$0xff] }
 0x363   : > { %3443 = vst.msk [vmem:[#allocation2 + $0x1e] sm:$0x1] %vm8303_vm3, %v3441_v63  ;;  %v3456_v40 = vcombine.high %v3441_v63, %v3441_v63  ;;  %3348 = vst.msk [vmem:[#allocation2 + $0x19] sm:$0x1] %vm8303_vm3, %v3346_v25  ;;  %v3240_v59 = vcombine.high %v3232_v60, %v3232_v60  ;;  %v3327_v42 = vcombine.high %v3326_v20, %v3326_v20  ;;  %v8709_v18 = vsub.s32 1, %v8271_v53  ;;  %v3582_v20 = vld [vmem:[%s10232_s5 + $0x390] sm:$0xff] }
 0x364   : > { %3269 = vrot.lane.b32.xlu0 %v3268_v0, %s7484_s20  ;;  %3385 = vst.msk [vmem:[#allocation2 + $0x1b] sm:$0x1] %vm8303_vm3, %v3383_v1  ;;  %v3313_v62 = vcombine.high %v3305_v37, %v3305_v37  ;;  %v3414_v2 = vrot.slane %v3400_v31, %v8299_v33  ;;  %v3371_v4 = vcombine.high %v3361_v16, %v3361_v16  ;;  %v3565_v0 = vld [vmem:[%s10232_s5 + $0x308] sm:$0xff]  ;;  %v3583_v16 = vld [vmem:[%s10232_s5 + $0x398] sm:$0xff] }
 0x365   : > { %3458 = vst.msk [vmem:[#allocation2 + $0x1f] sm:$0x1] %vm8303_vm3, %v3456_v40  ;;  %v3341_v15 = vrot.slane %v3327_v42, %v8299_v33  ;;  %v3459_v11 = vcombine.high %v8452_v23, %v8452_v23  ;;  %v6861_v29 = vpack.c.bf16 %v3533_v43, %v3532_v46  ;;  %v6893_v17 = vpack.c.bf16 %v3565_v0, %v3564_v50  ;;  %v3585_v63 = vld [vmem:[%s10232_s5 + $0x3a8] sm:$0xff]  ;;  %v3568_v42 = vld [vmem:[%s10232_s5 + $0x320] sm:$0xff] }
 0x366   : > { %3277 = vrot.lane.b32.xlu1 %v3276_v52, %s7484_s20  ;;  %v3422_v61 = vcombine.high %v3414_v2, %v3414_v2  ;;  %v3378_v13 = vrot.slane %v3371_v4, %v8299_v33  ;;  %v6863_v56 = vpack.c.bf16 %v3551_v6, %v3550_v45  ;;  %v6895_v12 = vpack.c.bf16 %v3583_v16, %v3582_v20  ;;  %v3555_v4 = vld [vmem:[%s10232_s5 + $0x2b8] sm:$0xff]  ;;  %v3588_v46 = vld [vmem:[%s10232_s5 + $0x3c0] sm:$0xff]  ;;  %v3589_v43 = vld [vmem:[%s10232_s5 + $0x3c8] sm:$0xff] }
 0x367   : > { %v3349_v39 = vcombine.high %v3341_v15, %v3341_v15  ;;  %v6865_v1 = vpack.c.bf16 %v3535_v54, %v3534_v57  ;;  %v6897_v40 = vpack.c.bf16 %v3567_v22, %v3566_v7  ;;  %v3540_v45 = vld [vmem:[%s10232_s5 + $0x240] sm:$0xff]  ;;  %v3541_v6 = vld [vmem:[%s10232_s5 + $0x248] sm:$0xff]  ;;  %v3542_v22 = vld [vmem:[%s10232_s5 + $0x250] sm:$0xff] }
 0x368   : > { %3196 = vrot.lane.b32.xlu0 %v3195_v26, %s7484_s20  ;;  %v3386_v10 = vcombine.high %v3378_v13, %v3378_v13  ;;  %v3572_v20 = vld [vmem:[%s10232_s5 + $0x340] sm:$0xff]  ;;  %v3573_v16 = vld [vmem:[%s10232_s5 + $0x348] sm:$0xff] }
 0x369   : > { %v6909_v7 = vpack.c.bf16 %v3573_v16, %v3572_v20  ;;  %v8966_v20 = vsub.s32 4, %v8271_v53 }
 0x36a   : > { %3204 = vrot.lane.b32.xlu1 %v3203_v35, %s7484_s20 }
 0x36c   : > { %3233 = vrot.lane.b32.xlu0 %v3232_v60, %s7484_s20 }
 0x36e   : > { %3241 = vrot.lane.b32.xlu1 %v3240_v59, %s7484_s20  ;;  %v3536_v59 = vld [vmem:[%s10232_s5 + $0x220] sm:$0xff] }
 0x370   : > { %3306 = vrot.lane.b32.xlu0 %v3305_v37, %s7484_s20  ;;  %v3537_v37 = vld [vmem:[%s10232_s5 + $0x228] sm:$0xff] }
 0x372   : > { %3314 = vrot.lane.b32.xlu1 %v3313_v62, %s7484_s20  ;;  %v6867_v62 = vpack.c.bf16 %v3553_v58, %v3552_v36  ;;  %v3543_v36 = vld [vmem:[%s10232_s5 + $0x258] sm:$0xff] }
 0x374   : > { %3415 = vrot.lane.b32.xlu0 %v3414_v2, %s7484_s20  ;;  %v6899_v2 = vpack.c.bf16 %v3585_v63, %v3584_v38  ;;  %v3574_v63 = vld [vmem:[%s10232_s5 + $0x350] sm:$0xff] }
 0x376   : > { %3423 = vrot.lane.b32.xlu1 %v3422_v61, %s7484_s20  ;;  %v3569_v61 = vld [vmem:[%s10232_s5 + $0x328] sm:$0xff] }
 0x378   : > { %3342 = vrot.lane.b32.xlu0 %v3341_v15, %s7484_s20  ;;  %v3554_v15 = vld [vmem:[%s10232_s5 + $0x2b0] sm:$0xff] }
 0x37a   : > { %3350 = vrot.lane.b32.xlu1 %v3349_v39, %s7484_s20  ;;  %v3586_v39 = vld [vmem:[%s10232_s5 + $0x3b0] sm:$0xff] }
 0x37c   : > { %3379 = vrot.lane.b32.xlu0 %v3378_v13, %s7484_s20  ;;  %v3587_v13 = vld [vmem:[%s10232_s5 + $0x3b8] sm:$0xff] }
 0x37e   : > { %3387 = vrot.lane.b32.xlu1 %v3386_v10, %s7484_s20 }
 0x380   : > { %3452 = vrot.lane.b32.xlu0 %v8452_v23, %s7484_s20 }
 0x382   : > { %3460 = vrot.lane.b32.xlu1 %v3459_v11, %s7484_s20  ;;  %v6869_v11 = vpack.c.bf16 %v3537_v37, %v3536_v59  ;;  %s10185_s20 = scalar_lea.hbm %s10234_s7, %s5575_s23 }
 0x3b6   : > { %v2978_v55 = vpop.permute.xlu0 %2977 }
 0x3b7   : > { %2980 = vst.msk [vmem:[#allocation2 + $0x4] sm:$0x1] %vm8678_vm6, %v2978_v55  ;;  %v6901_v55 = vpack.c.bf16 %v3569_v61, %v3568_v42  ;;  %v3545_v42 = vld [vmem:[%s10232_s5 + $0x268] sm:$0xff] }
 0x3b8   : > { %v2986_v9 = vpop.permute.xlu1 %2985 }
 0x3b9   : > { %2988 = vst.msk [vmem:[#allocation2 + $0x5] sm:$0x1] %vm8678_vm6, %v2986_v9  ;;  %v3538_v9 = vld [vmem:[%s10232_s5 + $0x230] sm:$0xff] }
 0x3ba   : > { %v2902_v19 = vpop.permute.xlu0 %2901 }
 0x3bb   : > { %2907 = vst.msk [vmem:[#allocation2] sm:$0x1] %vm8678_vm6, %v2902_v19  ;;  %v3539_v19 = vld [vmem:[%s10232_s5 + $0x238] sm:$0xff] }
 0x3bc   : > { %v2942_v23 = vpop.permute.xlu1 %2941  ;;  %v6873_v0 = vpack.c.bf16 %v3539_v19, %v3538_v9  ;;  %v3595_v9 = vld [vmem:[%s10232_s5 + $0x3f8] sm:$0xff] }
 0x3bd   : > { %2944 = vst.msk [vmem:[#allocation2 + $0x2] sm:$0x1] %vm8678_vm6, %v2942_v23 }
 0x3be   : > { %v2913_v34 = vpop.permute.xlu0 %2912 }
 0x3bf   : > { %2915 = vst.msk [vmem:[#allocation2 + $0x1] sm:$0x1] %vm8678_vm6, %v2913_v34  ;;  %v6871_v34 = vpack.c.bf16 %v3555_v4, %v3554_v15 }
 0x3c0   : > { %v2950_v27 = vpop.permute.xlu1 %2949 }
 0x3c1   : > { %2952 = vst.msk [vmem:[#allocation2 + $0x3] sm:$0x1] %vm8678_vm6, %v2950_v27  ;;  %v6903_v27 = vpack.c.bf16 %v3587_v13, %v3586_v39  ;;  %v3576_v39 = vld [vmem:[%s10232_s5 + $0x360] sm:$0xff]  ;;  %v3577_v13 = vld [vmem:[%s10232_s5 + $0x368] sm:$0xff] }
 0x3c2   : > { %v3015_v44 = vpop.permute.xlu0 %3014 }
 0x3c3   : > { %3017 = vst.msk [vmem:[#allocation2 + $0x6] sm:$0x1] %vm8678_vm6, %v3015_v44  ;;  %v3570_v44 = vld [vmem:[%s10232_s5 + $0x330] sm:$0xff] }
 0x3c4   : > { %v3023_v41 = vpop.permute.xlu1 %3022 }
 0x3c5   : > { %3025 = vst.msk [vmem:[#allocation2 + $0x7] sm:$0x1] %vm8678_vm6, %v3023_v41  ;;  %v3571_v41 = vld [vmem:[%s10232_s5 + $0x338] sm:$0xff] }
 0x3c6   : > { %v3124_v8 = vpop.permute.xlu0 %3123 }
 0x3c7   : > { %3126 = vst.msk [vmem:[#allocation2 + $0xc] sm:$0x1] %vm8678_vm6, %v3124_v8  ;;  %v3556_v8 = vld [vmem:[%s10232_s5 + $0x2c0] sm:$0xff] }
 0x3c8   : > { %v3132_v24 = vpop.permute.xlu1 %3131 }
 0x3c9   : > { %3134 = vst.msk [vmem:[#allocation2 + $0xd] sm:$0x1] %vm8678_vm6, %v3132_v24  ;;  %v3557_v24 = vld [vmem:[%s10232_s5 + $0x2c8] sm:$0xff] }
 0x3ca   : > { %v3051_v47 = vpop.permute.xlu0 %3050 }
 0x3cb   : > { %3053 = vst.msk [vmem:[#allocation2 + $0x8] sm:$0x1] %vm8678_vm6, %v3051_v47  ;;  %v6905_v47 = vpack.c.bf16 %v3571_v41, %v3570_v44  ;;  %v3547_v44 = vld [vmem:[%s10232_s5 + $0x278] sm:$0xff] }
 0x3cc   : > { %v3059_v28 = vpop.permute.xlu1 %3058  ;;  %v8734_v32 = vld [vmem:[#allocation2] sm:$0xff] }
 0x3cd   : > { %3061 = vst.msk [vmem:[#allocation2 + $0x9] sm:$0x1] %vm8678_vm6, %v3059_v28  ;;  %v3992_v3 = vrot.slane %v8734_v32, %v8709_v18  ;;  %v4000_v21 = vrot.slane %v8734_v32, %v8712_v30  ;;  %v3988_v26 = vrot.slane %v8734_v32, %v8715_v49  ;;  %v3996_v5 = vrot.slane %v8734_v32, %v8718_v14 }
 0x3ce   : > { %v3088_v52 = vpop.permute.xlu0 %3087  ;;  %v4008_v60 = vrot.slane %v8734_v32, %v8737_v51  ;;  %v4016_v25 = vrot.slane %v8734_v32, %v8740_v48 }
 0x3cf   : > { %3090 = vst.msk [vmem:[#allocation2 + $0xa] sm:$0x1] %vm8678_vm6, %v3088_v52  ;;  %4209 = vmatprep.mubr.f32.mxu1 %v3992_v3  ;;  %4279 = vmatprep.mubr.f32.mxu0 %v4000_v21  ;;  %v3558_v3 = vld [vmem:[%s10232_s5 + $0x2d0] sm:$0xff]  ;;  %v3559_v21 = vld [vmem:[%s10232_s5 + $0x2d8] sm:$0xff]  ;;  %v6877_v52 = vpack.c.bf16 %v3541_v6, %v3540_v45  ;;  %v3645_v45 = vld [vmem:[%s10232_s5 + $0x588] sm:$0xff] }
 0x3d0   : > { %4210 = vmatmul.mubr.f32.vlgmr.msra.gmra.mrb[70].mxu1 %v3988_v26  ;;  %4280 = vmatmul.mubr.f32.vlgmr.msra.gmra.mrb[10].mxu0 %v3996_v5  ;;  %v3096_v35 = vpop.permute.xlu1 %3095  ;;  %v3590_v26 = vld [vmem:[%s10232_s5 + $0x3d0] sm:$0xff]  ;;  %v3591_v5 = vld [vmem:[%s10232_s5 + $0x3d8] sm:$0xff]  ;;  %v6879_v58 = vpack.c.bf16 %v3559_v21, %v3558_v3  ;;  %v3596_v21 = vld [vmem:[%s10232_s5 + $0x400] sm:$0xff] }
 0x3d1   : > { %6862 = vmatpush3.bf16.msra.mxu1 %v6861_v29  ;;  %6894 = vmatpush3.bf16.msra.mxu0 %v6893_v17  ;;  %3098 = vst.msk [vmem:[#allocation2 + $0xb] sm:$0x1] %vm8678_vm6, %v3096_v35  ;;  %v6875_v29 = vpack.c.bf16 %v3557_v24, %v3556_v8  ;;  %v6907_v17 = vpack.c.bf16 %v3589_v43, %v3588_v46  ;;  %v3575_v35 = vld [vmem:[%s10232_s5 + $0x358] sm:$0xff]  ;;  %v3578_v46 = vld [vmem:[%s10232_s5 + $0x370] sm:$0xff] }
 0x3d2   : > { %4349 = vmatprep.mubr.f32.mxu1 %v4008_v60  ;;  %4419 = vmatprep.mubr.f32.mxu0 %v4016_v25  ;;  %v3161_v31 = vpop.permute.xlu0 %3160  ;;  %v6911_v38 = vpack.c.bf16 %v3591_v5, %v3590_v26  ;;  %v3560_v60 = vld [vmem:[%s10232_s5 + $0x2e0] sm:$0xff]  ;;  %v3561_v25 = vld [vmem:[%s10232_s5 + $0x2e8] sm:$0xff]  ;;  %v3579_v43 = vld [vmem:[%s10232_s5 + $0x378] sm:$0xff] }
 0x3d3   : > { %3163 = vst.msk [vmem:[#allocation2 + $0xe] sm:$0x1] %vm8678_vm6, %v3161_v31  ;;  %6864 = vmatprep.subr.bf16.mxu1 %v6863_v56  ;;  %6896 = vmatprep.subr.bf16.mxu0 %v6895_v12  ;;  %v8883_v56 = vsub.s32 6, %v8271_v53  ;;  %v6881_v31 = vpack.c.bf16 %v3543_v36, %v3542_v22  ;;  %v6883_v15 = vpack.c.bf16 %v3561_v25, %v3560_v60  ;;  %v3597_v26 = vld [vmem:[%s10232_s5 + $0x408] sm:$0xff]  ;;  %v3628_v5 = vld [vmem:[%s10232_s5 + $0x500] sm:$0xff]  ;;  %v3646_v22 = vld [vmem:[%s10232_s5 + $0x590] sm:$0xff] }
 0x3d4   : > { %v3169_v10 = vpop.permute.xlu1 %3168  ;;  %v3629_v53 = vld [vmem:[%s10232_s5 + $0x508] sm:$0xff]  ;;  %v3647_v36 = vld [vmem:[%s10232_s5 + $0x598] sm:$0xff]  ;;  %v3598_v60 = vld [vmem:[%s10232_s5 + $0x410] sm:$0xff] }
 0x3d5   : > { %6866 = vmatpush3.bf16.msra.mxu1 %v6865_v1  ;;  %6898 = vmatpush3.bf16.msra.mxu0 %v6897_v40  ;;  %3171 = vst.msk [vmem:[#allocation2 + $0xf] sm:$0x1] %vm8678_vm6, %v3169_v10  ;;  %v3592_v1 = vld [vmem:[%s10232_s5 + $0x3e0] sm:$0xff]  ;;  %v3593_v40 = vld [vmem:[%s10232_s5 + $0x3e8] sm:$0xff]  ;;  %v3562_v10 = vld [vmem:[%s10232_s5 + $0x2f0] sm:$0xff] }
 0x3d6   : > { %v3270_v23 = vpop.permute.xlu0 %3269  ;;  %6868 = vmatprep.subr.bf16.mxu1 %v6867_v62  ;;  %6900 = vmatprep.subr.bf16.mxu0 %v6899_v2  ;;  %v6913_v62 = vpack.c.bf16 %v3575_v35, %v3574_v63  ;;  %v3544_v2 = vld [vmem:[%s10232_s5 + $0x260] sm:$0xff]  ;;  %v6915_v4 = vpack.c.bf16 %v3593_v40, %v3592_v1  ;;  %v4012_v63 = vrot.slane %v8734_v32, %v8883_v56  ;;  %v3599_v25 = vld [vmem:[%s10232_s5 + $0x418] sm:$0xff]  ;;  %v3630_v1 = vld [vmem:[%s10232_s5 + $0x510] sm:$0xff] }
 0x3d7   : > { %3272 = vst.msk [vmem:[#allocation2 + $0x14] sm:$0x1] %vm8678_vm6, %v3270_v23  ;;  %v6885_v23 = vpack.c.bf16 %v3545_v42, %v3544_v2  ;;  %v6957_v35 = vpack.c.bf16 %v3629_v53, %v3628_v5  ;;  %v3617_v2 = vld [vmem:[%s10232_s5 + $0x4a8] sm:$0xff]  ;;  %v3604_v5 = vld [vmem:[%s10232_s5 + $0x440] sm:$0xff] }
 0x3d8   : > { %v3278_v50 = vpop.permute.xlu1 %3277  ;;  %v3605_v53 = vld [vmem:[%s10232_s5 + $0x448] sm:$0xff] }
 0x3d9   : > { %6870 = vmatpush3.bf16.msra.mxu1 %v6869_v11  ;;  %6902 = vmatpush3.bf16.msra.mxu0 %v6901_v55  ;;  %3280 = vst.msk [vmem:[#allocation2 + $0x15] sm:$0x1] %vm8678_vm6, %v3278_v50  ;;  %v3563_v11 = vld [vmem:[%s10232_s5 + $0x2f8] sm:$0xff]  ;;  %v3594_v55 = vld [vmem:[%s10232_s5 + $0x3f0] sm:$0xff]  ;;  %v3612_v50 = vld [vmem:[%s10232_s5 + $0x480] sm:$0xff] }
 0x3da   : > { %v3197_v28 = vpop.permute.xlu0 %3196  ;;  %6872 = vmatprep.subr.bf16.mxu1 %v6871_v34  ;;  %6904 = vmatprep.subr.bf16.mxu0 %v6903_v27  ;;  %v6917_v34 = vpack.c.bf16 %v3577_v13, %v3576_v39  ;;  %v3546_v27 = vld [vmem:[%s10232_s5 + $0x270] sm:$0xff]  ;;  %v6887_v8 = vpack.c.bf16 %v3563_v11, %v3562_v10  ;;  %v6919_v24 = vpack.c.bf16 %v3595_v9, %v3594_v55  ;;  %v3600_v55 = vld [vmem:[%s10232_s5 + $0x420] sm:$0xff]  ;;  %v3601_v9 = vld [vmem:[%s10232_s5 + $0x428] sm:$0xff] }
 0x3db   : > { %3199 = vst.msk [vmem:[#allocation2 + $0x10] sm:$0x1] %vm8678_vm6, %v3197_v28  ;;  %v6889_v28 = vpack.c.bf16 %v3547_v44, %v3546_v27  ;;  %v6929_v39 = vpack.c.bf16 %v3599_v25, %v3598_v60  ;;  %v3618_v27 = vld [vmem:[%s10232_s5 + $0x4b0] sm:$0xff]  ;;  %v3619_v44 = vld [vmem:[%s10232_s5 + $0x4b8] sm:$0xff] }
 0x3dc   : > { %v3205_v57 = vpop.permute.xlu1 %3204  ;;  %v8872_v54 = vld [vmem:[#allocation2 + $0x8] sm:$0xff]  ;;  %v3606_v60 = vld [vmem:[%s10232_s5 + $0x450] sm:$0xff]  ;;  %v3607_v25 = vld [vmem:[%s10232_s5 + $0x458] sm:$0xff] }
 0x3dd   : > { %6874 = vmatpush3.bf16.msra.mxu1 %v6873_v0  ;;  %6906 = vmatpush3.bf16.msra.mxu0 %v6905_v47  ;;  %3207 = vst.msk [vmem:[#allocation2 + $0x11] sm:$0x1] %vm8678_vm6, %v3205_v57  ;;  %v4044_v59 = vrot.slane %v8872_v54, %v8883_v56  ;;  %v3613_v0 = vld [vmem:[%s10232_s5 + $0x488] sm:$0xff]  ;;  %v3644_v47 = vld [vmem:[%s10232_s5 + $0x580] sm:$0xff]  ;;  %v3614_v57 = vld [vmem:[%s10232_s5 + $0x490] sm:$0xff]  ;;  %v4032_v42 = vrot.slane %v8872_v54, %v8712_v30 }
 0x3de   : > { %v3234_v12 = vpop.permute.xlu0 %3233  ;;  %6876 = vmatprep.subr.bf16.mxu1 %v6875_v29  ;;  %6908 = vmatprep.subr.bf16.mxu0 %v6907_v17  ;;  %v6921_v29 = vpack.c.bf16 %v3579_v43, %v3578_v46  ;;  %v6923_v16 = vpack.c.bf16 %v3613_v0, %v3612_v50  ;;  %v6955_v3 = vpack.c.bf16 %v3645_v45, %v3644_v47  ;;  %v3602_v0 = vld [vmem:[%s10232_s5 + $0x430] sm:$0xff]  ;;  %v3603_v47 = vld [vmem:[%s10232_s5 + $0x438] sm:$0xff] }
 0x3df   : > { %3236 = vst.msk [vmem:[#allocation2 + $0x12] sm:$0x1] %vm8678_vm6, %v3234_v12  ;;  %v6925_v12 = vpack.c.bf16 %v3597_v26, %v3596_v21  ;;  %v6933_v46 = vpack.c.bf16 %v3601_v9, %v3600_v55  ;;  %v6935_v50 = vpack.c.bf16 %v3619_v44, %v3618_v27  ;;  %v3634_v45 = vld [vmem:[%s10232_s5 + $0x530] sm:$0xff]  ;;  %v3627_v9 = vld [vmem:[%s10232_s5 + $0x4f8] sm:$0xff] }
 0x3e0   : > { %v3242_v37 = vpop.permute.xlu1 %3241  ;;  %v3626_v55 = vld [vmem:[%s10232_s5 + $0x4f0] sm:$0xff] }
 0x3e1   : > { %6878 = vmatpush3.bf16.msra.mxu1 %v6877_v52  ;;  %6910 = vmatpush3.bf16.msra.mxu0 %v6909_v7  ;;  %3244 = vst.msk [vmem:[#allocation2 + $0x13] sm:$0x1] %vm8678_vm6, %v3242_v37  ;;  %v3615_v7 = vld [vmem:[%s10232_s5 + $0x498] sm:$0xff]  ;;  %v6959_v37 = vpack.c.bf16 %v3647_v36, %v3646_v22  ;;  %v3622_v22 = vld [vmem:[%s10232_s5 + $0x4d0] sm:$0xff]  ;;  %v6951_v44 = vpack.c.bf16 %v3627_v9, %v3626_v55 }
 0x3e2   : > { %v3307_v61 = vpop.permute.xlu0 %3306  ;;  %6880 = vmatprep.subr.bf16.mxu1 %v6879_v58  ;;  %6912 = vmatprep.subr.bf16.mxu0 %v6911_v38  ;;  %v4004_v38 = vrot.slane %v8734_v32, %v8966_v20  ;;  %v4024_v32 = vrot.slane %v8872_v54, %v8709_v18  ;;  %v6927_v40 = vpack.c.bf16 %v3615_v7, %v3614_v57  ;;  %v3636_v57 = vld [vmem:[%s10232_s5 + $0x540] sm:$0xff]  ;;  %v3637_v7 = vld [vmem:[%s10232_s5 + $0x548] sm:$0xff]  ;;  %v3623_v36 = vld [vmem:[%s10232_s5 + $0x4d8] sm:$0xff] }
 0x3e3   : > { %3309 = vst.msk [vmem:[#allocation2 + $0x16] sm:$0x1] %vm8678_vm6, %v3307_v61  ;;  %v3714_v55 = vld [vmem:[%s10232_s5 + $0x7b0] sm:$0xff]  ;;  %v3715_v9 = vld [vmem:[%s10232_s5 + $0x7b8] sm:$0xff] }
 0x3e4   : > { %v3315_v19 = vpop.permute.xlu1 %3314 }
 0x3e5   : > { %6882 = vmatpush3.bf16.msra.mxu1 %v6881_v31  ;;  %6914 = vmatpush3.bf16.msra.mxu0 %v6913_v62  ;;  %3317 = vst.msk [vmem:[#allocation2 + $0x17] sm:$0x1] %vm8678_vm6, %v3315_v19  ;;  %v3631_v31 = vld [vmem:[%s10232_s5 + $0x518] sm:$0xff]  ;;  %v3616_v62 = vld [vmem:[%s10232_s5 + $0x4a0] sm:$0xff] }
 0x3e6   : > { %v3416_v41 = vpop.permute.xlu0 %3415  ;;  %6884 = vmatprep.subr.bf16.mxu1 %v6883_v15  ;;  %6916 = vmatprep.subr.bf16.mxu0 %v6915_v4  ;;  %v3648_v15 = vld [vmem:[%s10232_s5 + $0x5a0] sm:$0xff]  ;;  %v3649_v4 = vld [vmem:[%s10232_s5 + $0x5a8] sm:$0xff]  ;;  %v6961_v10 = vpack.c.bf16 %v3631_v31, %v3630_v1  ;;  %v6931_v11 = vpack.c.bf16 %v3617_v2, %v3616_v62  ;;  %v3638_v1 = vld [vmem:[%s10232_s5 + $0x550] sm:$0xff] }
 0x3e7   : > { %3418 = vst.msk [vmem:[#allocation2 + $0x1c] sm:$0x1] %vm8678_vm6, %v3416_v41  ;;  %v3632_v19 = vld [vmem:[%s10232_s5 + $0x520] sm:$0xff]  ;;  %v3625_v31 = vld [vmem:[%s10232_s5 + $0x4e8] sm:$0xff] }
 0x3e8   : > { %v3424_v6 = vpop.permute.xlu1 %3423  ;;  %v3656_v62 = vld [vmem:[%s10232_s5 + $0x5e0] sm:$0xff]  ;;  %v3657_v2 = vld [vmem:[%s10232_s5 + $0x5e8] sm:$0xff] }
 0x3e9   : > { %6886 = vmatpush3.bf16.msra.mxu1 %v6885_v23  ;;  %6918 = vmatpush3.bf16.msra.mxu0 %v6917_v34  ;;  %3426 = vst.msk [vmem:[#allocation2 + $0x1d] sm:$0x1] %vm8678_vm6, %v3424_v6  ;;  %v6963_v23 = vpack.c.bf16 %v3649_v4, %v3648_v15  ;;  %v3633_v34 = vld [vmem:[%s10232_s5 + $0x528] sm:$0xff]  ;;  %v3635_v6 = vld [vmem:[%s10232_s5 + $0x538] sm:$0xff]  ;;  %v3608_v4 = vld [vmem:[%s10232_s5 + $0x460] sm:$0xff] }
 0x3ea   : > { %v3343_v17 = vpop.permute.xlu0 %3342  ;;  %6888 = vmatprep.subr.bf16.mxu1 %v6887_v8  ;;  %6920 = vmatprep.subr.bf16.mxu0 %v6919_v24  ;;  %v3650_v8 = vld [vmem:[%s10232_s5 + $0x5b0] sm:$0xff]  ;;  %v3651_v24 = vld [vmem:[%s10232_s5 + $0x5b8] sm:$0xff]  ;;  %v6965_v43 = vpack.c.bf16 %v3633_v34, %v3632_v19  ;;  %v6969_v21 = vpack.c.bf16 %v3635_v6, %v3634_v45  ;;  %v3709_v45 = vld [vmem:[%s10232_s5 + $0x788] sm:$0xff] }
 0x3eb   : > { %3345 = vst.msk [vmem:[#allocation2 + $0x18] sm:$0x1] %vm8678_vm6, %v3343_v17  ;;  %v6967_v33 = vpack.c.bf16 %v3651_v24, %v3650_v8  ;;  %v3652_v17 = vld [vmem:[%s10232_s5 + $0x5c0] sm:$0xff]  ;;  %v3658_v19 = vld [vmem:[%s10232_s5 + $0x5f0] sm:$0xff]  ;;  %v3611_v8 = vld [vmem:[%s10232_s5 + $0x478] sm:$0xff] }
 0x3ec   : > { %v3351_v52 = vpop.permute.xlu1 %3350  ;;  %v3642_v24 = vld [vmem:[%s10232_s5 + $0x570] sm:$0xff] }
 0x3ed   : > { %6890 = vmatpush3.bf16.msra.mxu1 %v6889_v28  ;;  %6922 = vmatpush3.bf16.msra.mxu0 %v6921_v29  ;;  %3353 = vst.msk [vmem:[#allocation2 + $0x19] sm:$0x1] %vm8678_vm6, %v3351_v52  ;;  %v3620_v28 = vld [vmem:[%s10232_s5 + $0x4c0] sm:$0xff]  ;;  %v3621_v29 = vld [vmem:[%s10232_s5 + $0x4c8] sm:$0xff] }
 0x3ee   : > { %v3380_v58 = vpop.permute.xlu0 %3379  ;;  %6924 = vmatprep.subr.bf16.mxu1 %v6923_v16  ;;  %6956 = vmatprep.subr.bf16.mxu0 %v6955_v3  ;;  %v3653_v16 = vld [vmem:[%s10232_s5 + $0x5c8] sm:$0xff]  ;;  %v6937_v3 = vpack.c.bf16 %v3603_v47, %v3602_v0  ;;  %v6939_v26 = vpack.c.bf16 %v3621_v29, %v3620_v28  ;;  %v3708_v47 = vld [vmem:[%s10232_s5 + $0x780] sm:$0xff] }
 0x3ef   : > { %3382 = vst.msk [vmem:[#allocation2 + $0x1a] sm:$0x1] %vm8678_vm6, %v3380_v58  ;;  %v6971_v52 = vpack.c.bf16 %v3653_v16, %v3652_v17  ;;  %v3655_v58 = vld [vmem:[%s10232_s5 + $0x5d8] sm:$0xff]  ;;  %v3677_v0 = vld [vmem:[%s10232_s5 + $0x688] sm:$0xff]  ;;  %v3660_v29 = vld [vmem:[%s10232_s5 + $0x600] sm:$0xff]  ;;  %v7019_v16 = vpack.c.bf16 %v3709_v45, %v3708_v47 }
 0x3f0   : > { %4350 = vmatmul.mubr.f32.vlgmr.msra.gmra.mrb[72].mxu1 %v4004_v38  ;;  %4420 = vmatmul.mubr.f32.vlgmr.msra.gmra.mrb[12].mxu0 %v4012_v63  ;;  %v3388_v61 = vpop.permute.xlu1 %3387  ;;  %v6941_v38 = vpack.c.bf16 %v3605_v53, %v3604_v5  ;;  %v6973_v63 = vpack.c.bf16 %v3637_v7, %v3636_v57  ;;  %v3661_v17 = vld [vmem:[%s10232_s5 + $0x608] sm:$0xff]  ;;  %v3679_v5 = vld [vmem:[%s10232_s5 + $0x698] sm:$0xff]  ;;  %v3710_v57 = vld [vmem:[%s10232_s5 + $0x790] sm:$0xff]  ;;  %v4020_v7 = vrot.slane %v8872_v54, %v8715_v49 }
 0x3f1   : > { %6926 = vmatpush3.bf16.msra.mxu1 %v6925_v12  ;;  %4489 = vmatprep.mubr.f32.mxu1 %v4024_v32  ;;  %3390 = vst.msk [vmem:[#allocation2 + $0x1b] sm:$0x1] %vm8678_vm6, %v3388_v61  ;;  %v3654_v12 = vld [vmem:[%s10232_s5 + $0x5d0] sm:$0xff]  ;;  %v6989_v53 = vpack.c.bf16 %v3661_v17, %v3660_v29  ;;  %v3700_v29 = vld [vmem:[%s10232_s5 + $0x740] sm:$0xff] }
 0x3f2   : > { %6958 = vmatpush3.bf16.msra.mxu0 %v6957_v35  ;;  %4559 = vmatprep.mubr.f32.mxu0 %v4032_v42  ;;  %v3453_v13 = vpop.permute.xlu0 %3452  ;;  %v6943_v35 = vpack.c.bf16 %v3623_v36, %v3622_v22  ;;  %v6975_v32 = vpack.c.bf16 %v3655_v58, %v3654_v12  ;;  %v6945_v42 = vpack.c.bf16 %v3607_v25, %v3606_v60  ;;  %v3662_v36 = vld [vmem:[%s10232_s5 + $0x610] sm:$0xff]  ;;  %v3663_v12 = vld [vmem:[%s10232_s5 + $0x618] sm:$0xff]  ;;  %v3680_v60 = vld [vmem:[%s10232_s5 + $0x6a0] sm:$0xff] }
 0x3f3   : > { %3455 = vst.msk [vmem:[#allocation2 + $0x1e] sm:$0x1] %vm8678_vm6, %v3453_v13  ;;  %6928 = vmatprep.subr.bf16.mxu1 %v6927_v40  ;;  %6960 = vmatprep.subr.bf16.mxu0 %v6959_v37  ;;  %v3639_v40 = vld [vmem:[%s10232_s5 + $0x558] sm:$0xff]  ;;  %v3624_v37 = vld [vmem:[%s10232_s5 + $0x4e0] sm:$0xff]  ;;  %v3694_v58 = vld [vmem:[%s10232_s5 + $0x710] sm:$0xff] }
 0x3f4   : > { %v3461_v41 = vpop.permute.xlu1 %3460  ;;  %v6977_v61 = vpack.c.bf16 %v3639_v40, %v3638_v1  ;;  %v6947_v15 = vpack.c.bf16 %v3625_v31, %v3624_v37  ;;  %v3640_v13 = vld [vmem:[%s10232_s5 + $0x560] sm:$0xff]  ;;  %v3681_v25 = vld [vmem:[%s10232_s5 + $0x6a8] sm:$0xff]  ;;  %v4040_v1 = vrot.slane %v8872_v54, %v8737_v51  ;;  %v4048_v31 = vrot.slane %v8872_v54, %v8740_v48 }
 0x3f5   : > { %6930 = vmatpush3.bf16.msra.mxu1 %v6929_v39  ;;  %3463 = vst.msk [vmem:[#allocation2 + $0x1f] sm:$0x1] %vm8678_vm6, %v3461_v41  ;;  %v3609_v39 = vld [vmem:[%s10232_s5 + $0x468] sm:$0xff]  ;;  %v3610_v41 = vld [vmem:[%s10232_s5 + $0x470] sm:$0xff]  ;;  %v3712_v40 = vld [vmem:[%s10232_s5 + $0x7a0] sm:$0xff] }
 0x3f6   : > { %6962 = vmatpush3.bf16.msra.mxu0 %v6961_v10  ;;  %6932 = vmatprep.subr.bf16.mxu1 %v6931_v11  ;;  %v6979_v10 = vpack.c.bf16 %v3657_v2, %v3656_v62  ;;  %v3641_v11 = vld [vmem:[%s10232_s5 + $0x568] sm:$0xff]  ;;  %v6949_v34 = vpack.c.bf16 %v3609_v39, %v3608_v4  ;;  %v6993_v62 = vpack.c.bf16 %v3663_v12, %v3662_v36  ;;  %v3696_v4 = vld [vmem:[%s10232_s5 + $0x720] sm:$0xff]  ;;  %v3702_v36 = vld [vmem:[%s10232_s5 + $0x750] sm:$0xff] }
 0x3f7   : > { %6964 = vmatprep.subr.bf16.mxu0 %v6963_v23  ;;  %v3659_v23 = vld [vmem:[%s10232_s5 + $0x5f8] sm:$0xff]  ;;  %v6981_v27 = vpack.c.bf16 %v3641_v11, %v3640_v13  ;;  %v3713_v37 = vld [vmem:[%s10232_s5 + $0x7a8] sm:$0xff] }
 0x3f8   : > { %v7027_v39 = vpack.c.bf16 %v3713_v37, %v3712_v40  ;;  %v3697_v13 = vld [vmem:[%s10232_s5 + $0x728] sm:$0xff]  ;;  %v3683_v11 = vld [vmem:[%s10232_s5 + $0x6b8] sm:$0xff]  ;;  %v3672_v40 = vld [vmem:[%s10232_s5 + $0x660] sm:$0xff] }
 0x3f9   : > { %6934 = vmatpush3.bf16.msra.mxu1 %v6933_v46  ;;  %v6983_v46 = vpack.c.bf16 %v3659_v23, %v3658_v19  ;;  %v7029_v23 = vpack.c.bf16 %v3697_v13, %v3696_v4  ;;  %v3673_v37 = vld [vmem:[%s10232_s5 + $0x668] sm:$0xff]  ;;  %v3723_v4 = vld [vmem:[%s10232_s5 + $0x7f8] sm:$0xff] }
 0x3fa   : > { %6966 = vmatpush3.bf16.msra.mxu0 %v6965_v43  ;;  %6936 = vmatprep.subr.bf16.mxu1 %v6935_v50  ;;  %v3643_v43 = vld [vmem:[%s10232_s5 + $0x578] sm:$0xff]  ;;  %v3676_v50 = vld [vmem:[%s10232_s5 + $0x680] sm:$0xff] }
 0x3fb   : > { %6968 = vmatprep.subr.bf16.mxu0 %v6967_v33  ;;  %v6953_v33 = vpack.c.bf16 %v3611_v8, %v3610_v41  ;;  %v6985_v6 = vpack.c.bf16 %v3643_v43, %v3642_v24  ;;  %v6987_v28 = vpack.c.bf16 %v3677_v0, %v3676_v50  ;;  %v3698_v41 = vld [vmem:[%s10232_s5 + $0x730] sm:$0xff]  ;;  %v7031_v8 = vpack.c.bf16 %v3715_v9, %v3714_v55  ;;  %v3699_v24 = vld [vmem:[%s10232_s5 + $0x738] sm:$0xff]  ;;  %v3685_v43 = vld [vmem:[%s10232_s5 + $0x6c8] sm:$0xff] }
 0x3fc   : > { %v3716_v50 = vld [vmem:[%s10232_s5 + $0x7c0] sm:$0xff]  ;;  %v3717_v0 = vld [vmem:[%s10232_s5 + $0x7c8] sm:$0xff]  ;;  %v7033_v45 = vpack.c.bf16 %v3699_v24, %v3698_v41  ;;  %v3675_v55 = vld [vmem:[%s10232_s5 + $0x678] sm:$0xff] }
 0x3fd   : > { %6938 = vmatpush3.bf16.msra.mxu1 %v6937_v3  ;;  %v3692_v3 = vld [vmem:[%s10232_s5 + $0x700] sm:$0xff]  ;;  %v7035_v17 = vpack.c.bf16 %v3717_v0, %v3716_v50  ;;  %v3706_v9 = vld [vmem:[%s10232_s5 + $0x770] sm:$0xff]  ;;  %v3773_v41 = vld [vmem:[%s10232_s5 + $0x988] sm:$0xff] }
 0x3fe   : > { %6970 = vmatpush3.bf16.msra.mxu0 %v6969_v21  ;;  %6940 = vmatprep.subr.bf16.mxu1 %v6939_v26  ;;  %v3693_v21 = vld [vmem:[%s10232_s5 + $0x708] sm:$0xff]  ;;  %v3678_v26 = vld [vmem:[%s10232_s5 + $0x690] sm:$0xff] }
 0x3ff   : > { %6972 = vmatprep.subr.bf16.mxu0 %v6971_v52  ;;  %v3711_v52 = vld [vmem:[%s10232_s5 + $0x798] sm:$0xff]  ;;  %v7021_v22 = vpack.c.bf16 %v3693_v21, %v3692_v3  ;;  %v3686_v3 = vld [vmem:[%s10232_s5 + $0x6d0] sm:$0xff]  ;;  %v3725_v50 = vld [vmem:[%s10232_s5 + $0x808] sm:$0xff] }
 0x400   : > { %v3687_v21 = vld [vmem:[%s10232_s5 + $0x6d8] sm:$0xff] }
 0x401   : > { %6942 = vmatpush3.bf16.msra.mxu1 %v6941_v38  ;;  %v4028_v38 = vrot.slane %v8872_v54, %v8718_v14 }
 0x402   : > { %6974 = vmatpush3.bf16.msra.mxu0 %v6973_v63  ;;  %6944 = vmatprep.subr.bf16.mxu1 %v6943_v35  ;;  %v6991_v63 = vpack.c.bf16 %v3679_v5, %v3678_v26  ;;  %v3695_v35 = vld [vmem:[%s10232_s5 + $0x718] sm:$0xff]  ;;  %v3718_v26 = vld [vmem:[%s10232_s5 + $0x7d0] sm:$0xff] }
 0x403   : > { %6976 = vmatprep.subr.bf16.mxu0 %v6975_v32  ;;  %v7023_v32 = vpack.c.bf16 %v3711_v52, %v3710_v57  ;;  %v7025_v2 = vpack.c.bf16 %v3695_v35, %v3694_v58  ;;  %v3719_v5 = vld [vmem:[%s10232_s5 + $0x7d8] sm:$0xff]  ;;  %v7007_v52 = vpack.c.bf16 %v3687_v21, %v3686_v3  ;;  %v3720_v35 = vld [vmem:[%s10232_s5 + $0x7e0] sm:$0xff]  ;;  %v4036_v3 = vrot.slane %v8872_v54, %v8966_v20 }
 0x404   : > { %v7039_v12 = vpack.c.bf16 %v3719_v5, %v3718_v26  ;;  %v3703_v58 = vld [vmem:[%s10232_s5 + $0x758] sm:$0xff]  ;;  %v3726_v26 = vld [vmem:[%s10232_s5 + $0x810] sm:$0xff]  ;;  %v3760_v54 = vld [vmem:[%s10232_s5 + $0x920] sm:$0xff] }
 0x405   : > { %6946 = vmatpush3.bf16.msra.mxu1 %v6945_v42  ;;  %v6995_v42 = vpack.c.bf16 %v3681_v25, %v3680_v60  ;;  %v3721_v60 = vld [vmem:[%s10232_s5 + $0x7e8] sm:$0xff]  ;;  %v3727_v5 = vld [vmem:[%s10232_s5 + $0x818] sm:$0xff] }
 0x406   : > { %6978 = vmatpush3.bf16.msra.mxu0 %v6977_v61  ;;  %6948 = vmatprep.subr.bf16.mxu1 %v6947_v15  ;;  %v3664_v61 = vld [vmem:[%s10232_s5 + $0x620] sm:$0xff]  ;;  %v3665_v15 = vld [vmem:[%s10232_s5 + $0x628] sm:$0xff] }
 0x407   : > { %6980 = vmatprep.subr.bf16.mxu0 %v6979_v10  ;;  %v3682_v10 = vld [vmem:[%s10232_s5 + $0x6b0] sm:$0xff]  ;;  %v6997_v19 = vpack.c.bf16 %v3665_v15, %v3664_v61  ;;  %v3691_v61 = vld [vmem:[%s10232_s5 + $0x6f8] sm:$0xff] }
 0x408   : > { %v3722_v15 = vld [vmem:[%s10232_s5 + $0x7f0] sm:$0xff] }
 0x409   : > { %6950 = vmatpush3.bf16.msra.mxu1 %v6949_v34  ;;  %v6999_v34 = vpack.c.bf16 %v3683_v11, %v3682_v10  ;;  %v3674_v11 = vld [vmem:[%s10232_s5 + $0x670] sm:$0xff] }
 0x40a   : > { %6982 = vmatpush3.bf16.msra.mxu0 %v6981_v27  ;;  %6952 = vmatprep.subr.bf16.mxu1 %v6951_v44  ;;  %v3666_v27 = vld [vmem:[%s10232_s5 + $0x630] sm:$0xff]  ;;  %v3667_v44 = vld [vmem:[%s10232_s5 + $0x638] sm:$0xff] }
 0x40b   : > { %6984 = vmatprep.subr.bf16.mxu0 %v6983_v46  ;;  %v3684_v46 = vld [vmem:[%s10232_s5 + $0x6c0] sm:$0xff]  ;;  %v7001_v47 = vpack.c.bf16 %v3667_v44, %v3666_v27  ;;  %v3741_v27 = vld [vmem:[%s10232_s5 + $0x888] sm:$0xff] }
 0x40c   : > { %v3772_v44 = vld [vmem:[%s10232_s5 + $0x980] sm:$0xff] }
 0x40d   : > { %6954 = vmatpush3.bf16.msra.mxu1 %v6953_v33  ;;  %v7003_v33 = vpack.c.bf16 %v3685_v43, %v3684_v46  ;;  %v3724_v43 = vld [vmem:[%s10232_s5 + $0x800] sm:$0xff]  ;;  %v7083_v0 = vpack.c.bf16 %v3773_v41, %v3772_v44 }
 0x40e   : > { %6986 = vmatpush3.bf16.msra.mxu0 %v6985_v6  ;;  %6988 = vmatprep.subr.bf16.mxu1 %v6987_v28  ;;  %v3668_v6 = vld [vmem:[%s10232_s5 + $0x640] sm:$0xff]  ;;  %v3669_v28 = vld [vmem:[%s10232_s5 + $0x648] sm:$0xff] }
 0x40f   : > { %7020 = vmatprep.subr.bf16.mxu0 %v7019_v16  ;;  %v3701_v16 = vld [vmem:[%s10232_s5 + $0x748] sm:$0xff]  ;;  %v3732_v41 = vld [vmem:[%s10232_s5 + $0x840] sm:$0xff] }
 0x410   : > { %4490 = vmatmul.mubr.f32.vlgmr.msra.gmra.mrb[74].mxu1 %v4020_v7  ;;  %v7037_v57 = vpack.c.bf16 %v3701_v16, %v3700_v29  ;;  %v3670_v7 = vld [vmem:[%s10232_s5 + $0x650] sm:$0xff]  ;;  %v3775_v16 = vld [vmem:[%s10232_s5 + $0x998] sm:$0xff] }
 0x411   : > { %4560 = vmatmul.mubr.f32.vlgmr.msra.gmra.mrb[14].mxu0 %v4028_v38  ;;  %6990 = vmatpush3.bf16.msra.mxu1 %v6989_v53  ;;  %v7005_v53 = vpack.c.bf16 %v3669_v28, %v3668_v6  ;;  %v3688_v38 = vld [vmem:[%s10232_s5 + $0x6e0] sm:$0xff]  ;;  %v3743_v6 = vld [vmem:[%s10232_s5 + $0x898] sm:$0xff]  ;;  %v7053_v28 = vpack.c.bf16 %v3725_v50, %v3724_v43  ;;  %v9398_v29 = vld [vmem:[#allocation2 + $0x10] sm:$0xff] }
 0x412   : > { %4629 = vmatprep.mubr.f32.mxu1 %v4040_v1  ;;  %7022 = vmatpush3.bf16.msra.mxu0 %v7021_v22  ;;  %v3671_v22 = vld [vmem:[%s10232_s5 + $0x658] sm:$0xff]  ;;  %v7041_v1 = vpack.c.bf16 %v3703_v58, %v3702_v36  ;;  %v4056_v36 = vrot.slane %v9398_v29, %v8709_v18  ;;  %v3776_v58 = vld [vmem:[%s10232_s5 + $0x9a0] sm:$0xff]  ;;  %v3765_v43 = vld [vmem:[%s10232_s5 + $0x948] sm:$0xff] }
 0x413   : > { %4699 = vmatprep.mubr.f32.mxu0 %v4048_v31  ;;  %6992 = vmatprep.subr.bf16.mxu1 %v6991_v63  ;;  %v3689_v63 = vld [vmem:[%s10232_s5 + $0x6e8] sm:$0xff]  ;;  %v7009_v25 = vpack.c.bf16 %v3671_v22, %v3670_v7  ;;  %v3704_v31 = vld [vmem:[%s10232_s5 + $0x760] sm:$0xff]  ;;  %v3750_v50 = vld [vmem:[%s10232_s5 + $0x8d0] sm:$0xff] }
 0x414   : > { %7024 = vmatprep.subr.bf16.mxu0 %v7023_v32  ;;  %v7011_v32 = vpack.c.bf16 %v3689_v63, %v3688_v38  ;;  %v3744_v7 = vld [vmem:[%s10232_s5 + $0x8a0] sm:$0xff]  ;;  %v3745_v22 = vld [vmem:[%s10232_s5 + $0x8a8] sm:$0xff]  ;;  %v4064_v63 = vrot.slane %v9398_v29, %v8712_v30 }
 0x415   : > { %6994 = vmatpush3.bf16.msra.mxu1 %v6993_v62  ;;  %v7043_v62 = vpack.c.bf16 %v3721_v60, %v3720_v35  ;;  %v3777_v38 = vld [vmem:[%s10232_s5 + $0x9a8] sm:$0xff]  ;;  %v7057_v35 = vpack.c.bf16 %v3727_v5, %v3726_v26  ;;  %v3767_v26 = vld [vmem:[%s10232_s5 + $0x958] sm:$0xff]  ;;  %v3752_v5 = vld [vmem:[%s10232_s5 + $0x8e0] sm:$0xff] }
 0x416   : > { %7026 = vmatpush3.bf16.msra.mxu0 %v7025_v2  ;;  %6996 = vmatprep.subr.bf16.mxu1 %v6995_v42  ;;  %v3705_v2 = vld [vmem:[%s10232_s5 + $0x768] sm:$0xff]  ;;  %v3690_v42 = vld [vmem:[%s10232_s5 + $0x6f0] sm:$0xff] }
 0x417   : > { %7028 = vmatprep.subr.bf16.mxu0 %v7027_v39  ;;  %v7013_v39 = vpack.c.bf16 %v3673_v37, %v3672_v40  ;;  %v7045_v13 = vpack.c.bf16 %v3705_v2, %v3704_v31  ;;  %v7015_v10 = vpack.c.bf16 %v3691_v61, %v3690_v42  ;;  %v3761_v40 = vld [vmem:[%s10232_s5 + $0x928] sm:$0xff]  ;;  %v3746_v37 = vld [vmem:[%s10232_s5 + $0x8b0] sm:$0xff]  ;;  %v3747_v31 = vld [vmem:[%s10232_s5 + $0x8b8] sm:$0xff] }
 0x418   : > { %v3779_v2 = vld [vmem:[%s10232_s5 + $0x9b8] sm:$0xff]  ;;  %v7093_v61 = vpack.c.bf16 %v3761_v40, %v3760_v54 }
 0x419   : > { %6998 = vmatpush3.bf16.msra.mxu1 %v6997_v19  ;;  %v7047_v19 = vpack.c.bf16 %v3723_v4, %v3722_v15  ;;  %v7063_v15 = vpack.c.bf16 %v3747_v31, %v3746_v37  ;;  %v3730_v4 = vld [vmem:[%s10232_s5 + $0x830] sm:$0xff]  ;;  %v3739_v31 = vld [vmem:[%s10232_s5 + $0x878] sm:$0xff] }
 0x41a   : > { %7030 = vmatpush3.bf16.msra.mxu0 %v7029_v23  ;;  %7000 = vmatprep.subr.bf16.mxu1 %v6999_v34  ;;  %v3707_v23 = vld [vmem:[%s10232_s5 + $0x778] sm:$0xff]  ;;  %v3740_v34 = vld [vmem:[%s10232_s5 + $0x880] sm:$0xff]  ;;  %v3738_v37 = vld [vmem:[%s10232_s5 + $0x870] sm:$0xff] }
 0x41b   : > { %7032 = vmatprep.subr.bf16.mxu0 %v7031_v8  ;;  %v7017_v8 = vpack.c.bf16 %v3675_v55, %v3674_v11  ;;  %v7049_v24 = vpack.c.bf16 %v3707_v23, %v3706_v9  ;;  %v7051_v46 = vpack.c.bf16 %v3741_v27, %v3740_v34  ;;  %v3763_v11 = vld [vmem:[%s10232_s5 + $0x938] sm:$0xff]  ;;  %v3748_v55 = vld [vmem:[%s10232_s5 + $0x8c0] sm:$0xff]  ;;  %v3749_v9 = vld [vmem:[%s10232_s5 + $0x8c8] sm:$0xff] }
 0x41c   : > { %v3781_v23 = vld [vmem:[%s10232_s5 + $0x9c8] sm:$0xff]  ;;  %v7067_v44 = vpack.c.bf16 %v3749_v9, %v3748_v55  ;;  %v3788_v55 = vld [vmem:[%s10232_s5 + $0xa00] sm:$0xff] }
 0x41d   : > { %7002 = vmatpush3.bf16.msra.mxu1 %v7001_v47  ;;  %v3756_v47 = vld [vmem:[%s10232_s5 + $0x900] sm:$0xff]  ;;  %v3789_v9 = vld [vmem:[%s10232_s5 + $0xa08] sm:$0xff] }
 0x41e   : > { %7034 = vmatpush3.bf16.msra.mxu0 %v7033_v45  ;;  %7004 = vmatprep.subr.bf16.mxu1 %v7003_v33  ;;  %v3757_v45 = vld [vmem:[%s10232_s5 + $0x908] sm:$0xff]  ;;  %v3742_v33 = vld [vmem:[%s10232_s5 + $0x890] sm:$0xff] }
 0x41f   : > { %7036 = vmatprep.subr.bf16.mxu0 %v7035_v17  ;;  %v3774_v17 = vld [vmem:[%s10232_s5 + $0x990] sm:$0xff]  ;;  %v7085_v21 = vpack.c.bf16 %v3757_v45, %v3756_v47  ;;  %v3783_v45 = vld [vmem:[%s10232_s5 + $0x9d8] sm:$0xff] }
 0x420   : > { %v3782_v47 = vld [vmem:[%s10232_s5 + $0x9d0] sm:$0xff] }
 0x421   : > { %7006 = vmatpush3.bf16.msra.mxu1 %v7005_v53  ;;  %v3758_v53 = vld [vmem:[%s10232_s5 + $0x910] sm:$0xff] }
 0x422   : > { %7038 = vmatpush3.bf16.msra.mxu0 %v7037_v57  ;;  %7008 = vmatprep.subr.bf16.mxu1 %v7007_v52  ;;  %v7055_v57 = vpack.c.bf16 %v3743_v6, %v3742_v33  ;;  %v3759_v52 = vld [vmem:[%s10232_s5 + $0x918] sm:$0xff] }
 0x423   : > { %7040 = vmatprep.subr.bf16.mxu0 %v7039_v12  ;;  %v7087_v12 = vpack.c.bf16 %v3775_v16, %v3774_v17  ;;  %v7089_v60 = vpack.c.bf16 %v3759_v52, %v3758_v53  ;;  %v3734_v17 = vld [vmem:[%s10232_s5 + $0x850] sm:$0xff]  ;;  %v3735_v16 = vld [vmem:[%s10232_s5 + $0x858] sm:$0xff]  ;;  %v3753_v53 = vld [vmem:[%s10232_s5 + $0x8e8] sm:$0xff] }
 0x424   : > { %v3785_v52 = vld [vmem:[%s10232_s5 + $0x9e8] sm:$0xff] }
 0x425   : > { %7010 = vmatpush3.bf16.msra.mxu1 %v7009_v25  ;;  %v7059_v25 = vpack.c.bf16 %v3745_v22, %v3744_v7  ;;  %v7073_v7 = vpack.c.bf16 %v3735_v16, %v3734_v17  ;;  %v3809_v17 = vld [vmem:[%s10232_s5 + $0xaa8] sm:$0xff]  ;;  %v4072_v16 = vrot.slane %v9398_v29, %v8737_v51 }
 0x426   : > { %7042 = vmatpush3.bf16.msra.mxu0 %v7041_v1  ;;  %7012 = vmatprep.subr.bf16.mxu1 %v7011_v32  ;;  %v3728_v1 = vld [vmem:[%s10232_s5 + $0x820] sm:$0xff]  ;;  %v3729_v32 = vld [vmem:[%s10232_s5 + $0x828] sm:$0xff] }
 0x427   : > { %7044 = vmatprep.subr.bf16.mxu0 %v7043_v62  ;;  %v3778_v62 = vld [vmem:[%s10232_s5 + $0x9b0] sm:$0xff]  ;;  %v7061_v42 = vpack.c.bf16 %v3729_v32, %v3728_v1  ;;  %v3787_v32 = vld [vmem:[%s10232_s5 + $0x9f8] sm:$0xff] }
 0x428   : > { %v3786_v1 = vld [vmem:[%s10232_s5 + $0x9f0] sm:$0xff] }
 0x429   : > { %7014 = vmatpush3.bf16.msra.mxu1 %v7013_v39  ;;  %v3731_v39 = vld [vmem:[%s10232_s5 + $0x838] sm:$0xff] }
 0x42a   : > { %7046 = vmatpush3.bf16.msra.mxu0 %v7045_v13  ;;  %7016 = vmatprep.subr.bf16.mxu1 %v7015_v10  ;;  %v3762_v13 = vld [vmem:[%s10232_s5 + $0x930] sm:$0xff]  ;;  %v7095_v10 = vpack.c.bf16 %v3779_v2, %v3778_v62  ;;  %v7065_v34 = vpack.c.bf16 %v3731_v39, %v3730_v4  ;;  %v7111_v2 = vpack.c.bf16 %v3787_v32, %v3786_v1  ;;  %v3836_v4 = vld [vmem:[%s10232_s5 + $0xb80] sm:$0xff]  ;;  %v3837_v39 = vld [vmem:[%s10232_s5 + $0xb88] sm:$0xff] }
 0x42b   : > { %7048 = vmatprep.subr.bf16.mxu0 %v7047_v19  ;;  %v3780_v19 = vld [vmem:[%s10232_s5 + $0x9c0] sm:$0xff]  ;;  %v7097_v27 = vpack.c.bf16 %v3763_v11, %v3762_v13  ;;  %v3770_v62 = vld [vmem:[%s10232_s5 + $0x970] sm:$0xff]  ;;  %v7081_v13 = vpack.c.bf16 %v3739_v31, %v3738_v37  ;;  %v3827_v31 = vld [vmem:[%s10232_s5 + $0xb38] sm:$0xff] }
 0x42d   : > { %7018 = vmatpush3.bf16.msra.mxu1 %v7017_v8  ;;  %v3733_v8 = vld [vmem:[%s10232_s5 + $0x848] sm:$0xff] }
 0x42e   : > { %7050 = vmatpush3.bf16.msra.mxu0 %v7049_v24  ;;  %7052 = vmatprep.subr.bf16.mxu1 %v7051_v46  ;;  %v3764_v24 = vld [vmem:[%s10232_s5 + $0x940] sm:$0xff]  ;;  %v7099_v46 = vpack.c.bf16 %v3781_v23, %v3780_v19  ;;  %v7069_v33 = vpack.c.bf16 %v3733_v8, %v3732_v41  ;;  %v7147_v19 = vpack.c.bf16 %v3837_v39, %v3836_v4  ;;  %v3838_v8 = vld [vmem:[%s10232_s5 + $0xb90] sm:$0xff] }
 0x42f   : > { %7084 = vmatprep.subr.bf16.mxu0 %v7083_v0  ;;  %v3751_v0 = vld [vmem:[%s10232_s5 + $0x8d8] sm:$0xff]  ;;  %v7101_v6 = vpack.c.bf16 %v3765_v43, %v3764_v24  ;;  %v3820_v23 = vld [vmem:[%s10232_s5 + $0xb00] sm:$0xff]  ;;  %v7117_v41 = vpack.c.bf16 %v3789_v9, %v3788_v55  ;;  %v3829_v9 = vld [vmem:[%s10232_s5 + $0xb48] sm:$0xff] }
 0x430   : > { %4630 = vmatmul.mubr.f32.vlgmr.msra.gmra.mrb[76].mxu1 %v4036_v3  ;;  %v3766_v3 = vld [vmem:[%s10232_s5 + $0x950] sm:$0xff]  ;;  %v3839_v24 = vld [vmem:[%s10232_s5 + $0xb98] sm:$0xff] }
 0x431   : > { %4700 = vmatmul.mubr.f32.vlgmr.msra.gmra.mrb[16].mxu0 %v4044_v59  ;;  %7054 = vmatpush3.bf16.msra.mxu1 %v7053_v28  ;;  %v7091_v59 = vpack.c.bf16 %v3777_v38, %v3776_v58  ;;  %v7071_v28 = vpack.c.bf16 %v3751_v0, %v3750_v50  ;;  %v7105_v22 = vpack.c.bf16 %v3767_v26, %v3766_v3  ;;  %v3737_v58 = vld [vmem:[%s10232_s5 + $0x868] sm:$0xff]  ;;  %v3768_v38 = vld [vmem:[%s10232_s5 + $0x960] sm:$0xff]  ;;  %v3790_v50 = vld [vmem:[%s10232_s5 + $0xa10] sm:$0xff] }
 0x432   : > { %4769 = vmatprep.mubr.f32.mxu1 %v4056_v36  ;;  %7086 = vmatpush3.bf16.msra.mxu0 %v7085_v21  ;;  %v7103_v21 = vpack.c.bf16 %v3783_v45, %v3782_v47  ;;  %v7075_v36 = vpack.c.bf16 %v3753_v53, %v3752_v5  ;;  %v3791_v0 = vld [vmem:[%s10232_s5 + $0xa18] sm:$0xff]  ;;  %v3822_v47 = vld [vmem:[%s10232_s5 + $0xb10] sm:$0xff]  ;;  %v4060_v45 = vrot.slane %v9398_v29, %v8718_v14  ;;  %v3841_v26 = vld [vmem:[%s10232_s5 + $0xba8] sm:$0xff] }
 0x433   : > { %4839 = vmatprep.mubr.f32.mxu0 %v4064_v63  ;;  %7056 = vmatprep.subr.bf16.mxu1 %v7055_v57  ;;  %v3784_v57 = vld [vmem:[%s10232_s5 + $0x9e0] sm:$0xff]  ;;  %v7151_v3 = vpack.c.bf16 %v3839_v24, %v3838_v8  ;;  %v4080_v5 = vrot.slane %v9398_v29, %v8740_v48  ;;  %v7121_v53 = vpack.c.bf16 %v3791_v0, %v3790_v50  ;;  %v3798_v24 = vld [vmem:[%s10232_s5 + $0xa50] sm:$0xff]  ;;  %v3831_v0 = vld [vmem:[%s10232_s5 + $0xb58] sm:$0xff] }
 0x434   : > { %7088 = vmatprep.subr.bf16.mxu0 %v7087_v12  ;;  %v3736_v12 = vld [vmem:[%s10232_s5 + $0x860] sm:$0xff]  ;;  %v7107_v63 = vpack.c.bf16 %v3785_v52, %v3784_v57 }
 0x435   : > { %7058 = vmatpush3.bf16.msra.mxu1 %v7057_v35  ;;  %v3769_v35 = vld [vmem:[%s10232_s5 + $0x968] sm:$0xff]  ;;  %v7077_v54 = vpack.c.bf16 %v3737_v58, %v3736_v12 }
 0x436   : > { %7090 = vmatpush3.bf16.msra.mxu0 %v7089_v60  ;;  %7060 = vmatprep.subr.bf16.mxu1 %v7059_v25  ;;  %v3754_v60 = vld [vmem:[%s10232_s5 + $0x8f0] sm:$0xff]  ;;  %v3755_v25 = vld [vmem:[%s10232_s5 + $0x8f8] sm:$0xff]  ;;  %v3825_v58 = vld [vmem:[%s10232_s5 + $0xb28] sm:$0xff] }
 0x437   : > { %7092 = vmatprep.subr.bf16.mxu0 %v7091_v59  ;;  %v7109_v59 = vpack.c.bf16 %v3769_v35, %v3768_v38  ;;  %v7079_v40 = vpack.c.bf16 %v3755_v25, %v3754_v60  ;;  %v3810_v38 = vld [vmem:[%s10232_s5 + $0xab0] sm:$0xff]  ;;  %v3843_v60 = vld [vmem:[%s10232_s5 + $0xbb8] sm:$0xff] }
 0x438   : > { %v3842_v35 = vld [vmem:[%s10232_s5 + $0xbb0] sm:$0xff] }
 0x439   : > { %7062 = vmatpush3.bf16.msra.mxu1 %v7061_v42  ;;  %v3771_v42 = vld [vmem:[%s10232_s5 + $0x978] sm:$0xff]  ;;  %v7159_v37 = vpack.c.bf16 %v3843_v60, %v3842_v35  ;;  %v3834_v35 = vld [vmem:[%s10232_s5 + $0xb70] sm:$0xff] }
 0x43a   : > { %7094 = vmatpush3.bf16.msra.mxu0 %v7093_v61  ;;  %7064 = vmatprep.subr.bf16.mxu1 %v7063_v15  ;;  %v3804_v61 = vld [vmem:[%s10232_s5 + $0xa80] sm:$0xff]  ;;  %v3805_v15 = vld [vmem:[%s10232_s5 + $0xa88] sm:$0xff] }
 0x43b   : > { %7096 = vmatprep.subr.bf16.mxu0 %v7095_v10  ;;  %v7113_v10 = vpack.c.bf16 %v3771_v42, %v3770_v62  ;;  %v7115_v11 = vpack.c.bf16 %v3805_v15, %v3804_v61  ;;  %v3812_v62 = vld [vmem:[%s10232_s5 + $0xac0] sm:$0xff]  ;;  %v3845_v61 = vld [vmem:[%s10232_s5 + $0xbc8] sm:$0xff] }
 0x43c   : > { %v3844_v42 = vld [vmem:[%s10232_s5 + $0xbc0] sm:$0xff] }
 0x43d   : > { %7066 = vmatpush3.bf16.msra.mxu1 %v7065_v34  ;;  %v3821_v34 = vld [vmem:[%s10232_s5 + $0xb08] sm:$0xff]  ;;  %v7163_v55 = vpack.c.bf16 %v3845_v61, %v3844_v42  ;;  %v3884_v61 = vld [vmem:[%s10232_s5 + $0xd00] sm:$0xff] }
 0x43e   : > { %7098 = vmatpush3.bf16.msra.mxu0 %v7097_v27  ;;  %7068 = vmatprep.subr.bf16.mxu1 %v7067_v44  ;;  %v3806_v27 = vld [vmem:[%s10232_s5 + $0xa90] sm:$0xff]  ;;  %v3807_v44 = vld [vmem:[%s10232_s5 + $0xa98] sm:$0xff]  ;;  %v7149_v43 = vpack.c.bf16 %v3821_v34, %v3820_v23 }
 0x43f   : > { %7100 = vmatprep.subr.bf16.mxu0 %v7099_v46  ;;  %v4052_v46 = vrot.slane %v9398_v29, %v8715_v49  ;;  %v3815_v23 = vld [vmem:[%s10232_s5 + $0xad8] sm:$0xff]  ;;  %v3846_v34 = vld [vmem:[%s10232_s5 + $0xbd0] sm:$0xff] }
 0x441   : > { %7070 = vmatpush3.bf16.msra.mxu1 %v7069_v33  ;;  %v7119_v33 = vpack.c.bf16 %v3807_v44, %v3806_v27  ;;  %v3847_v27 = vld [vmem:[%s10232_s5 + $0xbd8] sm:$0xff] }
 0x442   : > { %7102 = vmatpush3.bf16.msra.mxu0 %v7101_v6  ;;  %7072 = vmatprep.subr.bf16.mxu1 %v7071_v28  ;;  %v3823_v6 = vld [vmem:[%s10232_s5 + $0xb18] sm:$0xff]  ;;  %v3808_v28 = vld [vmem:[%s10232_s5 + $0xaa0] sm:$0xff]  ;;  %v7167_v50 = vpack.c.bf16 %v3847_v27, %v3846_v34  ;;  %v3886_v27 = vld [vmem:[%s10232_s5 + $0xd10] sm:$0xff] }
 0x443   : > { %7104 = vmatprep.subr.bf16.mxu0 %v7103_v21  ;;  %v3840_v21 = vld [vmem:[%s10232_s5 + $0xba0] sm:$0xff]  ;;  %v7153_v57 = vpack.c.bf16 %v3823_v6, %v3822_v47  ;;  %v7123_v52 = vpack.c.bf16 %v3809_v17, %v3808_v28  ;;  %v3849_v6 = vld [vmem:[%s10232_s5 + $0xbe8] sm:$0xff]  ;;  %v3855_v34 = vld [vmem:[%s10232_s5 + $0xc18] sm:$0xff] }
 0x444   : > { %v7155_v12 = vpack.c.bf16 %v3841_v26, %v3840_v21  ;;  %v3816_v47 = vld [vmem:[%s10232_s5 + $0xae0] sm:$0xff]  ;;  %v3801_v21 = vld [vmem:[%s10232_s5 + $0xa68] sm:$0xff] }
 0x445   : > { %7074 = vmatpush3.bf16.msra.mxu1 %v7073_v7  ;;  %v3792_v7 = vld [vmem:[%s10232_s5 + $0xa20] sm:$0xff] }
 0x446   : > { %7106 = vmatpush3.bf16.msra.mxu0 %v7105_v22  ;;  %7076 = vmatprep.subr.bf16.mxu1 %v7075_v36  ;;  %v3793_v22 = vld [vmem:[%s10232_s5 + $0xa28] sm:$0xff]  ;;  %v3824_v36 = vld [vmem:[%s10232_s5 + $0xb20] sm:$0xff] }
 0x447   : > { %7108 = vmatprep.subr.bf16.mxu0 %v7107_v63  ;;  %v3811_v63 = vld [vmem:[%s10232_s5 + $0xab8] sm:$0xff]  ;;  %v7125_v25 = vpack.c.bf16 %v3793_v22, %v3792_v7  ;;  %v7157_v1 = vpack.c.bf16 %v3825_v58, %v3824_v36  ;;  %v3832_v26 = vld [vmem:[%s10232_s5 + $0xb60] sm:$0xff]  ;;  %v3850_v7 = vld [vmem:[%s10232_s5 + $0xbf0] sm:$0xff] }
 0x448   : > { %v7127_v32 = vpack.c.bf16 %v3811_v63, %v3810_v38  ;;  %v3851_v22 = vld [vmem:[%s10232_s5 + $0xbf8] sm:$0xff]  ;;  %v3802_v38 = vld [vmem:[%s10232_s5 + $0xa70] sm:$0xff] }
 0x449   : > { %7078 = vmatpush3.bf16.msra.mxu1 %v7077_v54  ;;  %v3794_v54 = vld [vmem:[%s10232_s5 + $0xa30] sm:$0xff]  ;;  %v3803_v63 = vld [vmem:[%s10232_s5 + $0xa78] sm:$0xff]  ;;  %v7175_v60 = vpack.c.bf16 %v3851_v22, %v3850_v7 }
 0x44a   : > { %7110 = vmatpush3.bf16.msra.mxu0 %v7109_v59  ;;  %7080 = vmatprep.subr.bf16.mxu1 %v7079_v40  ;;  %v3795_v59 = vld [vmem:[%s10232_s5 + $0xa38] sm:$0xff]  ;;  %v3826_v40 = vld [vmem:[%s10232_s5 + $0xb30] sm:$0xff] }
 0x44b   : > { %7112 = vmatprep.subr.bf16.mxu0 %v7111_v2  ;;  %v3813_v2 = vld [vmem:[%s10232_s5 + $0xac8] sm:$0xff]  ;;  %v7129_v15 = vpack.c.bf16 %v3795_v59, %v3794_v54  ;;  %v7161_v4 = vpack.c.bf16 %v3827_v31, %v3826_v40  ;;  %v3900_v54 = vld [vmem:[%s10232_s5 + $0xd80] sm:$0xff]  ;;  %v7145_v40 = vpack.c.bf16 %v3803_v63, %v3802_v38  ;;  %v3858_v7 = vld [vmem:[%s10232_s5 + $0xc30] sm:$0xff] }
 0x44c   : > { %v7131_v39 = vpack.c.bf16 %v3813_v2, %v3812_v62  ;;  %v3901_v59 = vld [vmem:[%s10232_s5 + $0xd88] sm:$0xff]  ;;  %v3852_v62 = vld [vmem:[%s10232_s5 + $0xc00] sm:$0xff]  ;;  %v3859_v22 = vld [vmem:[%s10232_s5 + $0xc38] sm:$0xff] }
 0x44d   : > { %7082 = vmatpush3.bf16.msra.mxu1 %v7081_v13  ;;  %v3796_v13 = vld [vmem:[%s10232_s5 + $0xa40] sm:$0xff]  ;;  %v3853_v2 = vld [vmem:[%s10232_s5 + $0xc08] sm:$0xff]  ;;  %v7211_v42 = vpack.c.bf16 %v3901_v59, %v3900_v54 }
 0x44e   : > { %7114 = vmatpush3.bf16.msra.mxu0 %v7113_v10  ;;  %7116 = vmatprep.subr.bf16.mxu1 %v7115_v11  ;;  %v3797_v10 = vld [vmem:[%s10232_s5 + $0xa48] sm:$0xff]  ;;  %v3828_v11 = vld [vmem:[%s10232_s5 + $0xb40] sm:$0xff] }
 0x44f   : > { %7148 = vmatprep.subr.bf16.mxu0 %v7147_v19  ;;  %v3814_v19 = vld [vmem:[%s10232_s5 + $0xad0] sm:$0xff]  ;;  %v7133_v44 = vpack.c.bf16 %v3797_v10, %v3796_v13  ;;  %v7181_v13 = vpack.c.bf16 %v3853_v2, %v3852_v62  ;;  %v9801_v10 = vld [vmem:[#allocation2 + $0x18] sm:$0xff]  ;;  %v3876_v38 = vld [vmem:[%s10232_s5 + $0xcc0] sm:$0xff] }
 0x450   : > { %4770 = vmatmul.mubr.f32.vlgmr.msra.gmra.mrb[78].mxu1 %v4052_v46  ;;  %v7135_v8 = vpack.c.bf16 %v3815_v23, %v3814_v19  ;;  %v3799_v46 = vld [vmem:[%s10232_s5 + $0xa58] sm:$0xff]  ;;  %v3854_v23 = vld [vmem:[%s10232_s5 + $0xc10] sm:$0xff]  ;;  %v3877_v63 = vld [vmem:[%s10232_s5 + $0xcc8] sm:$0xff] }
 0x451   : > { %4840 = vmatmul.mubr.f32.vlgmr.msra.gmra.mrb[18].mxu0 %v4060_v45  ;;  %7118 = vmatpush3.bf16.msra.mxu1 %v7117_v41  ;;  %v7165_v41 = vpack.c.bf16 %v3829_v9, %v3828_v11  ;;  %v3817_v45 = vld [vmem:[%s10232_s5 + $0xae8] sm:$0xff]  ;;  %v7137_v28 = vpack.c.bf16 %v3799_v46, %v3798_v24  ;;  %v3902_v11 = vld [vmem:[%s10232_s5 + $0xd90] sm:$0xff]  ;;  %v4068_v9 = vrot.slane %v9398_v29, %v8966_v20  ;;  %v3872_v24 = vld [vmem:[%s10232_s5 + $0xca0] sm:$0xff] }
 0x452   : > { %4909 = vmatprep.mubr.f32.mxu1 %v4072_v16  ;;  %7150 = vmatpush3.bf16.msra.mxu0 %v7149_v43  ;;  %v3830_v43 = vld [vmem:[%s10232_s5 + $0xb50] sm:$0xff]  ;;  %v7139_v16 = vpack.c.bf16 %v3817_v45, %v3816_v47  ;;  %v3873_v46 = vld [vmem:[%s10232_s5 + $0xca8] sm:$0xff]  ;;  %v4096_v47 = vrot.slane %v9801_v10, %v8712_v30  ;;  %v7185_v45 = vpack.c.bf16 %v3855_v34, %v3854_v23  ;;  %v3860_v54 = vld [vmem:[%s10232_s5 + $0xc40] sm:$0xff] }
 0x453   : > { %4979 = vmatprep.mubr.f32.mxu0 %v4080_v5  ;;  %7120 = vmatprep.subr.bf16.mxu1 %v7119_v33  ;;  %v3848_v33 = vld [vmem:[%s10232_s5 + $0xbe0] sm:$0xff]  ;;  %v7169_v17 = vpack.c.bf16 %v3831_v0, %v3830_v43  ;;  %v4088_v43 = vrot.slane %v9801_v10, %v8709_v18  ;;  %v3905_v0 = vld [vmem:[%s10232_s5 + $0xda8] sm:$0xff]  ;;  %v3878_v62 = vld [vmem:[%s10232_s5 + $0xcd0] sm:$0xff] }
 0x454   : > { %7152 = vmatprep.subr.bf16.mxu0 %v7151_v3  ;;  %v3800_v3 = vld [vmem:[%s10232_s5 + $0xa60] sm:$0xff]  ;;  %v7171_v5 = vpack.c.bf16 %v3849_v6, %v3848_v33  ;;  %v7187_v6 = vpack.c.bf16 %v3873_v46, %v3872_v24  ;;  %v3861_v59 = vld [vmem:[%s10232_s5 + $0xc48] sm:$0xff]  ;;  %v3879_v2 = vld [vmem:[%s10232_s5 + $0xcd8] sm:$0xff] }
 0x455   : > { %7122 = vmatpush3.bf16.msra.mxu1 %v7121_v53  ;;  %v3833_v53 = vld [vmem:[%s10232_s5 + $0xb68] sm:$0xff]  ;;  %v7141_v36 = vpack.c.bf16 %v3801_v21, %v3800_v3  ;;  %v3856_v18 = vld [vmem:[%s10232_s5 + $0xc20] sm:$0xff]  ;;  %v3874_v3 = vld [vmem:[%s10232_s5 + $0xcb0] sm:$0xff] }
 0x456   : > { %7154 = vmatpush3.bf16.msra.mxu0 %v7153_v57  ;;  %7124 = vmatprep.subr.bf16.mxu1 %v7123_v52  ;;  %v3818_v57 = vld [vmem:[%s10232_s5 + $0xaf0] sm:$0xff]  ;;  %v3819_v52 = vld [vmem:[%s10232_s5 + $0xaf8] sm:$0xff]  ;;  %v3880_v23 = vld [vmem:[%s10232_s5 + $0xce0] sm:$0xff] }
 0x457   : > { %7156 = vmatprep.subr.bf16.mxu0 %v7155_v12  ;;  %v7173_v12 = vpack.c.bf16 %v3833_v53, %v3832_v26  ;;  %v7143_v58 = vpack.c.bf16 %v3819_v52, %v3818_v57  ;;  %v3875_v21 = vld [vmem:[%s10232_s5 + $0xcb8] sm:$0xff]  ;;  %v3906_v26 = vld [vmem:[%s10232_s5 + $0xdb0] sm:$0xff]  ;;  %v3881_v34 = vld [vmem:[%s10232_s5 + $0xce8] sm:$0xff] }
 0x458   : > { %v7191_v52 = vpack.c.bf16 %v3875_v21, %v3874_v3  ;;  %v7203_v24 = vpack.c.bf16 %v3881_v34, %v3880_v23  ;;  %v3864_v46 = vld [vmem:[%s10232_s5 + $0xc60] sm:$0xff]  ;;  %v3898_v3 = vld [vmem:[%s10232_s5 + $0xd70] sm:$0xff]  ;;  %v3921_v23 = vld [vmem:[%s10232_s5 + $0xe28] sm:$0xff] }
 0x459   : > { %7126 = vmatpush3.bf16.msra.mxu1 %v7125_v25  ;;  %v3835_v25 = vld [vmem:[%s10232_s5 + $0xb78] sm:$0xff]  ;;  %v3952_v34 = vld [vmem:[%s10232_s5 + $0xf20] sm:$0xff] }
 0x45a   : > { %7158 = vmatpush3.bf16.msra.mxu0 %v7157_v1  ;;  %7128 = vmatprep.subr.bf16.mxu1 %v7127_v32  ;;  %v3868_v1 = vld [vmem:[%s10232_s5 + $0xc80] sm:$0xff]  ;;  %v3869_v32 = vld [vmem:[%s10232_s5 + $0xc88] sm:$0xff] }
 0x45b   : > { %7160 = vmatprep.subr.bf16.mxu0 %v7159_v37  ;;  %v7177_v37 = vpack.c.bf16 %v3835_v25, %v3834_v35  ;;  %v7179_v31 = vpack.c.bf16 %v3869_v32, %v3868_v1  ;;  %v3908_v35 = vld [vmem:[%s10232_s5 + $0xdc0] sm:$0xff]  ;;  %v7193_v25 = vpack.c.bf16 %v3859_v22, %v3858_v7  ;;  %v7195_v32 = vpack.c.bf16 %v3877_v63, %v3876_v38 }
 0x45c   : > { %v3948_v63 = vld [vmem:[%s10232_s5 + $0xf00] sm:$0xff] }
 0x45d   : > { %7130 = vmatpush3.bf16.msra.mxu1 %v7129_v15  ;;  %v3885_v15 = vld [vmem:[%s10232_s5 + $0xd08] sm:$0xff] }
 0x45e   : > { %7162 = vmatpush3.bf16.msra.mxu0 %v7161_v4  ;;  %7132 = vmatprep.subr.bf16.mxu1 %v7131_v39  ;;  %v3870_v4 = vld [vmem:[%s10232_s5 + $0xc90] sm:$0xff]  ;;  %v3871_v39 = vld [vmem:[%s10232_s5 + $0xc98] sm:$0xff]  ;;  %v7213_v19 = vpack.c.bf16 %v3885_v15, %v3884_v61  ;;  %v7197_v15 = vpack.c.bf16 %v3861_v59, %v3860_v54  ;;  %v4084_v59 = vrot.slane %v9801_v10, %v8715_v49 }
 0x45f   : > { %7164 = vmatprep.subr.bf16.mxu0 %v7163_v55  ;;  %v3903_v55 = vld [vmem:[%s10232_s5 + $0xd98] sm:$0xff] }
 0x460   : > { %v3911_v61 = vld [vmem:[%s10232_s5 + $0xdd8] sm:$0xff] }
 0x461   : > { %7134 = vmatpush3.bf16.msra.mxu1 %v7133_v44  ;;  %v4076_v44 = vrot.slane %v9398_v29, %v8883_v56  ;;  %v3904_v29 = vld [vmem:[%s10232_s5 + $0xda0] sm:$0xff]  ;;  %v3967_v54 = vld [vmem:[%s10232_s5 + $0xf98] sm:$0xff] }
 0x462   : > { %7166 = vmatpush3.bf16.msra.mxu0 %v7165_v41  ;;  %7136 = vmatprep.subr.bf16.mxu1 %v7135_v8  ;;  %v7183_v41 = vpack.c.bf16 %v3871_v39, %v3870_v4  ;;  %v3887_v8 = vld [vmem:[%s10232_s5 + $0xd18] sm:$0xff]  ;;  %v7219_v30 = vpack.c.bf16 %v3905_v0, %v3904_v29  ;;  %v7199_v39 = vpack.c.bf16 %v3879_v2, %v3878_v62  ;;  %v3897_v0 = vld [vmem:[%s10232_s5 + $0xd68] sm:$0xff]  ;;  %v3950_v62 = vld [vmem:[%s10232_s5 + $0xf10] sm:$0xff] }
 0x463   : > { %7168 = vmatprep.subr.bf16.mxu0 %v7167_v50  ;;  %v7215_v50 = vpack.c.bf16 %v3903_v55, %v3902_v11  ;;  %v7217_v33 = vpack.c.bf16 %v3887_v8, %v3886_v27  ;;  %v3863_v11 = vld [vmem:[%s10232_s5 + $0xc58] sm:$0xff]  ;;  %v3894_v55 = vld [vmem:[%s10232_s5 + $0xd50] sm:$0xff]  ;;  %v3912_v27 = vld [vmem:[%s10232_s5 + $0xde0] sm:$0xff]  ;;  %v4092_v2 = vrot.slane %v9801_v10, %v8718_v14 }
 0x464   : > { %v3951_v49 = vld [vmem:[%s10232_s5 + $0xf18] sm:$0xff]  ;;  %v3968_v14 = vld [vmem:[%s10232_s5 + $0xfa0] sm:$0xff] }
 0x465   : > { %7138 = vmatpush3.bf16.msra.mxu1 %v7137_v28  ;;  %v3857_v28 = vld [vmem:[%s10232_s5 + $0xc28] sm:$0xff] }
 0x466   : > { %7170 = vmatpush3.bf16.msra.mxu0 %v7169_v17  ;;  %7140 = vmatprep.subr.bf16.mxu1 %v7139_v16  ;;  %v3888_v17 = vld [vmem:[%s10232_s5 + $0xd20] sm:$0xff]  ;;  %v3889_v16 = vld [vmem:[%s10232_s5 + $0xd28] sm:$0xff]  ;;  %v7189_v53 = vpack.c.bf16 %v3857_v28, %v3856_v18 }
 0x467   : > { %7172 = vmatprep.subr.bf16.mxu0 %v7171_v5  ;;  %v3907_v5 = vld [vmem:[%s10232_s5 + $0xdb8] sm:$0xff]  ;;  %v7221_v57 = vpack.c.bf16 %v3889_v16, %v3888_v17 }
 0x468   : > { %v3867_v16 = vld [vmem:[%s10232_s5 + $0xc78] sm:$0xff] }
 0x469   : > { %7142 = vmatpush3.bf16.msra.mxu1 %v7141_v36  ;;  %v3890_v36 = vld [vmem:[%s10232_s5 + $0xd30] sm:$0xff] }
 0x46a   : > { %7174 = vmatpush3.bf16.msra.mxu0 %v7173_v12  ;;  %7144 = vmatprep.subr.bf16.mxu1 %v7143_v58  ;;  %v7223_v12 = vpack.c.bf16 %v3907_v5, %v3906_v26  ;;  %v3891_v58 = vld [vmem:[%s10232_s5 + $0xd38] sm:$0xff]  ;;  %v3932_v5 = vld [vmem:[%s10232_s5 + $0xe80] sm:$0xff] }
 0x46b   : > { %7176 = vmatprep.subr.bf16.mxu0 %v7175_v60  ;;  %v3909_v60 = vld [vmem:[%s10232_s5 + $0xdc8] sm:$0xff]  ;;  %v7225_v1 = vpack.c.bf16 %v3891_v58, %v3890_v36  ;;  %v3899_v26 = vld [vmem:[%s10232_s5 + $0xd78] sm:$0xff] }
 0x46c   : > { %v7241_v22 = vpack.c.bf16 %v3899_v26, %v3898_v3  ;;  %v3917_v58 = vld [vmem:[%s10232_s5 + $0xe08] sm:$0xff] }
 0x46d   : > { %7146 = vmatpush3.bf16.msra.mxu1 %v7145_v40  ;;  %v3892_v40 = vld [vmem:[%s10232_s5 + $0xd40] sm:$0xff]  ;;  %v3925_v26 = vld [vmem:[%s10232_s5 + $0xe48] sm:$0xff] }
 0x46e   : > { %7178 = vmatpush3.bf16.msra.mxu0 %v7177_v37  ;;  %7180 = vmatprep.subr.bf16.mxu1 %v7179_v31  ;;  %v7227_v37 = vpack.c.bf16 %v3909_v60, %v3908_v35  ;;  %v3893_v31 = vld [vmem:[%s10232_s5 + $0xd48] sm:$0xff]  ;;  %v3934_v60 = vld [vmem:[%s10232_s5 + $0xe90] sm:$0xff] }
 0x46f   : > { %7212 = vmatprep.subr.bf16.mxu0 %v7211_v42  ;;  %v3910_v42 = vld [vmem:[%s10232_s5 + $0xdd0] sm:$0xff]  ;;  %v7229_v4 = vpack.c.bf16 %v3893_v31, %v3892_v40  ;;  %v3949_v35 = vld [vmem:[%s10232_s5 + $0xf08] sm:$0xff]  ;;  %v3919_v31 = vld [vmem:[%s10232_s5 + $0xe18] sm:$0xff] }
 0x470   : > { %4910 = vmatmul.mubr.f32.vlgmr.msra.gmra.mrb[80].mxu1 %v4068_v9  ;;  %v7231_v9 = vpack.c.bf16 %v3911_v61, %v3910_v42  ;;  %v7277_v40 = vpack.c.bf16 %v3949_v35, %v3948_v63  ;;  %v3936_v61 = vld [vmem:[%s10232_s5 + $0xea0] sm:$0xff]  ;;  %v3926_v63 = vld [vmem:[%s10232_s5 + $0xe50] sm:$0xff]  ;;  %v3927_v35 = vld [vmem:[%s10232_s5 + $0xe58] sm:$0xff] }
 0x471   : > { %4980 = vmatmul.mubr.f32.vlgmr.msra.gmra.mrb[20].mxu0 %v4076_v44  ;;  %7182 = vmatpush3.bf16.msra.mxu1 %v7181_v13  ;;  %v3862_v13 = vld [vmem:[%s10232_s5 + $0xc50] sm:$0xff]  ;;  %v3913_v44 = vld [vmem:[%s10232_s5 + $0xde8] sm:$0xff] }
 0x472   : > { %5049 = vmatprep.mubr.f32.mxu1 %v4088_v43  ;;  %7214 = vmatpush3.bf16.msra.mxu0 %v7213_v19  ;;  %v3895_v19 = vld [vmem:[%s10232_s5 + $0xd58] sm:$0xff]  ;;  %v3865_v43 = vld [vmem:[%s10232_s5 + $0xc68] sm:$0xff]  ;;  %v7235_v29 = vpack.c.bf16 %v3913_v44, %v3912_v27  ;;  %v3938_v44 = vld [vmem:[%s10232_s5 + $0xeb0] sm:$0xff] }
 0x473   : > { %5119 = vmatprep.mubr.f32.mxu0 %v4096_v47  ;;  %7184 = vmatprep.subr.bf16.mxu1 %v7183_v41  ;;  %v7201_v41 = vpack.c.bf16 %v3863_v11, %v3862_v13  ;;  %v7233_v8 = vpack.c.bf16 %v3895_v19, %v3894_v55  ;;  %v3882_v47 = vld [vmem:[%s10232_s5 + $0xcf0] sm:$0xff]  ;;  %v7205_v18 = vpack.c.bf16 %v3865_v43, %v3864_v46  ;;  %v3969_v13 = vld [vmem:[%s10232_s5 + $0xfa8] sm:$0xff] }
 0x474   : > { %7216 = vmatprep.subr.bf16.mxu0 %v7215_v50  ;;  %v3896_v50 = vld [vmem:[%s10232_s5 + $0xd60] sm:$0xff]  ;;  %v4112_v11 = vrot.slane %v9801_v10, %v8740_v48  ;;  %v7283_v48 = vpack.c.bf16 %v3969_v13, %v3968_v14  ;;  %v3953_v27 = vld [vmem:[%s10232_s5 + $0xf28] sm:$0xff]  ;;  %v3946_v14 = vld [vmem:[%s10232_s5 + $0xef0] sm:$0xff] }
 0x475   : > { %7186 = vmatpush3.bf16.msra.mxu1 %v7185_v45  ;;  %v3883_v45 = vld [vmem:[%s10232_s5 + $0xcf8] sm:$0xff]  ;;  %v7237_v28 = vpack.c.bf16 %v3897_v0, %v3896_v50  ;;  %v7285_v43 = vpack.c.bf16 %v3953_v27, %v3952_v34 }
 0x476   : > { %7218 = vmatpush3.bf16.msra.mxu0 %v7217_v33  ;;  %7188 = vmatprep.subr.bf16.mxu1 %v7187_v6  ;;  %v3914_v33 = vld [vmem:[%s10232_s5 + $0xdf0] sm:$0xff]  ;;  %v3915_v6 = vld [vmem:[%s10232_s5 + $0xdf8] sm:$0xff]  ;;  %v7207_v17 = vpack.c.bf16 %v3883_v45, %v3882_v47 }
 0x477   : > { %7220 = vmatprep.subr.bf16.mxu0 %v7219_v30  ;;  %v3866_v30 = vld [vmem:[%s10232_s5 + $0xc70] sm:$0xff]  ;;  %v7239_v21 = vpack.c.bf16 %v3915_v6, %v3914_v33  ;;  %v3923_v0 = vld [vmem:[%s10232_s5 + $0xe38] sm:$0xff]  ;;  %v3940_v6 = vld [vmem:[%s10232_s5 + $0xec0] sm:$0xff] }
 0x478   : > { %v7209_v7 = vpack.c.bf16 %v3867_v16, %v3866_v30  ;;  %v3954_v47 = vld [vmem:[%s10232_s5 + $0xf30] sm:$0xff]  ;;  %v3955_v33 = vld [vmem:[%s10232_s5 + $0xf38] sm:$0xff] }
 0x479   : > { %7190 = vmatpush3.bf16.msra.mxu1 %v7189_v53  ;;  %v3933_v53 = vld [vmem:[%s10232_s5 + $0xe88] sm:$0xff]  ;;  %v7289_v16 = vpack.c.bf16 %v3955_v33, %v3954_v47  ;;  %v3947_v13 = vld [vmem:[%s10232_s5 + $0xef8] sm:$0xff]  ;;  %v4108_v33 = vrot.slane %v9801_v10, %v8883_v56 }
 0x47a   : > { %7222 = vmatpush3.bf16.msra.mxu0 %v7221_v57  ;;  %7192 = vmatprep.subr.bf16.mxu1 %v7191_v52  ;;  %v3964_v57 = vld [vmem:[%s10232_s5 + $0xf80] sm:$0xff]  ;;  %v3965_v52 = vld [vmem:[%s10232_s5 + $0xf88] sm:$0xff]  ;;  %v7243_v36 = vpack.c.bf16 %v3933_v53, %v3932_v5 }
 0x47b   : > { %7224 = vmatprep.subr.bf16.mxu0 %v7223_v12  ;;  %v3916_v12 = vld [vmem:[%s10232_s5 + $0xe00] sm:$0xff]  ;;  %v7275_v38 = vpack.c.bf16 %v3965_v52, %v3964_v57  ;;  %v3957_v57 = vld [vmem:[%s10232_s5 + $0xf48] sm:$0xff]  ;;  %v3942_v52 = vld [vmem:[%s10232_s5 + $0xed0] sm:$0xff] }
 0x47c   : > { %v3956_v5 = vld [vmem:[%s10232_s5 + $0xf40] sm:$0xff] }
 0x47d   : > { %7194 = vmatpush3.bf16.msra.mxu1 %v7193_v25  ;;  %v3935_v25 = vld [vmem:[%s10232_s5 + $0xe98] sm:$0xff] }
 0x47e   : > { %7226 = vmatpush3.bf16.msra.mxu0 %v7225_v1  ;;  %7196 = vmatprep.subr.bf16.mxu1 %v7195_v32  ;;  %v7245_v1 = vpack.c.bf16 %v3917_v58, %v3916_v12  ;;  %v3966_v32 = vld [vmem:[%s10232_s5 + $0xf90] sm:$0xff]  ;;  %v7247_v42 = vpack.c.bf16 %v3935_v25, %v3934_v60  ;;  %v7293_v58 = vpack.c.bf16 %v3957_v57, %v3956_v5 }
 0x47f   : > { %7228 = vmatprep.subr.bf16.mxu0 %v7227_v37  ;;  %v3918_v37 = vld [vmem:[%s10232_s5 + $0xe10] sm:$0xff] }
 0x480   : > { %v7249_v55 = vpack.c.bf16 %v3919_v31, %v3918_v37  ;;  %v3958_v60 = vld [vmem:[%s10232_s5 + $0xf50] sm:$0xff]  ;;  %v7265_v37 = vpack.c.bf16 %v3927_v35, %v3926_v63 }
 0x481   : > { %7198 = vmatpush3.bf16.msra.mxu1 %v7197_v15  ;;  %v3937_v15 = vld [vmem:[%s10232_s5 + $0xea8] sm:$0xff] }
 0x482   : > { %7230 = vmatpush3.bf16.msra.mxu0 %v7229_v4  ;;  %7200 = vmatprep.subr.bf16.mxu1 %v7199_v39  ;;  %v4104_v4 = vrot.slane %v9801_v10, %v8737_v51  ;;  %v7279_v39 = vpack.c.bf16 %v3967_v54, %v3966_v32  ;;  %v7251_v19 = vpack.c.bf16 %v3937_v15, %v3936_v61  ;;  %v3920_v51 = vld [vmem:[%s10232_s5 + $0xe20] sm:$0xff]  ;;  %v3945_v54 = vld [vmem:[%s10232_s5 + $0xee8] sm:$0xff] }
 0x483   : > { %7232 = vmatprep.subr.bf16.mxu0 %v7231_v9  ;;  %v7281_v9 = vpack.c.bf16 %v3951_v49, %v3950_v62  ;;  %v7253_v46 = vpack.c.bf16 %v3921_v23, %v3920_v51  ;;  %v3944_v32 = vld [vmem:[%s10232_s5 + $0xee0] sm:$0xff]  ;;  %v3979_v51 = vld [vmem:[%s10232_s5 + $0xff8] sm:$0xff] }
 0x484   : > { %v7267_v62 = vpack.c.bf16 %v3945_v54, %v3944_v32  ;;  %v3960_v49 = vld [vmem:[%s10232_s5 + $0xf60] sm:$0xff] }
 0x485   : > { %7202 = vmatpush3.bf16.msra.mxu1 %v7201_v41  ;;  %v3939_v41 = vld [vmem:[%s10232_s5 + $0xeb8] sm:$0xff] }
 0x486   : > { %7234 = vmatpush3.bf16.msra.mxu0 %v7233_v8  ;;  %7204 = vmatprep.subr.bf16.mxu1 %v7203_v24  ;;  %v3970_v8 = vld [vmem:[%s10232_s5 + $0xfb0] sm:$0xff]  ;;  %v3971_v24 = vld [vmem:[%s10232_s5 + $0xfb8] sm:$0xff]  ;;  %v7255_v50 = vpack.c.bf16 %v3939_v41, %v3938_v44  ;;  %v7271_v44 = vpack.c.bf16 %v3947_v13, %v3946_v14 }
 0x487   : > { %7236 = vmatprep.subr.bf16.mxu0 %v7235_v29  ;;  %v3922_v29 = vld [vmem:[%s10232_s5 + $0xe30] sm:$0xff]  ;;  %v7287_v45 = vpack.c.bf16 %v3971_v24, %v3970_v8  ;;  %v3931_v8 = vld [vmem:[%s10232_s5 + $0xe78] sm:$0xff] }
 0x488   : > { %v7257_v30 = vpack.c.bf16 %v3923_v0, %v3922_v29  ;;  %v3930_v41 = vld [vmem:[%s10232_s5 + $0xe70] sm:$0xff] }
 0x489   : > { %7206 = vmatpush3.bf16.msra.mxu1 %v7205_v18  ;;  %v3941_v18 = vld [vmem:[%s10232_s5 + $0xec8] sm:$0xff]  ;;  %v7273_v0 = vpack.c.bf16 %v3931_v8, %v3930_v41 }
 0x48a   : > { %7238 = vmatpush3.bf16.msra.mxu0 %v7237_v28  ;;  %7208 = vmatprep.subr.bf16.mxu1 %v7207_v17  ;;  %v3972_v28 = vld [vmem:[%s10232_s5 + $0xfc0] sm:$0xff]  ;;  %v3973_v17 = vld [vmem:[%s10232_s5 + $0xfc8] sm:$0xff]  ;;  %v7259_v3 = vpack.c.bf16 %v3941_v18, %v3940_v6 }
 0x48b   : > { %7240 = vmatprep.subr.bf16.mxu0 %v7239_v21  ;;  %v3924_v21 = vld [vmem:[%s10232_s5 + $0xe40] sm:$0xff]  ;;  %v7291_v53 = vpack.c.bf16 %v3973_v17, %v3972_v28 }
 0x48c   : > { %v7261_v12 = vpack.c.bf16 %v3925_v26, %v3924_v21 }
 0x48d   : > { %7210 = vmatpush3.bf16.msra.mxu1 %v7209_v7  ;;  %v3943_v7 = vld [vmem:[%s10232_s5 + $0xed8] sm:$0xff] }
 0x48e   : > { %7242 = vmatpush3.bf16.msra.mxu0 %v7241_v22  ;;  %7244 = vmatprep.subr.bf16.mxu1 %v7243_v36  ;;  %v3974_v22 = vld [vmem:[%s10232_s5 + $0xfd0] sm:$0xff]  ;;  %v3975_v36 = vld [vmem:[%s10232_s5 + $0xfd8] sm:$0xff] }
 0x48f   : > { %7276 = vmatprep.subr.bf16.mxu0 %v7275_v38  ;;  %v7263_v38 = vpack.c.bf16 %v3943_v7, %v3942_v52  ;;  %v7295_v25 = vpack.c.bf16 %v3975_v36, %v3974_v22 }
 0x490   : > { %5050 = vmatmul.mubr.f32.vlgmr.msra.gmra.mrb[82].mxu1 %v4084_v59  ;;  %v3976_v59 = vld [vmem:[%s10232_s5 + $0xfe0] sm:$0xff] }
 0x491   : > { %5120 = vmatmul.mubr.f32.vlgmr.msra.gmra.mrb[22].mxu0 %v4092_v2  ;;  %7246 = vmatpush3.bf16.msra.mxu1 %v7245_v1  ;;  %v3959_v1 = vld [vmem:[%s10232_s5 + $0xf58] sm:$0xff]  ;;  %v3928_v2 = vld [vmem:[%s10232_s5 + $0xe60] sm:$0xff] }
 0x492   : > { %5189 = vmatprep.mubr.f32.mxu1 %v4104_v4  ;;  %7278 = vmatpush3.bf16.msra.mxu0 %v7277_v40  ;;  %v3977_v40 = vld [vmem:[%s10232_s5 + $0xfe8] sm:$0xff]  ;;  %v7297_v31 = vpack.c.bf16 %v3959_v1, %v3958_v60 }
 0x493   : > { %5259 = vmatprep.mubr.f32.mxu0 %v4112_v11  ;;  %7248 = vmatprep.subr.bf16.mxu1 %v7247_v42  ;;  %v3929_v42 = vld [vmem:[%s10232_s5 + $0xe68] sm:$0xff]  ;;  %v7299_v4 = vpack.c.bf16 %v3977_v40, %v3976_v59  ;;  %v3980_v11 = vld [vmem:[%s10233_s6] sm:$0x1] }
 0x494   : > { %7280 = vmatprep.subr.bf16.mxu0 %v7279_v39  ;;  %v3961_v39 = vld [vmem:[%s10232_s5 + $0xf68] sm:$0xff] }
 0x495   : > { %7250 = vmatpush3.bf16.msra.mxu1 %v7249_v55  ;;  %v7301_v27 = vpack.c.bf16 %v3961_v39, %v3960_v49 }
 0x496   : > { %7282 = vmatpush3.bf16.msra.mxu0 %v7281_v9  ;;  %7252 = vmatprep.subr.bf16.mxu1 %v7251_v19  ;;  %v3978_v19 = vld [vmem:[%s10232_s5 + $0xff0] sm:$0xff] }
 0x497   : > { %7284 = vmatprep.subr.bf16.mxu0 %v7283_v48  ;;  %v7269_v48 = vpack.c.bf16 %v3929_v42, %v3928_v2 }
 0x499   : > { %7254 = vmatpush3.bf16.msra.mxu1 %v7253_v46  ;;  %v7303_v46 = vpack.c.bf16 %v3979_v51, %v3978_v19 }
 0x49a   : > { %7286 = vmatpush3.bf16.msra.mxu0 %v7285_v43  ;;  %7256 = vmatprep.subr.bf16.mxu1 %v7255_v50  ;;  %v3962_v43 = vld [vmem:[%s10232_s5 + $0xf70] sm:$0xff]  ;;  %v3963_v50 = vld [vmem:[%s10232_s5 + $0xf78] sm:$0xff] }
 0x49b   : > { %7288 = vmatprep.subr.bf16.mxu0 %v7287_v45  ;;  %v7305_v47 = vpack.c.bf16 %v3963_v50, %v3962_v43  ;;  %v4100_v45 = vrot.slane %v9801_v10, %v8966_v20 }
 0x49d   : > { %7258 = vmatpush3.bf16.msra.mxu1 %v7257_v30 }
 0x49e   : > { %7290 = vmatpush3.bf16.msra.mxu0 %v7289_v16  ;;  %7260 = vmatprep.subr.bf16.mxu1 %v7259_v3 }
 0x49f   : > { %7292 = vmatprep.subr.bf16.mxu0 %v7291_v53 }
 0x4a1   : > { %7262 = vmatpush3.bf16.msra.mxu1 %v7261_v12 }
 0x4a2   : > { %7294 = vmatpush3.bf16.msra.mxu0 %v7293_v58  ;;  %7264 = vmatprep.subr.bf16.mxu1 %v7263_v38 }
 0x4a3   : > { %v5817_v61 = vpop.f32.mrb[70].mxu1  ;;  %v5852_v15 = vpop.f32.mrb[10].mxu0  ;;  %7296 = vmatprep.subr.bf16.mxu0 %v7295_v25 }
 0x4a4   : > { %v5818_v55 = vpop.f32.mrb[71].mxu1  ;;  %v5853_v9 = vpop.f32.mrb[11].mxu0 }
 0x4a5   : > { %v5819_v23 = vadd.f32 %v5818_v55, %v5817_v61  ;;  %v5854_v34 = vadd.f32 %v5853_v9, %v5852_v15  ;;  %7266 = vmatpush3.bf16.msra.mxu1 %v7265_v37 }
 0x4a6   : > { %7298 = vmatpush3.bf16.msra.mxu0 %v7297_v31  ;;  %7268 = vmatprep.subr.bf16.mxu1 %v7267_v62 }
 0x4a7   : > { %v4212_v24 = vadd.f32 %v5819_v23, %v3980_v11  ;;  %7300 = vmatprep.subr.bf16.mxu0 %v7299_v4 }
 0x4a9   : > { %v4282_v29 = vadd.f32 %v5854_v34, %v4212_v24  ;;  %7270 = vmatpush3.bf16.msra.mxu1 %v7269_v48 }
 0x4aa   : > { %7302 = vmatpush3.bf16.msra.mxu0 %v7301_v27  ;;  %7272 = vmatprep.subr.bf16.mxu1 %v7271_v44 }
 0x4ab   : > { %7304 = vmatprep.subr.bf16.mxu0 %v7303_v46 }
 0x4ad   : > { %7274 = vmatpush3.bf16.msra.mxu1 %v7273_v0 }
 0x4ae   : > { %7306 = vmatpush3.bf16.msra.mxu0 %v7305_v47 }
 0x4b0   : > { %5190 = vmatmul.mubr.f32.vlgmr.msra.gmra.mrb[84].mxu1 %v4100_v45 }
 0x4b1   : > { %5260 = vmatmul.mubr.f32.vlgmr.msra.gmra.mrb[24].mxu0 %v4108_v33 }
 0x4c3   : > { %v5887_v6 = vpop.f32.mrb[72].mxu1  ;;  %v5922_v18 = vpop.f32.mrb[12].mxu0 }
 0x4c4   : > { %v5888_v28 = vpop.f32.mrb[73].mxu1  ;;  %v5923_v17 = vpop.f32.mrb[13].mxu0 }
 0x4c5   : > { %v5889_v30 = vadd.f32 %v5888_v28, %v5887_v6  ;;  %v5924_v16 = vadd.f32 %v5923_v17, %v5922_v18 }
 0x4c7   : > { %v4352_v3 = vadd.f32 %v5889_v30, %v4282_v29 }
 0x4c9   : > { %v4422_v21 = vadd.f32 %v5924_v16, %v4352_v3 }
 0x4e3   : > { %v5957_v26 = vpop.f32.mrb[74].mxu1 }
 0x4e4   : > { %v5992_v5 = vpop.f32.mrb[14].mxu0  ;;  %v5958_v53 = vpop.f32.mrb[75].mxu1 }
 0x4e5   : > { %v5959_v57 = vadd.f32 %v5958_v53, %v5957_v26  ;;  %v5993_v52 = vpop.f32.mrb[15].mxu0 }
 0x4e6   : > { %v5994_v7 = vadd.f32 %v5993_v52, %v5992_v5 }
 0x4e7   : > { %v4492_v20 = vadd.f32 %v5959_v57, %v4422_v21 }
 0x4e9   : > { %v4562_v22 = vadd.f32 %v5994_v7, %v4492_v20 }
 0x503   : > { %v6027_v36 = vpop.f32.mrb[76].mxu1 }
 0x504   : > { %v6062_v56 = vpop.f32.mrb[16].mxu0  ;;  %v6028_v10 = vpop.f32.mrb[77].mxu1 }
 0x505   : > { %v6029_v12 = vadd.f32 %v6028_v10, %v6027_v36  ;;  %v6063_v58 = vpop.f32.mrb[17].mxu0 }
 0x506   : > { %v6064_v38 = vadd.f32 %v6063_v58, %v6062_v56 }
 0x507   : > { %v4632_v63 = vadd.f32 %v6029_v12, %v4562_v22 }
 0x509   : > { %v4702_v35 = vadd.f32 %v6064_v38, %v4632_v63 }
 0x523   : > { %v6097_v60 = vpop.f32.mrb[78].mxu1 }
 0x524   : > { %v6132_v25 = vpop.f32.mrb[18].mxu0  ;;  %v6098_v1 = vpop.f32.mrb[79].mxu1 }
 0x525   : > { %v6099_v32 = vadd.f32 %v6098_v1, %v6097_v60  ;;  %v6133_v54 = vpop.f32.mrb[19].mxu0 }
 0x526   : > { %v6134_v59 = vadd.f32 %v6133_v54, %v6132_v25 }
 0x527   : > { %v4772_v40 = vadd.f32 %v6099_v32, %v4702_v35 }
 0x529   : > { %v4842_v37 = vadd.f32 %v6134_v59, %v4772_v40 }
 0x543   : > { %v6167_v31 = vpop.f32.mrb[80].mxu1 }
 0x544   : > { %v6202_v62 = vpop.f32.mrb[20].mxu0  ;;  %v6168_v2 = vpop.f32.mrb[81].mxu1 }
 0x545   : > { %v6169_v42 = vadd.f32 %v6168_v2, %v6167_v31  ;;  %v6203_v49 = vpop.f32.mrb[21].mxu0 }
 0x546   : > { %v6204_v61 = vadd.f32 %v6203_v49, %v6202_v62 }
 0x547   : > { %v4912_v15 = vadd.f32 %v6169_v42, %v4842_v37 }
 0x549   : > { %v4982_v4 = vadd.f32 %v6204_v61, %v4912_v15 }
 0x563   : > { %v6237_v39 = vpop.f32.mrb[82].mxu1 }
 0x564   : > { %v6272_v14 = vpop.f32.mrb[22].mxu0  ;;  %v6238_v13 = vpop.f32.mrb[83].mxu1 }
 0x565   : > { %v6239_v11 = vadd.f32 %v6238_v13, %v6237_v39  ;;  %v6273_v55 = vpop.f32.mrb[23].mxu0 }
 0x566   : > { %v6274_v9 = vadd.f32 %v6273_v55, %v6272_v14 }
 0x567   : > { %v5052_v19 = vadd.f32 %v6239_v11, %v4982_v4 }
 0x569   : > { %v5122_v51 = vadd.f32 %v6274_v9, %v5052_v19 }
 0x583   : > { %v6307_v23 = vpop.f32.mrb[84].mxu1 }
 0x584   : > { %v6342_v34 = vpop.f32.mrb[24].mxu0  ;;  %v6308_v48 = vpop.f32.mrb[85].mxu1 }
 0x585   : > { %v6309_v27 = vadd.f32 %v6308_v48, %v6307_v23  ;;  %v6343_v44 = vpop.f32.mrb[25].mxu0 }
 0x586   : > { %v6344_v41 = vadd.f32 %v6343_v44, %v6342_v34 }
 0x587   : > { %v5192_v8 = vadd.f32 %v6309_v27, %v5122_v51 }
 0x589   : > { %v5262_v24 = vadd.f32 %v6344_v41, %v5192_v8 }
 0x58b   : > { %5266 = vst.msk [vmem:[%s270_s29] sm:$0x1] %vm5265_vm7, %v5262_v24 }
 0x58c   : > { %7432 = shalt.err (!%p7429_p3)
}
 0x58d   : > { %s7433_s18 = scalar_lea.hbm %s10185_s20, 16  ;;  %s7437_s22 = scalar_lea.hbm %s10234_s7, 32 }
 0x58e   : > { %p7434_p4 = scmp.ne.s32.totalorder %s10185_s20, %s7433_s18  ;;  %p7438_p9 = scmp.lt.u32.totalorder %s10185_s20, %s10234_s7 }
 0x58f   : > { %p7439_p10 = scmp.lt.u32.totalorder %s7437_s22, %s7433_s18  ;;  %p7441_p12 = scmp.lt.u32.totalorder %s7433_s18, %s10185_s20 }
 0x590   : > { %p7435_p7 = pnand %p7434_p4, %p7564_p5 }
 0x591   : > { %p7440_p11 = por %p7439_p10, %p7438_p9 }
 0x592   : > { %p7436_p8 = pneg %p7435_p7 }
 0x593   : > { %p7442_p13 = por %p7441_p12, %p7440_p11 }
 0x595   : > { %p7443_p0 = pnand %p7442_p13, %p7436_p8 }
 0x597   : > { %7446 = shalt.err (!%p7443_p0)
}
 0x598   : > { %7378 = dma.vmem_to_hbm [thread:$0]  (%p7564_p5), %s10187_s8, 16, %s10185_s20, %s5268_s15  }
 0x599 PF: > { %p7384_p1 = scmp.ge.s32.totalorder %s7481_s27, 2  ;;  %s5292_s9 = sand.u32 1, %s7469_s24  }
 0x59a   : > { %s5293_s14 = scalar_lea.sflag [#allocation4], %s5292_s9 }
 0x59b   : > { %p7381_p2 = pnand %p7384_p1, %p7568_p6 }
 0x59d   : > { %7464 = dma.done.wait (!%p7381_p2), %s5293_s14, 16  }
 0x59e   : > { %7466 = vsyncadd (!%p7381_p2), %s5293_s14, 4294967280  ;;  %p17_p3 = scmp.ge.s32.totalorder %s7551_s30, 4   ;;  %s10247_s24 = smov %s7473_s25 }
 0x59f   : > { %s10248_s25 = smov %s7477_s26  ;;  %s10249_s26 = smov %s7562_s10 }
 0x5a0   : > { %s10250_s27 = smov %s7551_s30  ;;  %19 = sbr.rel (!%p17_p3) target bundleno = 3 (0x3), region = 99 }
 0x5a7   :  { %5297 = vsyncpa [#allocation4], 1 }
 0x5a8   :  { %5299 = vsyncpa [#allocation4 + $0x1], 1 }

</bundles_post_ra>
